<compile_context>
chip_gen: v6e
topology: v6e:2x2x1
jax: 0.10.0
libtpu: 0.0.40
codegen_flags: <defaults>
</compile_context>

<pallas_src>
import jax
import jax.numpy as jnp
import numpy as np
from jax.experimental import pallas as pl
from jax.experimental.pallas import tpu as pltpu

N_ACTIONS = 110
ACT_PAD = ((N_ACTIONS + 127) // 128) * 128   # 128: lane-dense output store
HIDDEN = 128                                 # module default hidden_size
CONV_OUT_CH = 16
H_IMG, W_IMG = 4, 13
N_PIX = H_IMG * W_IMG                        # 52
N_IN = 52                                    # LSTM input features
CONV_FEATS = CONV_OUT_CH * N_PIX             # 832
WIH_ROWS = 56                                # 52 rounded up to a sublane group
SEQ_LEN = 8
BATCH = 2


# ----------------------------- Pallas kernel ------------------------------- #

def _dqn_kernel(img_ref, disc_ref, mask_ref, wconv_ref, wlstm_ref, bias_ref,
                wfc_hbm_ref, q_ref, wfc_vmem, wfc_sem):
    B = img_ref.shape[0]             # padded batch (multiple of 8)
    TB = disc_ref.shape[0]
    T = TB // B
    H = HIDDEN
    cdt = wconv_ref.dtype            # matmul operand dtype (f32 or bf16)

    # Kick off the DMA for the late-used fc weight pack NOW; it overlaps the
    # conv matmul and the 8-step recurrence and is waited on just before fc1.
    wfc_cp = pltpu.make_async_copy(wfc_hbm_ref, wfc_vmem, wfc_sem)
    wfc_cp.start()

    # f32 biases (exact even on the bf16 weight path), packed in one operand.
    conv_b = bias_ref[0:1, :CONV_FEATS]          # (1, 832)
    lstm_b = bias_ref[1:2, :4 * H]               # (1, 512)
    b1 = bias_ref[2:3, :H]                       # (1, 128)
    b2 = bias_ref[3:4, :ACT_PAD]                 # (1, 128)

    # conv (pre-folded into a dense matmul over the flattened board) + bias +
    # ReLU; output columns are already in PyTorch (c, h, w) flatten order.
    x1 = jnp.maximum(
        jnp.dot(img_ref[...].astype(cdt), wconv_ref[...],
                preferred_element_type=jnp.float32) + conv_b, 0.0)  # (B, 832)

    # LSTM input projection for ALL timesteps in one matmul; bias added once
    # (outside the serial loop).
    wih = wlstm_ref[0:N_IN, :]                    # (52, 4H)
    whh = wlstm_ref[WIH_ROWS:WIH_ROWS + H, :]     # (128, 4H), sublane-aligned
    xall = jnp.dot(disc_ref[...].astype(cdt), wih,
                   preferred_element_type=jnp.float32) + lstm_b     # (TB, 4H)

    def sig(x):
        # sigmoid via tanh: one EUP push instead of exp + divide.
        return 0.5 * (jnp.tanh(0.5 * x) + 1.0)

    h = jnp.zeros((B, H), jnp.float32)
    c = jnp.zeros((B, H), jnp.float32)
    # T is small and static -> unrolled; PyTorch gate order (i, f, g, o).
    # With H == 128 every gate slice is a whole 128-lane tile, and with B == 8
    # every x_t slice is a whole sublane group (no relayouts in the loop).
    for t in range(T):
        gates = xall[t * B:(t + 1) * B, :] + jnp.dot(
            h.astype(cdt), whh, preferred_element_type=jnp.float32)
        i = sig(gates[:, 0 * H:1 * H])
        f = sig(gates[:, 1 * H:2 * H])
        g = jnp.tanh(gates[:, 2 * H:3 * H])
        o = sig(gates[:, 3 * H:4 * H])
        c = f * c + i * g
        h = o * jnp.tanh(c)

    # fc weight pack must be resident from here on.
    wfc_cp.wait()
    w1a = wfc_vmem[0:CONV_FEATS, :]                          # (832, 128)
    w1b = wfc_vmem[CONV_FEATS:CONV_FEATS + H, :]             # (128, 128)
    w2 = wfc_vmem[CONV_FEATS + H:CONV_FEATS + 2 * H, :]      # (128, 128)

    # fc1 on cat([x1, h], dim=1) as two split matmuls (no in-kernel concat).
    z = jnp.maximum(
        jnp.dot(x1.astype(cdt), w1a, preferred_element_type=jnp.float32)
        + jnp.dot(h.astype(cdt), w1b, preferred_element_type=jnp.float32)
        + b1, 0.0)
    q = jnp.dot(z.astype(cdt), w2, preferred_element_type=jnp.float32) + b2
    q_ref[...] = jnp.where(mask_ref[...] != 0, q, jnp.full_like(q, -jnp.inf))


# ----------------------- parameter init & one-time prep -------------------- #

def init_params(key, hidden=HIDDEN):
    """Parameters in PyTorch layout (as the nn.Module stores them)."""
    ks = jax.random.split(key, 10)

    def rnd(k, shape, scale=0.1):
        return scale * jax.random.normal(k, shape, dtype=jnp.float32)

    return {
        "conv_w": rnd(ks[0], (CONV_OUT_CH, 1, 3, 3)),
        "conv_b": rnd(ks[1], (CONV_OUT_CH,)),
        "w_ih":   rnd(ks[2], (4 * hidden, N_IN)),
        "w_hh":   rnd(ks[3], (4 * hidden, hidden)),
        "b_ih":   rnd(ks[4], (4 * hidden,)),
        "b_hh":   rnd(ks[5], (4 * hidden,)),
        "fc1_w":  rnd(ks[6], (hidden, CONV_FEATS + hidden)),
        "fc1_b":  rnd(ks[7], (hidden,)),
        "fc2_w":  rnd(ks[8], (N_ACTIONS, hidden)),
        "fc2_b":  rnd(ks[9], (N_ACTIONS,)),
    }


def prep_params(params, compute_dtype=jnp.float32):
    """One-time (init-time) weight preprocessing -- nothing here runs per call."""
    H = int(np.asarray(params["w_hh"]).shape[1])
    assert H == HIDDEN, "kernel packing assumes the module default hidden_size"

    # Fold the 3x3 conv (padding=1) into a dense (52, 832) matrix over the
    # flattened 4x13 board; columns in PyTorch (c, h, w) flatten order.
    cw = np.asarray(params["conv_w"], np.float32)[:, 0]          # (16, 3, 3)
    cb = np.asarray(params["conv_b"], np.float32)                # (16,)
    wconv = np.zeros((N_PIX, CONV_FEATS), np.float32)
    for ch in range(CONV_OUT_CH):
        for hh in range(H_IMG):
            for ww in range(W_IMG):
                col = (ch * H_IMG + hh) * W_IMG + ww
                for kh in range(3):
                    for kw in range(3):
                        hi, wi = hh + kh - 1, ww + kw - 1
                        if 0 <= hi < H_IMG and 0 <= wi < W_IMG:
                            wconv[hi * W_IMG + wi, col] = cw[ch, kh, kw]

    # LSTM weights packed into one operand: rows [0:52] = w_ih^T,
    # rows [56:56+H] = w_hh^T (sublane-aligned start for the recurrence slice).
    wlstm = np.zeros((WIH_ROWS + H, 4 * H), np.float32)
    wlstm[:N_IN, :] = np.asarray(params["w_ih"], np.float32).T
    wlstm[WIH_ROWS:, :] = np.asarray(params["w_hh"], np.float32).T

    # fc weights packed: [0:832]=fc1 conv-block, [832:960]=fc1 lstm-block,
    # [960:1088]=fc2 (padded 110 -> 128 output lanes).
    fc1_w = np.asarray(params["fc1_w"], np.float32)
    wfc = np.zeros((CONV_FEATS + 2 * H, ACT_PAD), np.float32)
    wfc[:CONV_FEATS, :H] = fc1_w[:, :CONV_FEATS].T
    wfc[CONV_FEATS:CONV_FEATS + H, :H] = fc1_w[:, CONV_FEATS:].T
    wfc[CONV_FEATS + H:, :N_ACTIONS] = np.asarray(params["fc2_w"],
                                                  np.float32).T

    # Biases stay exact f32 (also on the bf16 weight path), packed in one op.
    bias = np.zeros((4, CONV_FEATS), np.float32)
    bias[0, :] = np.repeat(cb, N_PIX)                            # (c,h,w) order
    bias[1, :4 * H] = (np.asarray(params["b_ih"], np.float32)
                       + np.asarray(params["b_hh"], np.float32))
    bias[2, :H] = np.asarray(params["fc1_b"], np.float32)
    bias[3, :N_ACTIONS] = np.asarray(params["fc2_b"], np.float32)

    cdt = compute_dtype
    return {
        "wconv": jnp.asarray(wconv, cdt),
        "wlstm": jnp.asarray(wlstm, cdt),
        "wfc":   jnp.asarray(wfc, cdt),
        "bias":  jnp.asarray(bias, jnp.float32),
    }


# ------------------------------ forward wrapper ----------------------------- #

def dqn_forward(prep, hand_matrix, discard_history, valid_actions_mask):
    B = hand_matrix.shape[0]
    T = discard_history.shape[1]
    BP = ((B + 7) // 8) * 8        # pad batch to a full f32 sublane group

    # Per-call glue touches only the tiny activation tensors.
    img = hand_matrix.astype(jnp.float32).reshape(B, N_PIX)
    img = jnp.pad(img, ((0, BP - B), (0, 0)))                    # (BP, 52)

    disc = jnp.pad(discard_history.astype(jnp.float32),
                   ((0, BP - B), (0, 0), (0, 0)))                # (BP, T, 52)
    disc_tm = jnp.transpose(disc, (1, 0, 2)).reshape(T * BP, N_IN)

    maskp = jnp.pad(valid_actions_mask.astype(jnp.int32),
                    ((0, BP - B), (0, ACT_PAD - N_ACTIONS)))     # (BP, 128)

    q_pad = pl.pallas_call(
        _dqn_kernel,
        out_shape=jax.ShapeDtypeStruct((BP, ACT_PAD), jnp.float32),
        in_specs=[pl.BlockSpec(memory_space=pltpu.MemorySpace.VMEM)] * 6
                 + [pl.BlockSpec(memory_space=pl.ANY)],   # wfc: manual DMA
        out_specs=pl.BlockSpec(memory_space=pltpu.MemorySpace.VMEM),
        scratch_shapes=[
            pltpu.VMEM((CONV_FEATS + 2 * HIDDEN, ACT_PAD), prep["wfc"].dtype),
            pltpu.SemaphoreType.DMA,
        ],
    )(img, disc_tm, maskp, prep["wconv"], prep["wlstm"], prep["bias"],
      prep["wfc"])
    # Consumers must slice off the padded batch rows and action lanes (-inf).
    return q_pad[:B, :N_ACTIONS]


# ------------------------- pure-JAX reference check ------------------------- #

def dqn_reference(params, hand, disc, mask, hidden=HIDDEN):
    B = hand.shape[0]
    xp = jnp.pad(hand[:, 0].astype(jnp.float32), ((0, 0), (1, 1), (1, 1)))
    w = params["conv_w"][:, 0]                                     # (16, 3, 3)
    outs = []
    for o in range(CONV_OUT_CH):
        acc = jnp.zeros((B, H_IMG, W_IMG), jnp.float32)
        for kh in range(3):
            for kw in range(3):
                acc = acc + xp[:, kh:kh + H_IMG, kw:kw + W_IMG] * w[o, kh, kw]
        outs.append(acc + params["conv_b"][o])
    x1 = jnp.maximum(jnp.stack(outs, axis=1), 0.0).reshape(B, -1)  # (c,h,w)

    h = jnp.zeros((B, hidden), jnp.float32)
    c = jnp.zeros((B, hidden), jnp.float32)
    for t in range(disc.shape[1]):
        xt = disc[:, t].astype(jnp.float32)
        gates = (xt @ params["w_ih"].T + h @ params["w_hh"].T
                 + params["b_ih"] + params["b_hh"])
        i = jax.nn.sigmoid(gates[:, :hidden])
        f = jax.nn.sigmoid(gates[:, hidden:2 * hidden])
        g = jnp.tanh(gates[:, 2 * hidden:3 * hidden])
        o = jax.nn.sigmoid(gates[:, 3 * hidden:])
        c = f * c + i * g
        h = o * jnp.tanh(c)

    x = jnp.concatenate([x1, h], axis=1)
    z = jnp.maximum(x @ params["fc1_w"].T + params["fc1_b"], 0.0)
    q = z @ params["fc2_w"].T + params["fc2_b"]
    return jnp.where(mask, q, -jnp.inf)


if __name__ == "__main__":
    key = jax.random.PRNGKey(0)
    kp, k1, k2, k3 = jax.random.split(key, 4)
    params = init_params(kp)

    hand_matrix = jax.random.bernoulli(
        k1, 0.3, (BATCH, 1, H_IMG, W_IMG)).astype(jnp.float32)
    discard_history = jax.random.normal(
        k2, (BATCH, SEQ_LEN, 52), dtype=jnp.float32)
    valid_actions_mask = jax.random.bernoulli(k3, 0.5, (BATCH, N_ACTIONS))

    q_ref = dqn_reference(params, hand_matrix, discard_history,
                          valid_actions_mask)
    fwd = jax.jit(dqn_forward)

    # f32 weight path (parity with the f32 reference).
    prep_f32 = prep_params(params, compute_dtype=jnp.float32)
    q = jax.block_until_ready(
        fwd(prep_f32, hand_matrix, discard_history, valid_actions_mask))
    assert q.shape == (BATCH, N_ACTIONS)
    assert np.allclose(np.asarray(q), np.asarray(q_ref), rtol=2e-3, atol=2e-3)

    # bf16 matmul-operand path (MXU-native on all generations; accumulation,
    # biases, gates and cell state stay f32).
    prep_bf16 = prep_params(params, compute_dtype=jnp.bfloat16)
    q_bf16 = jax.block_until_ready(
        fwd(prep_bf16, hand_matrix, discard_history, valid_actions_mask))
    assert np.allclose(np.asarray(q_bf16), np.asarray(q_ref),
                       rtol=6e-2, atol=6e-2)

    print("KERNEL_OK")
</pallas_src>

<mosaic_0001>
module attributes {stable_mosaic.version = 11 : i64} {
  func.func @_dqn_kernel(%arg0: memref<8x52xf32, #tpu.memory_space<vmem>>, %arg1: memref<64x52xf32, #tpu.memory_space<vmem>>, %arg2: memref<8x128xi32, #tpu.memory_space<vmem>>, %arg3: memref<52x832xf32, #tpu.memory_space<vmem>>, %arg4: memref<184x512xf32, #tpu.memory_space<vmem>>, %arg5: memref<4x832xf32, #tpu.memory_space<vmem>>, %arg6: memref<1088x128xf32, #tpu.memory_space<any>>, %arg7: memref<8x128xf32, #tpu.memory_space<vmem>>, %arg8: memref<1088x128xf32, #tpu.memory_space<vmem>>, %arg9: memref<!tpu.dma_semaphore, #tpu.memory_space<semaphore_mem>>) attributes {dimension_semantics = [], scalar_prefetch = 0 : i64, scratch_operands = 2 : i64, tpu.core_type = #tpu.core_type<tc>} {
    tpu.enqueue_dma source(%arg6 : memref<1088x128xf32, #tpu.memory_space<any>>) target(%arg8 : memref<1088x128xf32, #tpu.memory_space<vmem>>) target_semaphore(%arg9 : memref<!tpu.dma_semaphore, #tpu.memory_space<semaphore_mem>>)
    %c0 = arith.constant 0 : index
    %c0_0 = arith.constant 0 : index
    %0 = vector.load %arg5[%c0, %c0_0] : memref<4x832xf32, #tpu.memory_space<vmem>>, vector<1x832xf32>
    %c1 = arith.constant 1 : index
    %c0_1 = arith.constant 0 : index
    %1 = vector.load %arg5[%c1, %c0_1] : memref<4x832xf32, #tpu.memory_space<vmem>>, vector<1x512xf32>
    %c2 = arith.constant 2 : index
    %c0_2 = arith.constant 0 : index
    %2 = vector.load %arg5[%c2, %c0_2] : memref<4x832xf32, #tpu.memory_space<vmem>>, vector<1x128xf32>
    %c3 = arith.constant 3 : index
    %c0_3 = arith.constant 0 : index
    %3 = vector.load %arg5[%c3, %c0_3] : memref<4x832xf32, #tpu.memory_space<vmem>>, vector<1x128xf32>
    %c0_4 = arith.constant 0 : index
    %c0_5 = arith.constant 0 : index
    %4 = vector.load %arg0[%c0_4, %c0_5] : memref<8x52xf32, #tpu.memory_space<vmem>>, vector<8x52xf32>
    %c0_6 = arith.constant 0 : index
    %c0_7 = arith.constant 0 : index
    %5 = vector.load %arg3[%c0_6, %c0_7] : memref<52x832xf32, #tpu.memory_space<vmem>>, vector<52x832xf32>
    %cst = arith.constant dense<0.000000e+00> : vector<8x832xf32>
    %6 = tpu.matmul %4, %5, %cst {dimension_numbers = #tpu.dot_dimension_numbers<[1], [0], [0], [1], [0, 0, 1, 1], [], []>} : vector<8x52xf32>, vector<52x832xf32>, vector<8x832xf32> -> vector<8x832xf32>
    %7 = vector.broadcast %0 : vector<1x832xf32> to vector<8x832xf32>
    %8 = arith.addf %6, %7 : vector<8x832xf32>
    %cst_8 = arith.constant 0.000000e+00 : f32
    %9 = vector.broadcast %cst_8 : f32 to vector<8x832xf32>
    %10 = arith.maximumf %8, %9 : vector<8x832xf32>
    %c0_9 = arith.constant 0 : index
    %c0_10 = arith.constant 0 : index
    %11 = vector.load %arg4[%c0_9, %c0_10] : memref<184x512xf32, #tpu.memory_space<vmem>>, vector<52x512xf32>
    %c56 = arith.constant 56 : index
    %c0_11 = arith.constant 0 : index
    %12 = vector.load %arg4[%c56, %c0_11] : memref<184x512xf32, #tpu.memory_space<vmem>>, vector<128x512xf32>
    %c0_12 = arith.constant 0 : index
    %c0_13 = arith.constant 0 : index
    %13 = vector.load %arg1[%c0_12, %c0_13] : memref<64x52xf32, #tpu.memory_space<vmem>>, vector<64x52xf32>
    %cst_14 = arith.constant dense<0.000000e+00> : vector<64x512xf32>
    %14 = tpu.matmul %13, %11, %cst_14 {dimension_numbers = #tpu.dot_dimension_numbers<[1], [0], [0], [1], [0, 0, 1, 1], [], []>} : vector<64x52xf32>, vector<52x512xf32>, vector<64x512xf32> -> vector<64x512xf32>
    %15 = vector.broadcast %1 : vector<1x512xf32> to vector<64x512xf32>
    %16 = arith.addf %14, %15 : vector<64x512xf32>
    %cst_15 = arith.constant 0.000000e+00 : f32
    %17 = vector.broadcast %cst_15 : f32 to vector<8x128xf32>
    %cst_16 = arith.constant 0.000000e+00 : f32
    %18 = vector.broadcast %cst_16 : f32 to vector<8x128xf32>
    %19 = vector.extract_strided_slice %16 {offsets = [0, 0], sizes = [8, 512], strides = [1, 1]} : vector<64x512xf32> to vector<8x512xf32>
    %cst_17 = arith.constant dense<0.000000e+00> : vector<8x512xf32>
    %20 = tpu.matmul %17, %12, %cst_17 {dimension_numbers = #tpu.dot_dimension_numbers<[1], [0], [0], [1], [0, 0, 1, 1], [], []>} : vector<8x128xf32>, vector<128x512xf32>, vector<8x512xf32> -> vector<8x512xf32>
    %21 = arith.addf %19, %20 : vector<8x512xf32>
    %22 = vector.extract_strided_slice %21 {offsets = [0, 0], sizes = [8, 128], strides = [1, 1]} : vector<8x512xf32> to vector<8x128xf32>
    %cst_18 = arith.constant 5.000000e-01 : f32
    %23 = vector.broadcast %cst_18 : f32 to vector<8x128xf32>
    %24 = arith.mulf %23, %22 : vector<8x128xf32>
    %25 = math.tanh %24 : vector<8x128xf32>
    %cst_19 = arith.constant 1.000000e+00 : f32
    %26 = vector.broadcast %cst_19 : f32 to vector<8x128xf32>
    %27 = arith.addf %25, %26 : vector<8x128xf32>
    %cst_20 = arith.constant 5.000000e-01 : f32
    %28 = vector.broadcast %cst_20 : f32 to vector<8x128xf32>
    %29 = arith.mulf %28, %27 : vector<8x128xf32>
    %30 = vector.extract_strided_slice %21 {offsets = [0, 128], sizes = [8, 128], strides = [1, 1]} : vector<8x512xf32> to vector<8x128xf32>
    %cst_21 = arith.constant 5.000000e-01 : f32
    %31 = vector.broadcast %cst_21 : f32 to vector<8x128xf32>
    %32 = arith.mulf %31, %30 : vector<8x128xf32>
    %33 = math.tanh %32 : vector<8x128xf32>
    %cst_22 = arith.constant 1.000000e+00 : f32
    %34 = vector.broadcast %cst_22 : f32 to vector<8x128xf32>
    %35 = arith.addf %33, %34 : vector<8x128xf32>
    %cst_23 = arith.constant 5.000000e-01 : f32
    %36 = vector.broadcast %cst_23 : f32 to vector<8x128xf32>
    %37 = arith.mulf %36, %35 : vector<8x128xf32>
    %38 = vector.extract_strided_slice %21 {offsets = [0, 256], sizes = [8, 128], strides = [1, 1]} : vector<8x512xf32> to vector<8x128xf32>
    %39 = math.tanh %38 : vector<8x128xf32>
    %40 = vector.extract_strided_slice %21 {offsets = [0, 384], sizes = [8, 128], strides = [1, 1]} : vector<8x512xf32> to vector<8x128xf32>
    %cst_24 = arith.constant 5.000000e-01 : f32
    %41 = vector.broadcast %cst_24 : f32 to vector<8x128xf32>
    %42 = arith.mulf %41, %40 : vector<8x128xf32>
    %43 = math.tanh %42 : vector<8x128xf32>
    %cst_25 = arith.constant 1.000000e+00 : f32
    %44 = vector.broadcast %cst_25 : f32 to vector<8x128xf32>
    %45 = arith.addf %43, %44 : vector<8x128xf32>
    %cst_26 = arith.constant 5.000000e-01 : f32
    %46 = vector.broadcast %cst_26 : f32 to vector<8x128xf32>
    %47 = arith.mulf %46, %45 : vector<8x128xf32>
    %48 = arith.mulf %37, %18 : vector<8x128xf32>
    %49 = arith.mulf %29, %39 : vector<8x128xf32>
    %50 = arith.addf %48, %49 : vector<8x128xf32>
    %51 = math.tanh %50 : vector<8x128xf32>
    %52 = arith.mulf %47, %51 : vector<8x128xf32>
    %53 = vector.extract_strided_slice %16 {offsets = [8, 0], sizes = [8, 512], strides = [1, 1]} : vector<64x512xf32> to vector<8x512xf32>
    %cst_27 = arith.constant dense<0.000000e+00> : vector<8x512xf32>
    %54 = tpu.matmul %52, %12, %cst_27 {dimension_numbers = #tpu.dot_dimension_numbers<[1], [0], [0], [1], [0, 0, 1, 1], [], []>} : vector<8x128xf32>, vector<128x512xf32>, vector<8x512xf32> -> vector<8x512xf32>
    %55 = arith.addf %53, %54 : vector<8x512xf32>
    %56 = vector.extract_strided_slice %55 {offsets = [0, 0], sizes = [8, 128], strides = [1, 1]} : vector<8x512xf32> to vector<8x128xf32>
    %cst_28 = arith.constant 5.000000e-01 : f32
    %57 = vector.broadcast %cst_28 : f32 to vector<8x128xf32>
    %58 = arith.mulf %57, %56 : vector<8x128xf32>
    %59 = math.tanh %58 : vector<8x128xf32>
    %cst_29 = arith.constant 1.000000e+00 : f32
    %60 = vector.broadcast %cst_29 : f32 to vector<8x128xf32>
    %61 = arith.addf %59, %60 : vector<8x128xf32>
    %cst_30 = arith.constant 5.000000e-01 : f32
    %62 = vector.broadcast %cst_30 : f32 to vector<8x128xf32>
    %63 = arith.mulf %62, %61 : vector<8x128xf32>
    %64 = vector.extract_strided_slice %55 {offsets = [0, 128], sizes = [8, 128], strides = [1, 1]} : vector<8x512xf32> to vector<8x128xf32>
    %cst_31 = arith.constant 5.000000e-01 : f32
    %65 = vector.broadcast %cst_31 : f32 to vector<8x128xf32>
    %66 = arith.mulf %65, %64 : vector<8x128xf32>
    %67 = math.tanh %66 : vector<8x128xf32>
    %cst_32 = arith.constant 1.000000e+00 : f32
    %68 = vector.broadcast %cst_32 : f32 to vector<8x128xf32>
    %69 = arith.addf %67, %68 : vector<8x128xf32>
    %cst_33 = arith.constant 5.000000e-01 : f32
    %70 = vector.broadcast %cst_33 : f32 to vector<8x128xf32>
    %71 = arith.mulf %70, %69 : vector<8x128xf32>
    %72 = vector.extract_strided_slice %55 {offsets = [0, 256], sizes = [8, 128], strides = [1, 1]} : vector<8x512xf32> to vector<8x128xf32>
    %73 = math.tanh %72 : vector<8x128xf32>
    %74 = vector.extract_strided_slice %55 {offsets = [0, 384], sizes = [8, 128], strides = [1, 1]} : vector<8x512xf32> to vector<8x128xf32>
    %cst_34 = arith.constant 5.000000e-01 : f32
    %75 = vector.broadcast %cst_34 : f32 to vector<8x128xf32>
    %76 = arith.mulf %75, %74 : vector<8x128xf32>
    %77 = math.tanh %76 : vector<8x128xf32>
    %cst_35 = arith.constant 1.000000e+00 : f32
    %78 = vector.broadcast %cst_35 : f32 to vector<8x128xf32>
    %79 = arith.addf %77, %78 : vector<8x128xf32>
    %cst_36 = arith.constant 5.000000e-01 : f32
    %80 = vector.broadcast %cst_36 : f32 to vector<8x128xf32>
    %81 = arith.mulf %80, %79 : vector<8x128xf32>
    %82 = arith.mulf %71, %50 : vector<8x128xf32>
    %83 = arith.mulf %63, %73 : vector<8x128xf32>
    %84 = arith.addf %82, %83 : vector<8x128xf32>
    %85 = math.tanh %84 : vector<8x128xf32>
    %86 = arith.mulf %81, %85 : vector<8x128xf32>
    %87 = vector.extract_strided_slice %16 {offsets = [16, 0], sizes = [8, 512], strides = [1, 1]} : vector<64x512xf32> to vector<8x512xf32>
    %cst_37 = arith.constant dense<0.000000e+00> : vector<8x512xf32>
    %88 = tpu.matmul %86, %12, %cst_37 {dimension_numbers = #tpu.dot_dimension_numbers<[1], [0], [0], [1], [0, 0, 1, 1], [], []>} : vector<8x128xf32>, vector<128x512xf32>, vector<8x512xf32> -> vector<8x512xf32>
    %89 = arith.addf %87, %88 : vector<8x512xf32>
    %90 = vector.extract_strided_slice %89 {offsets = [0, 0], sizes = [8, 128], strides = [1, 1]} : vector<8x512xf32> to vector<8x128xf32>
    %cst_38 = arith.constant 5.000000e-01 : f32
    %91 = vector.broadcast %cst_38 : f32 to vector<8x128xf32>
    %92 = arith.mulf %91, %90 : vector<8x128xf32>
    %93 = math.tanh %92 : vector<8x128xf32>
    %cst_39 = arith.constant 1.000000e+00 : f32
    %94 = vector.broadcast %cst_39 : f32 to vector<8x128xf32>
    %95 = arith.addf %93, %94 : vector<8x128xf32>
    %cst_40 = arith.constant 5.000000e-01 : f32
    %96 = vector.broadcast %cst_40 : f32 to vector<8x128xf32>
    %97 = arith.mulf %96, %95 : vector<8x128xf32>
    %98 = vector.extract_strided_slice %89 {offsets = [0, 128], sizes = [8, 128], strides = [1, 1]} : vector<8x512xf32> to vector<8x128xf32>
    %cst_41 = arith.constant 5.000000e-01 : f32
    %99 = vector.broadcast %cst_41 : f32 to vector<8x128xf32>
    %100 = arith.mulf %99, %98 : vector<8x128xf32>
    %101 = math.tanh %100 : vector<8x128xf32>
    %cst_42 = arith.constant 1.000000e+00 : f32
    %102 = vector.broadcast %cst_42 : f32 to vector<8x128xf32>
    %103 = arith.addf %101, %102 : vector<8x128xf32>
    %cst_43 = arith.constant 5.000000e-01 : f32
    %104 = vector.broadcast %cst_43 : f32 to vector<8x128xf32>
    %105 = arith.mulf %104, %103 : vector<8x128xf32>
    %106 = vector.extract_strided_slice %89 {offsets = [0, 256], sizes = [8, 128], strides = [1, 1]} : vector<8x512xf32> to vector<8x128xf32>
    %107 = math.tanh %106 : vector<8x128xf32>
    %108 = vector.extract_strided_slice %89 {offsets = [0, 384], sizes = [8, 128], strides = [1, 1]} : vector<8x512xf32> to vector<8x128xf32>
    %cst_44 = arith.constant 5.000000e-01 : f32
    %109 = vector.broadcast %cst_44 : f32 to vector<8x128xf32>
    %110 = arith.mulf %109, %108 : vector<8x128xf32>
    %111 = math.tanh %110 : vector<8x128xf32>
    %cst_45 = arith.constant 1.000000e+00 : f32
    %112 = vector.broadcast %cst_45 : f32 to vector<8x128xf32>
    %113 = arith.addf %111, %112 : vector<8x128xf32>
    %cst_46 = arith.constant 5.000000e-01 : f32
    %114 = vector.broadcast %cst_46 : f32 to vector<8x128xf32>
    %115 = arith.mulf %114, %113 : vector<8x128xf32>
    %116 = arith.mulf %105, %84 : vector<8x128xf32>
    %117 = arith.mulf %97, %107 : vector<8x128xf32>
    %118 = arith.addf %116, %117 : vector<8x128xf32>
    %119 = math.tanh %118 : vector<8x128xf32>
    %120 = arith.mulf %115, %119 : vector<8x128xf32>
    %121 = vector.extract_strided_slice %16 {offsets = [24, 0], sizes = [8, 512], strides = [1, 1]} : vector<64x512xf32> to vector<8x512xf32>
    %cst_47 = arith.constant dense<0.000000e+00> : vector<8x512xf32>
    %122 = tpu.matmul %120, %12, %cst_47 {dimension_numbers = #tpu.dot_dimension_numbers<[1], [0], [0], [1], [0, 0, 1, 1], [], []>} : vector<8x128xf32>, vector<128x512xf32>, vector<8x512xf32> -> vector<8x512xf32>
    %123 = arith.addf %121, %122 : vector<8x512xf32>
    %124 = vector.extract_strided_slice %123 {offsets = [0, 0], sizes = [8, 128], strides = [1, 1]} : vector<8x512xf32> to vector<8x128xf32>
    %cst_48 = arith.constant 5.000000e-01 : f32
    %125 = vector.broadcast %cst_48 : f32 to vector<8x128xf32>
    %126 = arith.mulf %125, %124 : vector<8x128xf32>
    %127 = math.tanh %126 : vector<8x128xf32>
    %cst_49 = arith.constant 1.000000e+00 : f32
    %128 = vector.broadcast %cst_49 : f32 to vector<8x128xf32>
    %129 = arith.addf %127, %128 : vector<8x128xf32>
    %cst_50 = arith.constant 5.000000e-01 : f32
    %130 = vector.broadcast %cst_50 : f32 to vector<8x128xf32>
    %131 = arith.mulf %130, %129 : vector<8x128xf32>
    %132 = vector.extract_strided_slice %123 {offsets = [0, 128], sizes = [8, 128], strides = [1, 1]} : vector<8x512xf32> to vector<8x128xf32>
    %cst_51 = arith.constant 5.000000e-01 : f32
    %133 = vector.broadcast %cst_51 : f32 to vector<8x128xf32>
    %134 = arith.mulf %133, %132 : vector<8x128xf32>
    %135 = math.tanh %134 : vector<8x128xf32>
    %cst_52 = arith.constant 1.000000e+00 : f32
    %136 = vector.broadcast %cst_52 : f32 to vector<8x128xf32>
    %137 = arith.addf %135, %136 : vector<8x128xf32>
    %cst_53 = arith.constant 5.000000e-01 : f32
    %138 = vector.broadcast %cst_53 : f32 to vector<8x128xf32>
    %139 = arith.mulf %138, %137 : vector<8x128xf32>
    %140 = vector.extract_strided_slice %123 {offsets = [0, 256], sizes = [8, 128], strides = [1, 1]} : vector<8x512xf32> to vector<8x128xf32>
    %141 = math.tanh %140 : vector<8x128xf32>
    %142 = vector.extract_strided_slice %123 {offsets = [0, 384], sizes = [8, 128], strides = [1, 1]} : vector<8x512xf32> to vector<8x128xf32>
    %cst_54 = arith.constant 5.000000e-01 : f32
    %143 = vector.broadcast %cst_54 : f32 to vector<8x128xf32>
    %144 = arith.mulf %143, %142 : vector<8x128xf32>
    %145 = math.tanh %144 : vector<8x128xf32>
    %cst_55 = arith.constant 1.000000e+00 : f32
    %146 = vector.broadcast %cst_55 : f32 to vector<8x128xf32>
    %147 = arith.addf %145, %146 : vector<8x128xf32>
    %cst_56 = arith.constant 5.000000e-01 : f32
    %148 = vector.broadcast %cst_56 : f32 to vector<8x128xf32>
    %149 = arith.mulf %148, %147 : vector<8x128xf32>
    %150 = arith.mulf %139, %118 : vector<8x128xf32>
    %151 = arith.mulf %131, %141 : vector<8x128xf32>
    %152 = arith.addf %150, %151 : vector<8x128xf32>
    %153 = math.tanh %152 : vector<8x128xf32>
    %154 = arith.mulf %149, %153 : vector<8x128xf32>
    %155 = vector.extract_strided_slice %16 {offsets = [32, 0], sizes = [8, 512], strides = [1, 1]} : vector<64x512xf32> to vector<8x512xf32>
    %cst_57 = arith.constant dense<0.000000e+00> : vector<8x512xf32>
    %156 = tpu.matmul %154, %12, %cst_57 {dimension_numbers = #tpu.dot_dimension_numbers<[1], [0], [0], [1], [0, 0, 1, 1], [], []>} : vector<8x128xf32>, vector<128x512xf32>, vector<8x512xf32> -> vector<8x512xf32>
    %157 = arith.addf %155, %156 : vector<8x512xf32>
    %158 = vector.extract_strided_slice %157 {offsets = [0, 0], sizes = [8, 128], strides = [1, 1]} : vector<8x512xf32> to vector<8x128xf32>
    %cst_58 = arith.constant 5.000000e-01 : f32
    %159 = vector.broadcast %cst_58 : f32 to vector<8x128xf32>
    %160 = arith.mulf %159, %158 : vector<8x128xf32>
    %161 = math.tanh %160 : vector<8x128xf32>
    %cst_59 = arith.constant 1.000000e+00 : f32
    %162 = vector.broadcast %cst_59 : f32 to vector<8x128xf32>
    %163 = arith.addf %161, %162 : vector<8x128xf32>
    %cst_60 = arith.constant 5.000000e-01 : f32
    %164 = vector.broadcast %cst_60 : f32 to vector<8x128xf32>
    %165 = arith.mulf %164, %163 : vector<8x128xf32>
    %166 = vector.extract_strided_slice %157 {offsets = [0, 128], sizes = [8, 128], strides = [1, 1]} : vector<8x512xf32> to vector<8x128xf32>
    %cst_61 = arith.constant 5.000000e-01 : f32
    %167 = vector.broadcast %cst_61 : f32 to vector<8x128xf32>
    %168 = arith.mulf %167, %166 : vector<8x128xf32>
    %169 = math.tanh %168 : vector<8x128xf32>
    %cst_62 = arith.constant 1.000000e+00 : f32
    %170 = vector.broadcast %cst_62 : f32 to vector<8x128xf32>
    %171 = arith.addf %169, %170 : vector<8x128xf32>
    %cst_63 = arith.constant 5.000000e-01 : f32
    %172 = vector.broadcast %cst_63 : f32 to vector<8x128xf32>
    %173 = arith.mulf %172, %171 : vector<8x128xf32>
    %174 = vector.extract_strided_slice %157 {offsets = [0, 256], sizes = [8, 128], strides = [1, 1]} : vector<8x512xf32> to vector<8x128xf32>
    %175 = math.tanh %174 : vector<8x128xf32>
    %176 = vector.extract_strided_slice %157 {offsets = [0, 384], sizes = [8, 128], strides = [1, 1]} : vector<8x512xf32> to vector<8x128xf32>
    %cst_64 = arith.constant 5.000000e-01 : f32
    %177 = vector.broadcast %cst_64 : f32 to vector<8x128xf32>
    %178 = arith.mulf %177, %176 : vector<8x128xf32>
    %179 = math.tanh %178 : vector<8x128xf32>
    %cst_65 = arith.constant 1.000000e+00 : f32
    %180 = vector.broadcast %cst_65 : f32 to vector<8x128xf32>
    %181 = arith.addf %179, %180 : vector<8x128xf32>
    %cst_66 = arith.constant 5.000000e-01 : f32
    %182 = vector.broadcast %cst_66 : f32 to vector<8x128xf32>
    %183 = arith.mulf %182, %181 : vector<8x128xf32>
    %184 = arith.mulf %173, %152 : vector<8x128xf32>
    %185 = arith.mulf %165, %175 : vector<8x128xf32>
    %186 = arith.addf %184, %185 : vector<8x128xf32>
    %187 = math.tanh %186 : vector<8x128xf32>
    %188 = arith.mulf %183, %187 : vector<8x128xf32>
    %189 = vector.extract_strided_slice %16 {offsets = [40, 0], sizes = [8, 512], strides = [1, 1]} : vector<64x512xf32> to vector<8x512xf32>
    %cst_67 = arith.constant dense<0.000000e+00> : vector<8x512xf32>
    %190 = tpu.matmul %188, %12, %cst_67 {dimension_numbers = #tpu.dot_dimension_numbers<[1], [0], [0], [1], [0, 0, 1, 1], [], []>} : vector<8x128xf32>, vector<128x512xf32>, vector<8x512xf32> -> vector<8x512xf32>
    %191 = arith.addf %189, %190 : vector<8x512xf32>
    %192 = vector.extract_strided_slice %191 {offsets = [0, 0], sizes = [8, 128], strides = [1, 1]} : vector<8x512xf32> to vector<8x128xf32>
    %cst_68 = arith.constant 5.000000e-01 : f32
    %193 = vector.broadcast %cst_68 : f32 to vector<8x128xf32>
    %194 = arith.mulf %193, %192 : vector<8x128xf32>
    %195 = math.tanh %194 : vector<8x128xf32>
    %cst_69 = arith.constant 1.000000e+00 : f32
    %196 = vector.broadcast %cst_69 : f32 to vector<8x128xf32>
    %197 = arith.addf %195, %196 : vector<8x128xf32>
    %cst_70 = arith.constant 5.000000e-01 : f32
    %198 = vector.broadcast %cst_70 : f32 to vector<8x128xf32>
    %199 = arith.mulf %198, %197 : vector<8x128xf32>
    %200 = vector.extract_strided_slice %191 {offsets = [0, 128], sizes = [8, 128], strides = [1, 1]} : vector<8x512xf32> to vector<8x128xf32>
    %cst_71 = arith.constant 5.000000e-01 : f32
    %201 = vector.broadcast %cst_71 : f32 to vector<8x128xf32>
    %202 = arith.mulf %201, %200 : vector<8x128xf32>
    %203 = math.tanh %202 : vector<8x128xf32>
    %cst_72 = arith.constant 1.000000e+00 : f32
    %204 = vector.broadcast %cst_72 : f32 to vector<8x128xf32>
    %205 = arith.addf %203, %204 : vector<8x128xf32>
    %cst_73 = arith.constant 5.000000e-01 : f32
    %206 = vector.broadcast %cst_73 : f32 to vector<8x128xf32>
    %207 = arith.mulf %206, %205 : vector<8x128xf32>
    %208 = vector.extract_strided_slice %191 {offsets = [0, 256], sizes = [8, 128], strides = [1, 1]} : vector<8x512xf32> to vector<8x128xf32>
    %209 = math.tanh %208 : vector<8x128xf32>
    %210 = vector.extract_strided_slice %191 {offsets = [0, 384], sizes = [8, 128], strides = [1, 1]} : vector<8x512xf32> to vector<8x128xf32>
    %cst_74 = arith.constant 5.000000e-01 : f32
    %211 = vector.broadcast %cst_74 : f32 to vector<8x128xf32>
    %212 = arith.mulf %211, %210 : vector<8x128xf32>
    %213 = math.tanh %212 : vector<8x128xf32>
    %cst_75 = arith.constant 1.000000e+00 : f32
    %214 = vector.broadcast %cst_75 : f32 to vector<8x128xf32>
    %215 = arith.addf %213, %214 : vector<8x128xf32>
    %cst_76 = arith.constant 5.000000e-01 : f32
    %216 = vector.broadcast %cst_76 : f32 to vector<8x128xf32>
    %217 = arith.mulf %216, %215 : vector<8x128xf32>
    %218 = arith.mulf %207, %186 : vector<8x128xf32>
    %219 = arith.mulf %199, %209 : vector<8x128xf32>
    %220 = arith.addf %218, %219 : vector<8x128xf32>
    %221 = math.tanh %220 : vector<8x128xf32>
    %222 = arith.mulf %217, %221 : vector<8x128xf32>
    %223 = vector.extract_strided_slice %16 {offsets = [48, 0], sizes = [8, 512], strides = [1, 1]} : vector<64x512xf32> to vector<8x512xf32>
    %cst_77 = arith.constant dense<0.000000e+00> : vector<8x512xf32>
    %224 = tpu.matmul %222, %12, %cst_77 {dimension_numbers = #tpu.dot_dimension_numbers<[1], [0], [0], [1], [0, 0, 1, 1], [], []>} : vector<8x128xf32>, vector<128x512xf32>, vector<8x512xf32> -> vector<8x512xf32>
    %225 = arith.addf %223, %224 : vector<8x512xf32>
    %226 = vector.extract_strided_slice %225 {offsets = [0, 0], sizes = [8, 128], strides = [1, 1]} : vector<8x512xf32> to vector<8x128xf32>
    %cst_78 = arith.constant 5.000000e-01 : f32
    %227 = vector.broadcast %cst_78 : f32 to vector<8x128xf32>
    %228 = arith.mulf %227, %226 : vector<8x128xf32>
    %229 = math.tanh %228 : vector<8x128xf32>
    %cst_79 = arith.constant 1.000000e+00 : f32
    %230 = vector.broadcast %cst_79 : f32 to vector<8x128xf32>
    %231 = arith.addf %229, %230 : vector<8x128xf32>
    %cst_80 = arith.constant 5.000000e-01 : f32
    %232 = vector.broadcast %cst_80 : f32 to vector<8x128xf32>
    %233 = arith.mulf %232, %231 : vector<8x128xf32>
    %234 = vector.extract_strided_slice %225 {offsets = [0, 128], sizes = [8, 128], strides = [1, 1]} : vector<8x512xf32> to vector<8x128xf32>
    %cst_81 = arith.constant 5.000000e-01 : f32
    %235 = vector.broadcast %cst_81 : f32 to vector<8x128xf32>
    %236 = arith.mulf %235, %234 : vector<8x128xf32>
    %237 = math.tanh %236 : vector<8x128xf32>
    %cst_82 = arith.constant 1.000000e+00 : f32
    %238 = vector.broadcast %cst_82 : f32 to vector<8x128xf32>
    %239 = arith.addf %237, %238 : vector<8x128xf32>
    %cst_83 = arith.constant 5.000000e-01 : f32
    %240 = vector.broadcast %cst_83 : f32 to vector<8x128xf32>
    %241 = arith.mulf %240, %239 : vector<8x128xf32>
    %242 = vector.extract_strided_slice %225 {offsets = [0, 256], sizes = [8, 128], strides = [1, 1]} : vector<8x512xf32> to vector<8x128xf32>
    %243 = math.tanh %242 : vector<8x128xf32>
    %244 = vector.extract_strided_slice %225 {offsets = [0, 384], sizes = [8, 128], strides = [1, 1]} : vector<8x512xf32> to vector<8x128xf32>
    %cst_84 = arith.constant 5.000000e-01 : f32
    %245 = vector.broadcast %cst_84 : f32 to vector<8x128xf32>
    %246 = arith.mulf %245, %244 : vector<8x128xf32>
    %247 = math.tanh %246 : vector<8x128xf32>
    %cst_85 = arith.constant 1.000000e+00 : f32
    %248 = vector.broadcast %cst_85 : f32 to vector<8x128xf32>
    %249 = arith.addf %247, %248 : vector<8x128xf32>
    %cst_86 = arith.constant 5.000000e-01 : f32
    %250 = vector.broadcast %cst_86 : f32 to vector<8x128xf32>
    %251 = arith.mulf %250, %249 : vector<8x128xf32>
    %252 = arith.mulf %241, %220 : vector<8x128xf32>
    %253 = arith.mulf %233, %243 : vector<8x128xf32>
    %254 = arith.addf %252, %253 : vector<8x128xf32>
    %255 = math.tanh %254 : vector<8x128xf32>
    %256 = arith.mulf %251, %255 : vector<8x128xf32>
    %257 = vector.extract_strided_slice %16 {offsets = [56, 0], sizes = [8, 512], strides = [1, 1]} : vector<64x512xf32> to vector<8x512xf32>
    %cst_87 = arith.constant dense<0.000000e+00> : vector<8x512xf32>
    %258 = tpu.matmul %256, %12, %cst_87 {dimension_numbers = #tpu.dot_dimension_numbers<[1], [0], [0], [1], [0, 0, 1, 1], [], []>} : vector<8x128xf32>, vector<128x512xf32>, vector<8x512xf32> -> vector<8x512xf32>
    %259 = arith.addf %257, %258 : vector<8x512xf32>
    %260 = vector.extract_strided_slice %259 {offsets = [0, 0], sizes = [8, 128], strides = [1, 1]} : vector<8x512xf32> to vector<8x128xf32>
    %cst_88 = arith.constant 5.000000e-01 : f32
    %261 = vector.broadcast %cst_88 : f32 to vector<8x128xf32>
    %262 = arith.mulf %261, %260 : vector<8x128xf32>
    %263 = math.tanh %262 : vector<8x128xf32>
    %cst_89 = arith.constant 1.000000e+00 : f32
    %264 = vector.broadcast %cst_89 : f32 to vector<8x128xf32>
    %265 = arith.addf %263, %264 : vector<8x128xf32>
    %cst_90 = arith.constant 5.000000e-01 : f32
    %266 = vector.broadcast %cst_90 : f32 to vector<8x128xf32>
    %267 = arith.mulf %266, %265 : vector<8x128xf32>
    %268 = vector.extract_strided_slice %259 {offsets = [0, 128], sizes = [8, 128], strides = [1, 1]} : vector<8x512xf32> to vector<8x128xf32>
    %cst_91 = arith.constant 5.000000e-01 : f32
    %269 = vector.broadcast %cst_91 : f32 to vector<8x128xf32>
    %270 = arith.mulf %269, %268 : vector<8x128xf32>
    %271 = math.tanh %270 : vector<8x128xf32>
    %cst_92 = arith.constant 1.000000e+00 : f32
    %272 = vector.broadcast %cst_92 : f32 to vector<8x128xf32>
    %273 = arith.addf %271, %272 : vector<8x128xf32>
    %cst_93 = arith.constant 5.000000e-01 : f32
    %274 = vector.broadcast %cst_93 : f32 to vector<8x128xf32>
    %275 = arith.mulf %274, %273 : vector<8x128xf32>
    %276 = vector.extract_strided_slice %259 {offsets = [0, 256], sizes = [8, 128], strides = [1, 1]} : vector<8x512xf32> to vector<8x128xf32>
    %277 = math.tanh %276 : vector<8x128xf32>
    %278 = vector.extract_strided_slice %259 {offsets = [0, 384], sizes = [8, 128], strides = [1, 1]} : vector<8x512xf32> to vector<8x128xf32>
    %cst_94 = arith.constant 5.000000e-01 : f32
    %279 = vector.broadcast %cst_94 : f32 to vector<8x128xf32>
    %280 = arith.mulf %279, %278 : vector<8x128xf32>
    %281 = math.tanh %280 : vector<8x128xf32>
    %cst_95 = arith.constant 1.000000e+00 : f32
    %282 = vector.broadcast %cst_95 : f32 to vector<8x128xf32>
    %283 = arith.addf %281, %282 : vector<8x128xf32>
    %cst_96 = arith.constant 5.000000e-01 : f32
    %284 = vector.broadcast %cst_96 : f32 to vector<8x128xf32>
    %285 = arith.mulf %284, %283 : vector<8x128xf32>
    %286 = arith.mulf %275, %254 : vector<8x128xf32>
    %287 = arith.mulf %267, %277 : vector<8x128xf32>
    %288 = arith.addf %286, %287 : vector<8x128xf32>
    %289 = math.tanh %288 : vector<8x128xf32>
    %290 = arith.mulf %285, %289 : vector<8x128xf32>
    tpu.wait_dma2 semaphore(%arg9 : memref<!tpu.dma_semaphore, #tpu.memory_space<semaphore_mem>>) src(%arg6 : memref<1088x128xf32, #tpu.memory_space<any>>) dst(%arg8 : memref<1088x128xf32, #tpu.memory_space<vmem>>)
    %c0_97 = arith.constant 0 : index
    %c0_98 = arith.constant 0 : index
    %291 = vector.load %arg8[%c0_97, %c0_98] : memref<1088x128xf32, #tpu.memory_space<vmem>>, vector<832x128xf32>
    %c832 = arith.constant 832 : index
    %c0_99 = arith.constant 0 : index
    %292 = vector.load %arg8[%c832, %c0_99] : memref<1088x128xf32, #tpu.memory_space<vmem>>, vector<128x128xf32>
    %c960 = arith.constant 960 : index
    %c0_100 = arith.constant 0 : index
    %293 = vector.load %arg8[%c960, %c0_100] : memref<1088x128xf32, #tpu.memory_space<vmem>>, vector<128x128xf32>
    %cst_101 = arith.constant dense<0.000000e+00> : vector<8x128xf32>
    %294 = tpu.matmul %10, %291, %cst_101 {dimension_numbers = #tpu.dot_dimension_numbers<[1], [0], [0], [1], [0, 0, 1, 1], [], []>} : vector<8x832xf32>, vector<832x128xf32>, vector<8x128xf32> -> vector<8x128xf32>
    %cst_102 = arith.constant dense<0.000000e+00> : vector<8x128xf32>
    %295 = tpu.matmul %290, %292, %cst_102 {dimension_numbers = #tpu.dot_dimension_numbers<[1], [0], [0], [1], [0, 0, 1, 1], [], []>} : vector<8x128xf32>, vector<128x128xf32>, vector<8x128xf32> -> vector<8x128xf32>
    %296 = arith.addf %294, %295 : vector<8x128xf32>
    %297 = vector.broadcast %2 : vector<1x128xf32> to vector<8x128xf32>
    %298 = arith.addf %296, %297 : vector<8x128xf32>
    %cst_103 = arith.constant 0.000000e+00 : f32
    %299 = vector.broadcast %cst_103 : f32 to vector<8x128xf32>
    %300 = arith.maximumf %298, %299 : vector<8x128xf32>
    %cst_104 = arith.constant dense<0.000000e+00> : vector<8x128xf32>
    %301 = tpu.matmul %300, %293, %cst_104 {dimension_numbers = #tpu.dot_dimension_numbers<[1], [0], [0], [1], [0, 0, 1, 1], [], []>} : vector<8x128xf32>, vector<128x128xf32>, vector<8x128xf32> -> vector<8x128xf32>
    %302 = vector.broadcast %3 : vector<1x128xf32> to vector<8x128xf32>
    %303 = arith.addf %301, %302 : vector<8x128xf32>
    %c0_105 = arith.constant 0 : index
    %c0_106 = arith.constant 0 : index
    %304 = vector.load %arg2[%c0_105, %c0_106] : memref<8x128xi32, #tpu.memory_space<vmem>>, vector<8x128xi32>
    %c0_i32 = arith.constant 0 : i32
    %305 = vector.broadcast %c0_i32 : i32 to vector<8x128xi32>
    %306 = arith.cmpi ne, %304, %305 : vector<8x128xi32>
    %cst_107 = arith.constant 0xFF800000 : f32
    %307 = vector.broadcast %cst_107 : f32 to vector<8x128xf32>
    %308 = arith.select %306, %303, %307 : vector<8x128xi1>, vector<8x128xf32>
    %c0_108 = arith.constant 0 : index
    %c0_109 = arith.constant 0 : index
    %309 = vector.load %arg7[%c0_108, %c0_109] : memref<8x128xf32, #tpu.memory_space<vmem>>, vector<8x128xf32>
    tpu.vector_store %arg7[%c0_108, %c0_109], %308 {strides = array<i32>} : memref<8x128xf32, #tpu.memory_space<vmem>>, vector<8x128xf32>,
    return
  }
}

</mosaic_0001>

<bundles_post_ra>
// kernel: dqn_forward.1
= control target key start
LH: loop header
LB: loop body
LE: loop exit
PB: predicated region body
PF: predicated region fallthrough
CT: control target
= control target key end

     0   :  { %12 = vsyncpa [#allocation5], 0  ;;  %s4498_s0 = inlined_call_operand.vmem [shape: f32[8,52], index: 0, kind: input, shape index: {}]   ;;  %s4499_s1 = inlined_call_operand.vmem [shape: f32[64,52], index: 1, kind: input, shape index: {}]   ;;  %s4500_s2 = inlined_call_operand.vmem [shape: s32[8,128], index: 2, kind: input, shape index: {}]   ;;  %s4501_s3 = inlined_call_operand.hbm [shape: f32[52,832], index: 3, kind: input, shape index: {}]   ;;  %s4502_s4 = inlined_call_operand.hbm [shape: f32[184,512], index: 4, kind: input, shape index: {}]   ;;  %s4503_s5 = inlined_call_operand.vmem [shape: f32[4,832], index: 5, kind: input, shape index: {}]   ;;  %s4504_s6 = inlined_call_operand.hbm [shape: f32[1088,128], index: 6, kind: input, shape index: {}]   ;;  %s4505_s7 = inlined_call_operand.vmem [shape: f32[8,128], index: 7, kind: output, shape index: {}]  }
   0x1   :  { %13 = vsyncpa [#allocation7], 0  ;;  %s3271_s24 = smov [#allocation4]  }
   0x2   :  { %s25_s25 = sshll.u32 %s3271_s24, 4  ;;  %s26_s25 = int_to_ptr.vmem [resolvable:$true] %s25_s25 }
   0x3   :  { %s3213_s26 = scalar_lea.vmem %s26_s25, 6272  ;;  %p3218_p1 = scmp.lt.s32.totalorder %s26_s25, %s26_s25 }
   0x4   :  { %p3214_p0 = scmp.ne.s32.totalorder %s26_s25, %s3213_s26  ;;  %p3219_p2 = scmp.lt.s32.totalorder %s3213_s26, %s3213_s26 }
   0x6   :  { %p3220_p3 = por %p3219_p2, %p3218_p1 }
   0x8   :  { %p3221_p4 = pnand %p3220_p3, %p3214_p0 }
   0xa   :  { %3224 = shalt.err (!%p3221_p4)
}
   0xb   :  { %s3272_s27 = smov 896   ;;  %s3273_s28 = smov 56  }
   0xc   :  { %31 = dma.hbm_to_vmem [thread:$0]  %s4501_s3, 6272, %s26_s25, [#allocation5], %s3272_s27, %s3272_s27, %s3273_s28  }
   0xd   :  { %s3274_s8 = smov [#allocation6]  }
   0xe   :  { %s37_s9 = sshll.u32 %s3274_s8, 4  ;;  %s38_s9 = int_to_ptr.vmem [resolvable:$true] %s37_s9 }
   0xf   :  { %s3233_s10 = scalar_lea.vmem %s38_s9, 11776  ;;  %p3238_p6 = scmp.lt.s32.totalorder %s38_s9, %s38_s9 }
  0x10   :  { %p3234_p5 = scmp.ne.s32.totalorder %s38_s9, %s3233_s10  ;;  %p3239_p7 = scmp.lt.s32.totalorder %s3233_s10, %s3233_s10 }
  0x12   :  { %p3240_p8 = por %p3239_p7, %p3238_p6 }
  0x14   :  { %p3241_p9 = pnand %p3240_p8, %p3234_p5 }
  0x16   :  { %3244 = shalt.err (!%p3241_p9)
}
  0x17   :  { %s3275_s11 = smov 512   ;;  %s3276_s12 = smov 32  }
  0x18   :  { %43 = dma.hbm_to_vmem [thread:$0]  %s4502_s4, 11776, %s38_s9, [#allocation7], %s3275_s11, %s3275_s11, %s3276_s12  }
  0x19   :  { %3265 = dma.done.wait [#allocation5], 6272  }
  0x1a   :  { %3266 = vsyncadd [#allocation5], 4294961024 }
  0x1b   :  { %3267 = dma.done.wait [#allocation7], 11776  }
  0x1c   :  { %3268 = vsyncadd [#allocation7], 4294955520  ;;  %v4509_v0 = vmov 0.0   ;;  %vm3278_vm0 = vmmov 0   ;;  %vm158_vm1 = vcmask 1043456   ;;  %v105_v5 = vld [vmem:[#allocation4 + $0x120] sm:$0xff] }
  0x1d   :  { %2946 = vmatprep.subr.mxu1 %v4509_v0  ;;  %244 = vmatprep.mubr.f32.mxu0 %v4509_v0  ;;  %v3333_v1 = vld [vmem:[%s4503_s5 + $0x2] ss:$0 sm:$0xff]  ;;  %v3338_v2 = vld [vmem:[%s4503_s5 + $0x3] ss:$0 sm:$0xff]  ;;  %v112_v3 = vld [vmem:[#allocation4 + $0x158] sm:$0xf] }
  0x1e   :  { %2960 = vmatprep.mubr.msk.f32.mxu1 %vm3278_vm0, %v4509_v0  ;;  %4604 = vst [vmem:[#allocation15_spill] sm:$0xff] %v3333_v1  ;;  %4605 = vst [vmem:[#allocation16_spill] sm:$0xff] %v3338_v2  ;;  %2755 = vmatprep.subr.msk.mxu0 %vm158_vm1, %v112_v3  ;;  %v111_v4 = vld [vmem:[#allocation4 + $0x150] sm:$0xf]  ;;  %v104_v6 = vld [vmem:[#allocation4 + $0x118] sm:$0xff]  ;;  %vm154_vm2 = vcmask 424960  }
  0x1f   :  { %2756 = vmatpush1.msk.msra.mxu0 %vm158_vm1, %v111_v4  ;;  %v98_v7 = vld [vmem:[#allocation4 + $0xe8] sm:$0xff]  ;;  %v97_v8 = vld [vmem:[#allocation4 + $0xe0] sm:$0xff]  ;;  %v91_v10 = vld [vmem:[#allocation4 + $0xb0] sm:$0xff] }
  0x20   :  { %200 = vmatprep.subr.mxu0 %v105_v5  ;;  %v117_v9 = vld [vmem:[#allocation4 + $0x180] sm:$0xf]  ;;  %v110_v11 = vld [vmem:[#allocation4 + $0x148] sm:$0xff]  ;;  %v103_v13 = vld [vmem:[#allocation4 + $0x110] sm:$0xff] }
  0x21   :  { %201 = vmatpush1.msra.mxu0 %v104_v6  ;;  %2947 = vmatpush3.msk.msra.mxu1 %vm158_vm1, %v117_v9  ;;  %v90_v12 = vld [vmem:[#allocation4 + $0xa8] sm:$0xff]  ;;  %v84_v14 = vld [vmem:[#allocation4 + $0x78] sm:$0xff]  ;;  %v83_v15 = vld [vmem:[#allocation4 + $0x70] sm:$0xff] }
  0x22   :  { %202 = vmatprep.subr.mxu0 %v98_v7  ;;  %2948 = vmatprep.subr.mxu1 %v4509_v0  ;;  %v96_v16 = vld [vmem:[#allocation4 + $0xd8] sm:$0xff]  ;;  %v77_v17 = vld [vmem:[#allocation4 + $0x40] sm:$0xff]  ;;  %v70_v20 = vld [vmem:[#allocation4 + $0x8] sm:$0xff] }
  0x23   :  { %203 = vmatpush1.msra.mxu0 %v97_v8  ;;  %2949 = vmatpush3.msra.mxu1 %v110_v11  ;;  %v76_v18 = vld [vmem:[#allocation4 + $0x38] sm:$0xff]  ;;  %v89_v19 = vld [vmem:[#allocation4 + $0xa0] sm:$0xff]  ;;  %v82_v22 = vld [vmem:[#allocation4 + $0x68] sm:$0xff] }
  0x24   :  { %204 = vmatprep.subr.mxu0 %v91_v10  ;;  %2950 = vmatprep.subr.mxu1 %v4509_v0  ;;  %v69_v21 = vld [vmem:[#allocation4] sm:$0xff]  ;;  %v114_v24 = vld [vmem:[#allocation4 + $0x168] sm:$0xf]  ;;  %v107_v26 = vld [vmem:[#allocation4 + $0x130] sm:$0xff] }
  0x25   :  { %205 = vmatpush1.msra.mxu0 %v90_v12  ;;  %2951 = vmatpush3.msra.mxu1 %v103_v13  ;;  %v3350_v23 = vld [vmem:[%s4498_s0] sm:$0xff]  ;;  %v75_v27 = vld [vmem:[#allocation4 + $0x30] sm:$0xff]  ;;  %v106_v28 = vld [vmem:[#allocation4 + $0x128] sm:$0xff] }
  0x26   :  { %206 = vmatprep.subr.mxu0 %v84_v14  ;;  %2952 = vmatprep.subr.mxu1 %v4509_v0  ;;  %v113_v25 = vld [vmem:[#allocation4 + $0x160] sm:$0xf]  ;;  %v100_v30 = vld [vmem:[#allocation4 + $0xf8] sm:$0xff]  ;;  %v99_v31 = vld [vmem:[#allocation4 + $0xf0] sm:$0xff] }
  0x27   :  { %207 = vmatpush1.msra.mxu0 %v83_v15  ;;  %2953 = vmatpush3.msra.mxu1 %v96_v16  ;;  %v497_v29 = vld [vmem:[#allocation6 + $0xd8] sm:$0xf]  ;;  %v496_v32 = vld [vmem:[#allocation6 + $0xd0] sm:$0xf]  ;;  %v86_v37 = vld [vmem:[#allocation4 + $0x88] sm:$0xff] }
  0x28   :  { %208 = vmatprep.subr.mxu0 %v77_v17  ;;  %2954 = vmatprep.subr.mxu1 %v4509_v0  ;;  %v93_v33 = vld [vmem:[#allocation4 + $0xc0] sm:$0xff]  ;;  %v92_v35 = vld [vmem:[#allocation4 + $0xb8] sm:$0xff]  ;;  %v79_v41 = vld [vmem:[#allocation4 + $0x50] sm:$0xff] }
  0x29   :  { %209 = vmatpush1.msra.mxu0 %v76_v18  ;;  %2955 = vmatpush3.msra.mxu1 %v89_v19  ;;  %v493_v34 = vld [vmem:[#allocation6 + $0xb8] sm:$0xff]  ;;  %v492_v36 = vld [vmem:[#allocation6 + $0xb0] sm:$0xff]  ;;  %v78_v43 = vld [vmem:[#allocation4 + $0x48] sm:$0xff] }
  0x2a   :  { %210 = vmatprep.subr.mxu0 %v70_v20  ;;  %2956 = vmatprep.subr.mxu1 %v4509_v0  ;;  %v489_v38 = vld [vmem:[#allocation6 + $0x98] sm:$0xff]  ;;  %v488_v40 = vld [vmem:[#allocation6 + $0x90] sm:$0xff]  ;;  %v71_v46 = vld [vmem:[#allocation4 + $0x10] sm:$0xff] }
  0x2b   :  { %211 = vmatpush1.msra.mxu0 %v69_v21  ;;  %2957 = vmatpush3.msra.mxu1 %v82_v22  ;;  %v85_v39 = vld [vmem:[#allocation4 + $0x80] sm:$0xff]  ;;  %v484_v44 = vld [vmem:[#allocation6 + $0x70] sm:$0xff]  ;;  %v115_v50 = vld [vmem:[#allocation4 + $0x170] sm:$0xf] }
  0x2c   :  { %2757 = vmatmul.mubr.msk.f32.vlgmr.msra.gmra.mxu0 %vm154_vm2, %v3350_v23  ;;  %2758 = vmatprep.subr.msk.mxu0 %vm158_vm1, %v114_v24  ;;  %v485_v42 = vld [vmem:[#allocation6 + $0x78] sm:$0xff]  ;;  %v72_v45 = vld [vmem:[#allocation4 + $0x18] sm:$0xff]  ;;  %v102_v56 = vld [vmem:[#allocation4 + $0x108] sm:$0xff] }
  0x2d   :  { %2759 = vmatpush1.msk.msra.mxu0 %vm158_vm1, %v113_v25  ;;  %2958 = vmatprep.subr.mxu1 %v4509_v0  ;;  %v481_v47 = vld [vmem:[#allocation6 + $0x58] sm:$0xff]  ;;  %v116_v48 = vld [vmem:[#allocation4 + $0x178] sm:$0xf]  ;;  %v95_v61 = vld [vmem:[#allocation4 + $0xd0] sm:$0xff] }
  0x2e   :  { %271 = vmatprep.subr.mxu0 %v107_v26  ;;  %2959 = vmatpush3.msra.mxu1 %v75_v27  ;;  %v480_v49 = vld [vmem:[#allocation6 + $0x50] sm:$0xff]  ;;  %v477_v51 = vld [vmem:[#allocation6 + $0x38] sm:$0xff]  ;;  %v94_v63 = vld [vmem:[#allocation4 + $0xc8] sm:$0xff] }
  0x2f   :  { %272 = vmatpush1.msra.mxu0 %v106_v28  ;;  %2776 = vmatprep.subr.msk.mxu1 %vm158_vm1, %v497_v29  ;;  %v109_v52 = vld [vmem:[#allocation4 + $0x140] sm:$0xff]  ;;  %v476_v53 = vld [vmem:[#allocation6 + $0x30] sm:$0xff]  ;;  %v87_v6 = vld [vmem:[#allocation4 + $0x90] sm:$0xff] }
  0x30   :  { %273 = vmatprep.subr.mxu0 %v100_v30  ;;  %2961 = vmatmul.mubr.msk.f32.vlgmr.msra.gmra.mxu1 %vm154_vm2, %v3350_v23  ;;  %v108_v54 = vld [vmem:[#allocation4 + $0x138] sm:$0xff]  ;;  %v473_v55 = vld [vmem:[#allocation6 + $0x18] sm:$0xff]  ;;  %v3388_v7 = vld [vmem:[%s4499_s1 + $0x8] sm:$0xff] }
  0x31   :  { %274 = vmatpush1.msra.mxu0 %v99_v31  ;;  %2777 = vmatpush1.msk.msra.mxu1 %vm158_vm1, %v496_v32  ;;  %v472_v57 = vld [vmem:[#allocation6 + $0x10] sm:$0xff]  ;;  %v101_v58 = vld [vmem:[#allocation4 + $0x100] sm:$0xff]  ;;  %v74_v13 = vld [vmem:[#allocation4 + $0x28] sm:$0xff] }
  0x32   :  { %275 = vmatprep.subr.mxu0 %v93_v33  ;;  %760 = vmatprep.subr.mxu1 %v493_v34  ;;  %v3370_v59 = vld [vmem:[%s4499_s1] sm:$0xff]  ;;  %v3375_v62 = vld [vmem:[#allocation6 + $0x2d0] sm:$0xff]  ;;  %v3409_v16 = vld [vmem:[%s4499_s1 + $0x10] sm:$0xff] }
  0x33   :  { %276 = vmatpush1.msra.mxu0 %v92_v35  ;;  %761 = vmatpush1.msra.mxu1 %v492_v36  ;;  %v3372_v60 = vld [vmem:[#allocation6 + $0x2d8] sm:$0xff]  ;;  %v88_v4 = vld [vmem:[#allocation4 + $0x98] sm:$0xff]  ;;  %v495_v18 = vld [vmem:[#allocation6 + $0xc8] sm:$0xf] }
  0x34   :  { %277 = vmatprep.subr.mxu0 %v86_v37  ;;  %762 = vmatprep.subr.mxu1 %v489_v38  ;;  %4606 = vst [vmem:[#allocation17_spill] sm:$0xff] %v3372_v60  ;;  %v3379_v3 = vld [vmem:[#allocation6 + $0x2b8] sm:$0xff]  ;;  %v3382_v5 = vld [vmem:[#allocation6 + $0x2b0] sm:$0xff]  ;;  %v494_v20 = vld [vmem:[#allocation6 + $0xc0] sm:$0xf] }
  0x35   :  { %278 = vmatpush1.msra.mxu0 %v85_v39  ;;  %763 = vmatpush1.msra.mxu1 %v488_v40  ;;  %v3391_v8 = vld [vmem:[#allocation6 + $0x298] sm:$0xff]  ;;  %v3395_v10 = vld [vmem:[#allocation6 + $0x290] sm:$0xff]  ;;  %v491_v22 = vld [vmem:[#allocation6 + $0xa8] sm:$0xff] }
  0x36   :  { %279 = vmatprep.subr.mxu0 %v79_v41  ;;  %764 = vmatprep.subr.mxu1 %v485_v42  ;;  %v81_v9 = vld [vmem:[#allocation4 + $0x60] sm:$0xff]  ;;  %4607 = vst [vmem:[#allocation18_spill] sm:$0xff] %v3395_v10  ;;  %v80_v11 = vld [vmem:[#allocation4 + $0x58] sm:$0xff]  ;;  %v490_v25 = vld [vmem:[#allocation6 + $0xa0] sm:$0xff] }
  0x37   :  { %280 = vmatpush1.msra.mxu0 %v78_v43  ;;  %765 = vmatpush1.msra.mxu1 %v484_v44  ;;  %v3399_v12 = vld [vmem:[#allocation6 + $0x278] sm:$0xff]  ;;  %v3402_v14 = vld [vmem:[#allocation6 + $0x270] sm:$0xff]  ;;  %v486_v29 = vld [vmem:[#allocation6 + $0x80] sm:$0xff] }
  0x38   :  { %281 = vmatprep.subr.mxu0 %v72_v45  ;;  %315 = vmatprep.mubr.f32.mxu0 %v4509_v0  ;;  %4608 = vst [vmem:[#allocation19_spill] sm:$0xff] %v3399_v12  ;;  %v73_v15 = vld [vmem:[#allocation4 + $0x20] sm:$0xff]  ;;  %v3416_v19 = vld [vmem:[#allocation6 + $0x250] sm:$0xff]  ;;  %v483_v31 = vld [vmem:[#allocation6 + $0x68] sm:$0xff] }
  0x39   :  { %282 = vmatpush1.msra.mxu0 %v71_v46  ;;  %766 = vmatprep.subr.mxu1 %v481_v47  ;;  %v3411_v17 = vld [vmem:[#allocation6 + $0x258] sm:$0xff]  ;;  %v3426_v24 = vld [vmem:[#allocation6 + $0x230] sm:$0xff]  ;;  %v482_v33 = vld [vmem:[#allocation6 + $0x60] sm:$0xff] }
  0x3a   :  { %2760 = vmatmul.mubr.msk.f32.vlgmr.msra.gmra.mxu0 %vm154_vm2, %v3350_v23  ;;  %2761 = vmatprep.subr.msk.mxu0 %vm158_vm1, %v116_v48  ;;  %v3421_v21 = vld [vmem:[#allocation6 + $0x238] sm:$0xff]  ;;  %v3433_v26 = vld [vmem:[%s4499_s1 + $0x18] sm:$0xff]  ;;  %v479_v36 = vld [vmem:[#allocation6 + $0x48] sm:$0xff] }
  0x3b   :  { %767 = vmatpush1.msra.mxu1 %v480_v49  ;;  %2762 = vmatpush1.msk.msra.mxu0 %vm158_vm1, %v115_v50  ;;  %v3436_v27 = vld [vmem:[#allocation6 + $0x218] sm:$0xff]  ;;  %v3440_v28 = vld [vmem:[#allocation6 + $0x210] sm:$0xff]  ;;  %v478_v38 = vld [vmem:[#allocation6 + $0x40] sm:$0xff] }
  0x3c   :  { %768 = vmatprep.subr.mxu1 %v477_v51  ;;  %342 = vmatprep.subr.mxu0 %v109_v52  ;;  %v3444_v30 = vld [vmem:[#allocation6 + $0x1f8] sm:$0xff]  ;;  %v3447_v32 = vld [vmem:[#allocation6 + $0x1f0] sm:$0xff]  ;;  %v475_v40 = vld [vmem:[#allocation6 + $0x28] sm:$0xff] }
  0x3d   :  { %769 = vmatpush1.msra.mxu1 %v476_v53  ;;  %343 = vmatpush1.msra.mxu0 %v108_v54  ;;  %v3453_v34 = vld [vmem:[%s4499_s1 + $0x20] sm:$0xff]  ;;  %v3460_v37 = vld [vmem:[#allocation6 + $0x1d0] sm:$0xff]  ;;  %v474_v42 = vld [vmem:[#allocation6 + $0x20] sm:$0xff] }
  0x3e   :  { %770 = vmatprep.subr.mxu1 %v473_v55  ;;  %344 = vmatprep.subr.mxu0 %v102_v56  ;;  %v3456_v35 = vld [vmem:[#allocation6 + $0x1d8] sm:$0xff]  ;;  %v3467_v41 = vld [vmem:[#allocation6 + $0x1b0] sm:$0xff]  ;;  %v3473_v43 = vld [vmem:[%s4499_s1 + $0x28] sm:$0xff] }
  0x3f   :  { %771 = vmatpush1.msra.mxu1 %v472_v57  ;;  %804 = vmatprep.mubr.f32.mxu1 %v4509_v0  ;;  %v3464_v39 = vld [vmem:[#allocation6 + $0x1b8] sm:$0xff]  ;;  %v471_v45 = vld [vmem:[#allocation6 + $0x8] sm:$0xff]  ;;  %v3480_v46 = vld [vmem:[#allocation6 + $0x190] sm:$0xff] }
  0x40   :  { %345 = vmatpush1.msra.mxu0 %v101_v58  ;;  %2778 = vmatmul.mubr.msk.f32.vlgmr.msra.gmra.mxu1 %vm154_vm2, %v3370_v59  ;;  %v3476_v44 = vld [vmem:[#allocation6 + $0x198] sm:$0xff]  ;;  %v470_v47 = vld [vmem:[#allocation6] sm:$0xff]  ;;  %v3488_v49 = vld [vmem:[#allocation6 + $0x2c8] sm:$0xff] }
  0x41   :  { %924 = vmatprep.subr.mxu1 %v3372_v60  ;;  %346 = vmatprep.subr.mxu0 %v95_v61  ;;  %v3484_v48 = vld [vmem:[#allocation6 + $0x178] sm:$0xff]  ;;  %4610 = vst [vmem:[#allocation21_spill] sm:$0xff] %v3488_v49  ;;  %v3490_v50 = vld [vmem:[#allocation6 + $0x170] sm:$0xff]  ;;  %v3497_v51 = vld [vmem:[%s4499_s1 + $0x30] sm:$0xff] }
  0x42   :  { %925 = vmatpush1.msra.mxu1 %v3375_v62  ;;  %347 = vmatpush1.msra.mxu0 %v94_v63  ;;  %4609 = vst [vmem:[#allocation20_spill] sm:$0xff] %v3484_v48  ;;  %4611 = vst [vmem:[#allocation22_spill] sm:$0xff] %v3490_v50  ;;  %v3499_v52 = vld [vmem:[#allocation6 + $0x2c0] sm:$0xff]  ;;  %v3504_v53 = vld [vmem:[#allocation6 + $0x158] sm:$0xff] }
  0x43   :  { %926 = vmatprep.subr.mxu1 %v3379_v3  ;;  %348 = vmatprep.subr.mxu0 %v88_v4  ;;  %4612 = vst [vmem:[#allocation23_spill] sm:$0xff] %v3504_v53  ;;  %v3506_v54 = vld [vmem:[#allocation6 + $0x2a8] sm:$0xff]  ;;  %v3510_v55 = vld [vmem:[#allocation6 + $0x150] sm:$0xff]  ;;  %v3515_v56 = vld [vmem:[#allocation6 + $0x2a0] sm:$0xff] }
  0x44   :  { %810 = vmatprep.mubr.f32.mxu1 %v4509_v0  ;;  %927 = vmatpush1.msra.mxu1 %v3382_v5  ;;  %4613 = vst [vmem:[#allocation24_spill] sm:$0xff] %v3510_v55  ;;  %v3517_v57 = vld [vmem:[#allocation6 + $0x138] sm:$0xff]  ;;  %v3523_v58 = vld [vmem:[#allocation6 + $0x288] sm:$0xff]  ;;  %v3532_v61 = vld [vmem:[%s4499_s1 + $0x38] sm:$0xff] }
  0x45   :  { %349 = vmatpush1.msra.mxu0 %v87_v6  ;;  %2779 = vmatmul.mubr.msk.f32.gmra.mxu1 %vm154_vm2, %v3388_v7  ;;  %4614 = vst [vmem:[#allocation25_spill] sm:$0xff] %v3517_v57  ;;  %v3534_v63 = vld [vmem:[#allocation6 + $0x280] sm:$0xff]  ;;  %v3539_v4 = vld [vmem:[#allocation6 + $0x118] sm:$0xff]  ;;  %v3541_v6 = vld [vmem:[#allocation6 + $0x268] sm:$0xff] }
  0x46   :  { %928 = vmatprep.subr.mxu1 %v3391_v8  ;;  %350 = vmatprep.subr.mxu0 %v81_v9  ;;  %4616 = vst [vmem:[#allocation27_spill] sm:$0xff] %v3539_v4  ;;  %v3545_v9 = vld [vmem:[#allocation6 + $0x110] sm:$0xff]  ;;  %v3635_v2 = vld [vmem:[#allocation6 + $0x128] sm:$0xff] }
  0x47   :  { %929 = vmatpush1.msra.mxu1 %v3395_v10  ;;  %351 = vmatpush1.msra.mxu0 %v80_v11  ;;  %4617 = vst [vmem:[#allocation28_spill] sm:$0xff] %v3545_v9  ;;  %v3550_v11 = vld [vmem:[#allocation6 + $0x260] sm:$0xff]  ;;  %4623 = vst [vmem:[#allocation34_spill] sm:$0xff] %v3635_v2  ;;  %v3645_v1 = vld [vmem:[#allocation6 + $0x108] sm:$0xff] }
  0x48   :  { %930 = vmatprep.subr.mxu1 %v3399_v12  ;;  %352 = vmatprep.subr.mxu0 %v74_v13  ;;  %v3556_v13 = vld [vmem:[#allocation6 + $0x248] sm:$0xff]  ;;  %4625 = vst [vmem:[#allocation36_spill] sm:$0xff] %v3645_v1 }
  0x49   :  { %816 = vmatprep.mubr.f32.mxu1 %v4509_v0  ;;  %931 = vmatpush1.msra.mxu1 %v3402_v14 }
  0x4a   :  { %353 = vmatpush1.msra.mxu0 %v73_v15  ;;  %386 = vmatprep.mubr.f32.mxu0 %v4509_v0  ;;  %v3560_v15 = vld [vmem:[#allocation6 + $0xf0] sm:$0xff] }
  0x4b   :  { %2780 = vmatmul.mubr.msk.f32.gmra.mxu1 %vm154_vm2, %v3409_v16  ;;  %932 = vmatprep.subr.mxu1 %v3411_v17  ;;  %4619 = vst [vmem:[#allocation30_spill] sm:$0xff] %v3560_v15 }
  0x4c   :  { %2763 = vmatmul.mubr.msk.f32.vlgmr.msra.gmra.mxu0 %vm154_vm2, %v3350_v23  ;;  %2766 = vmatprep.subr.msk.mxu0 %vm158_vm1, %v495_v18  ;;  %v487_v23 = vld [vmem:[#allocation6 + $0x88] sm:$0xff]  ;;  %v3564_v18 = vld [vmem:[#allocation6 + $0x240] sm:$0xff] }
  0x4d   :  { %933 = vmatpush1.msra.mxu1 %v3416_v19  ;;  %2767 = vmatpush1.msk.msra.mxu0 %vm158_vm1, %v494_v20  ;;  %v3569_v20 = vld [vmem:[#allocation6 + $0x228] sm:$0xff] }
  0x4e   :  { %934 = vmatprep.subr.mxu1 %v3421_v21  ;;  %647 = vmatprep.subr.mxu0 %v491_v22  ;;  %v3573_v22 = vld [vmem:[#allocation6 + $0x220] sm:$0xff] }
  0x4f   :  { %822 = vmatprep.mubr.f32.mxu1 %v4509_v0  ;;  %935 = vmatpush1.msra.mxu1 %v3426_v24 }
  0x50   :  { %648 = vmatpush1.msra.mxu0 %v490_v25  ;;  %2781 = vmatmul.mubr.msk.f32.gmra.mxu1 %vm154_vm2, %v3433_v26  ;;  %v3577_v25 = vld [vmem:[#allocation6 + $0x208] sm:$0xff] }
  0x51   :  { %936 = vmatprep.subr.mxu1 %v3436_v27  ;;  %649 = vmatprep.subr.mxu0 %v487_v23  ;;  %v3584_v23 = vld [vmem:[#allocation6 + $0x1e8] sm:$0xff] }
  0x52   :  { %937 = vmatpush1.msra.mxu1 %v3440_v28  ;;  %650 = vmatpush1.msra.mxu0 %v486_v29  ;;  %v3590_v29 = vld [vmem:[#allocation6 + $0x1e0] sm:$0xff] }
  0x53   :  { %938 = vmatprep.subr.mxu1 %v3444_v30  ;;  %651 = vmatprep.subr.mxu0 %v483_v31  ;;  %v3594_v31 = vld [vmem:[#allocation6 + $0x1c8] sm:$0xff] }
  0x54   :  { %828 = vmatprep.mubr.f32.mxu1 %v4509_v0  ;;  %939 = vmatpush1.msra.mxu1 %v3447_v32 }
  0x55   :  { %652 = vmatpush1.msra.mxu0 %v482_v33  ;;  %2782 = vmatmul.mubr.msk.f32.gmra.mxu1 %vm154_vm2, %v3453_v34  ;;  %v3597_v33 = vld [vmem:[#allocation6 + $0x1c0] sm:$0xff] }
  0x56   :  { %940 = vmatprep.subr.mxu1 %v3456_v35  ;;  %653 = vmatprep.subr.mxu0 %v479_v36  ;;  %v3601_v36 = vld [vmem:[#allocation6 + $0x1a8] sm:$0xff] }
  0x57   :  { %941 = vmatpush1.msra.mxu1 %v3460_v37  ;;  %654 = vmatpush1.msra.mxu0 %v478_v38  ;;  %v3611_v38 = vld [vmem:[#allocation6 + $0x188] sm:$0xff] }
  0x58   :  { %942 = vmatprep.subr.mxu1 %v3464_v39  ;;  %655 = vmatprep.subr.mxu0 %v475_v40  ;;  %v3614_v40 = vld [vmem:[#allocation6 + $0x180] sm:$0xff] }
  0x59   :  { %834 = vmatprep.mubr.f32.mxu1 %v4509_v0  ;;  %943 = vmatpush1.msra.mxu1 %v3467_v41 }
  0x5a   :  { %656 = vmatpush1.msra.mxu0 %v474_v42  ;;  %2783 = vmatmul.mubr.msk.f32.gmra.mxu1 %vm154_vm2, %v3473_v43  ;;  %v3618_v42 = vld [vmem:[#allocation6 + $0x168] sm:$0xff] }
  0x5b   :  { %944 = vmatprep.subr.mxu1 %v3476_v44  ;;  %657 = vmatprep.subr.mxu0 %v471_v45  ;;  %v3628_v45 = vld [vmem:[#allocation6 + $0x148] sm:$0xff] }
  0x5c   :  { %945 = vmatpush1.msra.mxu1 %v3480_v46  ;;  %658 = vmatpush1.msra.mxu0 %v470_v47  ;;  %4621 = vst [vmem:[#allocation32_spill] sm:$0xff] %v3628_v45  ;;  %v3631_v47 = vld [vmem:[#allocation6 + $0x140] sm:$0xff] }
  0x5d   :  { %691 = vmatprep.mubr.f32.mxu0 %v4509_v0  ;;  %946 = vmatprep.subr.mxu1 %v3484_v48  ;;  %4622 = vst [vmem:[#allocation33_spill] sm:$0xff] %v3631_v47 }
  0x5e   :  { %2768 = vmatmul.mubr.msk.f32.vlgmr.msra.gmra.mxu0 %vm154_vm2, %v3370_v59  ;;  %840 = vmatprep.mubr.f32.mxu1 %v4509_v0  ;;  %v3525_v59 = vld [vmem:[#allocation6 + $0x130] sm:$0xff] }
  0x5f   :  { %853 = vmatprep.subr.mxu0 %v3488_v49  ;;  %947 = vmatpush1.msra.mxu1 %v3490_v50  ;;  %4615 = vst [vmem:[#allocation26_spill] sm:$0xff] %v3525_v59 }
  0x60   :  { %2784 = vmatmul.mubr.msk.f32.gmra.mxu1 %vm154_vm2, %v3497_v51  ;;  %854 = vmatpush1.msra.mxu0 %v3499_v52 }
  0x61   :  { %948 = vmatprep.subr.mxu1 %v3504_v53  ;;  %855 = vmatprep.subr.mxu0 %v3506_v54 }
  0x62   :  { %949 = vmatpush1.msra.mxu1 %v3510_v55  ;;  %697 = vmatprep.mubr.f32.mxu0 %v4509_v0 }
  0x63   :  { %856 = vmatpush1.msra.mxu0 %v3515_v56  ;;  %950 = vmatprep.subr.mxu1 %v3517_v57 }
  0x64   :  { %2769 = vmatmul.mubr.msk.f32.gmra.mxu0 %vm154_vm2, %v3388_v7  ;;  %846 = vmatprep.mubr.f32.mxu1 %v4509_v0  ;;  %v3552_v7 = vld [vmem:[#allocation6 + $0xf8] sm:$0xff] }
  0x65   :  { %857 = vmatprep.subr.mxu0 %v3523_v58  ;;  %951 = vmatpush1.msra.mxu1 %v3525_v59  ;;  %4618 = vst [vmem:[#allocation29_spill] sm:$0xff] %v3552_v7 }
  0x66   :  { %2785 = vmatmul.mubr.msk.f32.gmra.mxu1 %vm154_vm2, %v3532_v61  ;;  %858 = vmatpush1.msra.mxu0 %v3534_v63 }
  0x67   :  { %952 = vmatprep.subr.mxu1 %v3539_v4  ;;  %859 = vmatprep.subr.mxu0 %v3541_v6 }
  0x68   :  { %953 = vmatpush1.msra.mxu1 %v3545_v9  ;;  %703 = vmatprep.mubr.f32.mxu0 %v4509_v0 }
  0x69   :  { %860 = vmatpush1.msra.mxu0 %v3550_v11  ;;  %954 = vmatprep.subr.mxu1 %v3552_v7 }
  0x6a   :  { %2770 = vmatmul.mubr.msk.f32.gmra.mxu0 %vm154_vm2, %v3409_v16  ;;  %861 = vmatprep.subr.mxu0 %v3556_v13  ;;  %v3581_v16 = vld [vmem:[#allocation6 + $0x200] sm:$0xff] }
  0x6b   :  { %955 = vmatpush1.msra.mxu1 %v3560_v15  ;;  %988 = vmatprep.mubr.f32.mxu1 %v4509_v0 }
  0x6c   :  { %862 = vmatpush1.msra.mxu0 %v3564_v18  ;;  %989 = vmatmul.mubr.f32.vlgmr.msra.gmra.mxu1 %v4509_v0 }
  0x6d   :  { %863 = vmatprep.subr.mxu0 %v3569_v20  ;;  %709 = vmatprep.mubr.f32.mxu0 %v4509_v0 }
  0x6e   :  { %864 = vmatpush1.msra.mxu0 %v3573_v22  ;;  %1088 = vmatprep.subr.mxu1 %v3372_v60 }
  0x6f   :  { %2771 = vmatmul.mubr.msk.f32.gmra.mxu0 %vm154_vm2, %v3433_v26  ;;  %865 = vmatprep.subr.mxu0 %v3577_v25  ;;  %v3607_v26 = vld [vmem:[#allocation6 + $0x1a0] sm:$0xff] }
  0x70   :  { %866 = vmatpush1.msra.mxu0 %v3581_v16  ;;  %715 = vmatprep.mubr.f32.mxu0 %v4509_v0 }
  0x71   :  { %867 = vmatprep.subr.mxu0 %v3584_v23  ;;  %1089 = vmatpush1.msra.mxu1 %v3375_v62 }
  0x72   :  { %868 = vmatpush1.msra.mxu0 %v3590_v29  ;;  %1090 = vmatprep.subr.mxu1 %v3379_v3 }
  0x73   :  { %2772 = vmatmul.mubr.msk.f32.gmra.mxu0 %vm154_vm2, %v3453_v34  ;;  %869 = vmatprep.subr.mxu0 %v3594_v31  ;;  %v3624_v34 = vld [vmem:[#allocation6 + $0x160] sm:$0xff] }
  0x74   :  { %870 = vmatpush1.msra.mxu0 %v3597_v33  ;;  %721 = vmatprep.mubr.f32.mxu0 %v4509_v0  ;;  %4620 = vst [vmem:[#allocation31_spill] sm:$0xff] %v3624_v34 }
  0x75   :  { %871 = vmatprep.subr.mxu0 %v3601_v36  ;;  %1091 = vmatpush1.msra.mxu1 %v3382_v5 }
  0x76   :  { %872 = vmatpush1.msra.mxu0 %v3607_v26  ;;  %1092 = vmatprep.subr.mxu1 %v3391_v8 }
  0x77   :  { %2773 = vmatmul.mubr.msk.f32.gmra.mxu0 %vm154_vm2, %v3473_v43  ;;  %873 = vmatprep.subr.mxu0 %v3611_v38  ;;  %v3641_v43 = vld [vmem:[#allocation6 + $0x120] sm:$0xff] }
  0x78   :  { %874 = vmatpush1.msra.mxu0 %v3614_v40  ;;  %727 = vmatprep.mubr.f32.mxu0 %v4509_v0  ;;  %4624 = vst [vmem:[#allocation35_spill] sm:$0xff] %v3641_v43 }
  0x79   :  { %875 = vmatprep.subr.mxu0 %v3618_v42  ;;  %1093 = vmatpush1.msra.mxu1 %v3395_v10  ;;  %v3648_v10 = vld [vmem:[#allocation6 + $0x100] sm:$0xff] }
  0x7a   :  { %876 = vmatpush1.msra.mxu0 %v3624_v34  ;;  %1094 = vmatprep.subr.mxu1 %v3399_v12  ;;  %4626 = vst [vmem:[#allocation37_spill] sm:$0xff] %v3648_v10  ;;  %v3652_v12 = vld [vmem:[#allocation6 + $0xe8] sm:$0xff] }
  0x7b   :  { %2774 = vmatmul.mubr.msk.f32.gmra.mxu0 %vm154_vm2, %v3497_v51  ;;  %877 = vmatprep.subr.mxu0 %v3628_v45  ;;  %4627 = vst [vmem:[#allocation38_spill] sm:$0xff] %v3652_v12  ;;  %v3658_v51 = vld [vmem:[#allocation6 + $0xe0] sm:$0xff] }
  0x7c   :  { %878 = vmatpush1.msra.mxu0 %v3631_v47  ;;  %733 = vmatprep.mubr.f32.mxu0 %v4509_v0  ;;  %4628 = vst [vmem:[#allocation39_spill] sm:$0xff] %v3658_v51 }
  0x7d   :  { %879 = vmatprep.subr.mxu0 %v3635_v2  ;;  %1095 = vmatpush1.msra.mxu1 %v3402_v14 }
  0x7e   :  { %880 = vmatpush1.msra.mxu0 %v3641_v43  ;;  %1096 = vmatprep.subr.mxu1 %v3411_v17 }
  0x7f   :  { %2775 = vmatmul.mubr.msk.f32.gmra.mxu0 %vm154_vm2, %v3532_v61  ;;  %881 = vmatprep.subr.mxu0 %v3645_v1  ;;  %v119_v61 = vlaneseq }
  0x80   :  { %882 = vmatpush1.msra.mxu0 %v3648_v10  ;;  %917 = vmatprep.mubr.f32.mxu0 %v4509_v0 }
  0x81   :  { %883 = vmatprep.subr.mxu0 %v3652_v12  ;;  %1097 = vmatpush1.msra.mxu1 %v3416_v19 }
  0x82   :  { %884 = vmatpush1.msra.mxu0 %v3658_v51  ;;  %1098 = vmatprep.subr.mxu1 %v3421_v21 }
  0x83   :  { %918 = vmatmul.mubr.f32.vlgmr.msra.gmra.mxu0 %v4509_v0  ;;  %1017 = vmatprep.subr.mxu0 %v3488_v49 }
  0x84   :  { %1018 = vmatpush1.msra.mxu0 %v3499_v52  ;;  %1099 = vmatpush1.msra.mxu1 %v3426_v24 }
  0x85   :  { %1019 = vmatprep.subr.mxu0 %v3506_v54  ;;  %1100 = vmatprep.subr.mxu1 %v3436_v27 }
  0x86   :  { %1020 = vmatpush1.msra.mxu0 %v3515_v56  ;;  %1101 = vmatpush1.msra.mxu1 %v3440_v28 }
  0x87   :  { %1021 = vmatprep.subr.mxu0 %v3523_v58  ;;  %1102 = vmatprep.subr.mxu1 %v3444_v30 }
  0x88   :  { %1022 = vmatpush1.msra.mxu0 %v3534_v63  ;;  %1103 = vmatpush1.msra.mxu1 %v3447_v32 }
  0x89   :  { %1023 = vmatprep.subr.mxu0 %v3541_v6  ;;  %1104 = vmatprep.subr.mxu1 %v3456_v35 }
  0x8a   :  { %1024 = vmatpush1.msra.mxu0 %v3550_v11  ;;  %1105 = vmatpush1.msra.mxu1 %v3460_v37 }
  0x8b   :  { %1025 = vmatprep.subr.mxu0 %v3556_v13  ;;  %1106 = vmatprep.subr.mxu1 %v3464_v39 }
  0x8c   :  { %1026 = vmatpush1.msra.mxu0 %v3564_v18  ;;  %1107 = vmatpush1.msra.mxu1 %v3467_v41 }
  0x8d   :  { %1027 = vmatprep.subr.mxu0 %v3569_v20  ;;  %1108 = vmatprep.subr.mxu1 %v3476_v44 }
  0x8e   :  { %1028 = vmatpush1.msra.mxu0 %v3573_v22  ;;  %1109 = vmatpush1.msra.mxu1 %v3480_v46 }
  0x8f   :  { %1029 = vmatprep.subr.mxu0 %v3577_v25  ;;  %1110 = vmatprep.subr.mxu1 %v3484_v48 }
  0x90   :  { %1030 = vmatpush1.msra.mxu0 %v3581_v16  ;;  %1111 = vmatpush1.msra.mxu1 %v3490_v50 }
  0x91   :  { %1031 = vmatprep.subr.mxu0 %v3584_v23  ;;  %1112 = vmatprep.subr.mxu1 %v3504_v53 }
  0x92   :  { %1032 = vmatpush1.msra.mxu0 %v3590_v29  ;;  %1113 = vmatpush1.msra.mxu1 %v3510_v55 }
  0x93   :  { %1033 = vmatprep.subr.mxu0 %v3594_v31  ;;  %1114 = vmatprep.subr.mxu1 %v3517_v57 }
  0x94   :  { %1034 = vmatpush1.msra.mxu0 %v3597_v33  ;;  %1115 = vmatpush1.msra.mxu1 %v3525_v59 }
  0x95   :  { %1035 = vmatprep.subr.mxu0 %v3601_v36  ;;  %1116 = vmatprep.subr.mxu1 %v3539_v4 }
  0x96   :  { %1036 = vmatpush1.msra.mxu0 %v3607_v26  ;;  %1117 = vmatpush1.msra.mxu1 %v3545_v9 }
  0x97   :  { %1037 = vmatprep.subr.mxu0 %v3611_v38  ;;  %1118 = vmatprep.subr.mxu1 %v3552_v7 }
  0x98   :  { %1038 = vmatpush1.msra.mxu0 %v3614_v40  ;;  %1081 = vmatprep.mubr.f32.mxu0 %v4509_v0 }
  0x99   :  { %1039 = vmatprep.subr.mxu0 %v3618_v42  ;;  %1119 = vmatpush1.msra.mxu1 %v3560_v15  ;;  %v63_v15 = vld [vmem:[%s4503_s5] ss:$4 sm:$0x7f] }
  0x9a   :  { %1040 = vmatpush1.msra.mxu0 %v3624_v34  ;;  %1152 = vmatprep.mubr.f32.mxu1 %v4509_v0  ;;  %v3724_v0 = vshrl.u32 %v119_v61, 7 }
  0x9b   :  { %1041 = vmatprep.subr.mxu0 %v3628_v45  ;;  %1252 = vmatprep.subr.mxu1 %v3372_v60 }
  0x9c   :  { %1042 = vmatpush1.msra.mxu0 %v3631_v47  ;;  %v4538_v60 = vsub.s32 0, %v3724_v0  ;;  %v4543_v7 = vsub.s32 1, %v3724_v0  ;;  %v129_v55 = vsub.s32 2, %v3724_v0  ;;  %v2754_v47 = vld [vmem:[%s4503_s5 + $0x1] ss:$4 sm:$0xf] }
  0x9d   :  { %1043 = vmatprep.subr.mxu0 %v3635_v2  ;;  %s3279_s5 = smov [#allocation2]  }
  0x9e   :  { %1044 = vmatpush1.msra.mxu0 %v3641_v43  ;;  %v122_v9 = vrot.slane %v63_v15, %v4538_v60  ;;  %v3760_v57 = vrot.slane %v2754_v47, %v129_v55  ;;  %s59_s14 = sshll.u32 %s3279_s5, 4  ;;  %s60_s14 = int_to_ptr.vmem [resolvable:$true] %s59_s14 }
  0x9f   :  { %1045 = vmatprep.subr.mxu0 %v3645_v1  ;;  %s3253_s3 = scalar_lea.vmem %s60_s14, 17408  ;;  %p3258_p11 = scmp.lt.s32.totalorder %s60_s14, %s60_s14 }
  0xa0   :  { %1046 = vmatpush1.msra.mxu0 %v3648_v10  ;;  %p3254_p10 = scmp.ne.s32.totalorder %s60_s14, %s3253_s3  ;;  %p3259_p12 = scmp.lt.s32.totalorder %s3253_s3, %s3253_s3 }
  0xa1   :  { %1047 = vmatprep.subr.mxu0 %v3652_v12  ;;  %v145_v12 = vsub.s32 6, %v3724_v0 }
  0xa2   :  { %1048 = vmatpush1.msra.mxu0 %v3658_v51  ;;  %v126_v51 = vrot.slane %v63_v15, %v4543_v7  ;;  %v133_v7 = vsub.s32 3, %v3724_v0  ;;  %p3260_p13 = por %p3259_p12, %p3258_p11 }
  0xa3   :  { %1181 = vmatprep.subr.mxu0 %v3488_v49  ;;  %v146_v61 = vrot.slane %v63_v15, %v145_v12 }
  0xa4   :  { %p3261_p0 = pnand %p3260_p13, %p3254_p10 }
  0xec   :  { %v246_v49 = vpop.f32.mrf.mxu0 }
  0xed   :  { %v3736_v10 = vadd.f32 %v246_v49, %v122_v9  ;;  %v130_v49 = vrot.slane %v63_v15, %v129_v55  ;;  %v134_v9 = vrot.slane %v63_v15, %v133_v7 }
  0xee   :  { %v248_v4 = vpop.f32.mrf.mxu0 }
  0xef   :  { %4629 = vst [vmem:[#allocation40_spill] sm:$0xff] %v3736_v10  ;;  %v3739_v59 = vadd.f32 %v248_v4, %v126_v51  ;;  %v141_v4 = vsub.s32 5, %v3724_v0 }
  0xf0   :  { %v459_v43 = vpop.f32.mrf.mxu1 }
  0xf1   :  { %4630 = vst [vmem:[#allocation41_spill] sm:$0xff] %v3739_v59  ;;  %v3742_v2 = vadd.f32 %v459_v43, %v146_v61  ;;  %v142_v10 = vrot.slane %v63_v15, %v141_v4 }
  0xf2   :  { %v2962_v60 = vpop.f32.mrf.mxu1 }
  0xf3   :  { %4631 = vst [vmem:[#allocation42_spill] sm:$0xff] %v3742_v2 }
  0xfa   :  { %v317_v12 = vpop.f32.mrf.mxu0 }
  0xfb   :  { %v3747_v53 = vadd.f32 %v317_v12, %v130_v49  ;;  %v137_v49 = vsub.s32 4, %v3724_v0  ;;  %v3763_v12 = vrot.slane %v2754_v47, %v133_v7 }
  0xfc   :  { %v319_v1 = vpop.f32.mrf.mxu0 }
  0xfd   :  { %4632 = vst [vmem:[#allocation43_spill] sm:$0xff] %v3747_v53  ;;  %v3750_v51 = vadd.f32 %v319_v1, %v134_v9  ;;  %v138_v53 = vrot.slane %v63_v15, %v137_v49 }
  0xff   :  { %4633 = vst [vmem:[#allocation44_spill] sm:$0xff] %v3750_v51 }
 0x100   :  { %v3753_v61 = vpop.f32.mrf.mxu1 }
 0x102   :  { %v3755_v60 = vpop.f32.mrf.mxu1 }
 0x105   :  { %v812_v2 = vpop.f32.mrf.mxu1 }
 0x106   :  { %v3766_v1 = vadd.f32 %v812_v2, %v3760_v57 }
 0x107   :  { %v814_v9 = vpop.f32.mrf.mxu1 }
 0x108   :  { %4634 = vst [vmem:[#allocation45_spill] sm:$0xff] %v3766_v1  ;;  %v3770_v43 = vadd.f32 %v814_v9, %v3763_v12 }
 0x10a   :  { %4635 = vst [vmem:[#allocation46_spill] sm:$0xff] %v3770_v43 }
 0x10b   :  { %v818_v51 = vpop.f32.mrf.mxu1 }
 0x10c   :  { %v3773_v55 = vadd.f32 %v818_v51, %v3760_v57  ;;  %v388_v59 = vpop.f32.mrf.mxu0 }
 0x10d   :  { %v3775_v45 = vadd.f32 %v388_v59, %v138_v53  ;;  %v820_v7 = vpop.f32.mrf.mxu1 }
 0x10e   :  { %4636 = vst [vmem:[#allocation47_spill] sm:$0xff] %v3773_v55  ;;  %v3778_v50 = vadd.f32 %v820_v7, %v3763_v12  ;;  %v390_v2 = vpop.f32.mrf.mxu0 }
 0x10f   :  { %4637 = vst [vmem:[#allocation48_spill] sm:$0xff] %v3775_v45  ;;  %v3781_v34 = vadd.f32 %v390_v2, %v142_v10 }
 0x110   :  { %4638 = vst [vmem:[#allocation49_spill] sm:$0xff] %v3778_v50  ;;  %v824_v9 = vpop.f32.mrf.mxu1 }
 0x111   :  { %4639 = vst [vmem:[#allocation50_spill] sm:$0xff] %v3781_v34  ;;  %v3785_v15 = vadd.f32 %v824_v9, %v3760_v57 }
 0x112   :  { %v826_v4 = vpop.f32.mrf.mxu1 }
 0x113   :  { %4640 = vst [vmem:[#allocation51_spill] sm:$0xff] %v3785_v15  ;;  %v3788_v51 = vadd.f32 %v826_v4, %v3763_v12 }
 0x115   :  { %4641 = vst [vmem:[#allocation52_spill] sm:$0xff] %v3788_v51  ;;  %v830_v53 = vpop.f32.mrf.mxu1 }
 0x116   :  { %v3791_v59 = vadd.f32 %v830_v53, %v3760_v57 }
 0x117   :  { %v832_v7 = vpop.f32.mrf.mxu1 }
 0x118   :  { %4642 = vst [vmem:[#allocation53_spill] sm:$0xff] %v3791_v59  ;;  %v3794_v50 = vadd.f32 %v832_v7, %v3763_v12  ;;  %v4647_v59 = vsub.s32 0, %v3724_v0 }
 0x11a   :  { %4643 = vst [vmem:[#allocation54_spill] sm:$0xff] %v3794_v50  ;;  %v836_v10 = vpop.f32.mrf.mxu1  ;;  %v574_v51 = vrot.slane %v2754_v47, %v4647_v59 }
 0x11b   :  { %v3797_v2 = vadd.f32 %v836_v10, %v3760_v57  ;;  %v4649_v10 = vsub.s32 1, %v3724_v0 }
 0x11c   :  { %v838_v1 = vpop.f32.mrf.mxu1 }
 0x11d   :  { %4644 = vst [vmem:[#allocation55_spill] sm:$0xff] %v3797_v2  ;;  %v3800_v9 = vadd.f32 %v838_v1, %v3763_v12  ;;  %v578_v2 = vrot.slane %v2754_v47, %v4649_v10 }
 0x11e   :  { %v693_v49 = vpop.f32.mrf.mxu0 }
 0x11f   :  { %4645 = vst [vmem:[#allocation56_spill] sm:$0xff] %v3800_v9 }
 0x120   :  { %v842_v45 = vpop.f32.mrf.mxu1  ;;  %v695_v4 = vpop.f32.mrf.mxu0 }
 0x121   :  { %v3803_v34 = vadd.f32 %v842_v45, %v3760_v57 }
 0x122   :  { %v844_v53 = vpop.f32.mrf.mxu1 }
 0x123   :  { %4646 = vst [vmem:[#allocation57_spill] sm:$0xff] %v3803_v34  ;;  %v3808_v7 = vadd.f32 %v844_v53, %v3763_v12 }
 0x124   :  { %v699_v50 = vpop.f32.mrf.mxu0 }
 0x125   :  { %4648 = vst [vmem:[#allocation58_spill] sm:$0xff] %v3808_v7  ;;  %v3812_v15 = vadd.f32 %v699_v50, %v574_v51 }
 0x126   :  { %v848_v1 = vpop.f32.mrf.mxu1  ;;  %v701_v9 = vpop.f32.mrf.mxu0 }
 0x127   :  { %4650 = vst [vmem:[#allocation59_spill] sm:$0xff] %v3812_v15  ;;  %v3815_v55 = vadd.f32 %v848_v1, %v3760_v57  ;;  %v3817_v45 = vadd.f32 %v701_v9, %v578_v2 }
 0x128   :  { %v850_v34 = vpop.f32.mrf.mxu1 }
 0x129   :  { %4651 = vst [vmem:[#allocation60_spill] sm:$0xff] %v3815_v55  ;;  %4652 = vst [vmem:[#allocation61_spill] sm:$0xff] %v3817_v45  ;;  %v3820_v43 = vadd.f32 %v850_v34, %v3763_v12 }
 0x12a   :  { %v705_v59 = vpop.f32.mrf.mxu0 }
 0x12b   :  { %4653 = vst [vmem:[#allocation62_spill] sm:$0xff] %v3820_v43  ;;  %v3822_v53 = vadd.f32 %v705_v59, %v574_v51 }
 0x12c   :  { %v707_v7 = vpop.f32.mrf.mxu0 }
 0x12d   :  { %4654 = vst [vmem:[#allocation63_spill] sm:$0xff] %v3822_v53  ;;  %v3824_v48 = vadd.f32 %v707_v7, %v578_v2 }
 0x12f   :  { %4655 = vst [vmem:[#allocation64_spill] sm:$0xff] %v3824_v48  ;;  %v711_v0 = vpop.f32.mrf.mxu0 }
 0x130   :  { %v3826_v50 = vadd.f32 %v711_v0, %v574_v51 }
 0x131   :  { %v713_v47 = vpop.f32.mrf.mxu0 }
 0x132   :  { %4656 = vst [vmem:[#allocation65_spill] sm:$0xff] %v3826_v50  ;;  %v3828_v10 = vadd.f32 %v713_v47, %v578_v2 }
 0x133   :  { %v717_v1 = vpop.f32.mrf.mxu0 }
 0x134   :  { %4657 = vst [vmem:[#allocation66_spill] sm:$0xff] %v3828_v10  ;;  %v3830_v55 = vadd.f32 %v717_v1, %v574_v51 }
 0x135   :  { %v719_v9 = vpop.f32.mrf.mxu0 }
 0x136   :  { %4658 = vst [vmem:[#allocation67_spill] sm:$0xff] %v3830_v55  ;;  %v3832_v45 = vadd.f32 %v719_v9, %v578_v2  ;;  %v694_v55 = vadd.f32 %v693_v49, %v574_v51 }
 0x137   :  { %v723_v34 = vpop.f32.mrf.mxu0 }
 0x138   :  { %4659 = vst [vmem:[#allocation68_spill] sm:$0xff] %v3832_v45  ;;  %v3834_v43 = vadd.f32 %v723_v34, %v574_v51  ;;  %v696_v45 = vadd.f32 %v695_v4, %v578_v2 }
 0x139   :  { %v725_v59 = vpop.f32.mrf.mxu0 }
 0x13a   :  { %4660 = vst [vmem:[#allocation69_spill] sm:$0xff] %v3834_v43  ;;  %v3836_v53 = vadd.f32 %v725_v59, %v578_v2  ;;  %v807_v59 = vadd.f32 %v3753_v61, %v3760_v57 }
 0x13b   :  { %v729_v7 = vpop.f32.mrf.mxu0 }
 0x13c   :  { %4661 = vst [vmem:[#allocation70_spill] sm:$0xff] %v3836_v53  ;;  %v3838_v48 = vadd.f32 %v729_v7, %v574_v51 }
 0x13d   :  { %v731_v0 = vpop.f32.mrf.mxu0 }
 0x13e   :  { %4662 = vst [vmem:[#allocation71_spill] sm:$0xff] %v3838_v48  ;;  %v3840_v50 = vadd.f32 %v731_v0, %v578_v2  ;;  %v990_v0 = vpop.f32.mrf.mxu1 }
 0x13f   :  { %v735_v47 = vpop.f32.mrf.mxu0 }
 0x140   :  { %4663 = vst [vmem:[#allocation72_spill] sm:$0xff] %v3840_v50  ;;  %v3842_v10 = vadd.f32 %v735_v47, %v574_v51  ;;  %v997_v50 = vadd.f32 %v990_v0, %v807_v59  ;;  %v809_v47 = vadd.f32 %v3755_v60, %v3763_v12  ;;  %v992_v49 = vpop.f32.mrf.mxu1  ;;  %v4667_v0 = vld [vmem:[#allocation19_spill] sm:$0xff] }
 0x141   :  { %v737_v1 = vpop.f32.mrf.mxu0 }
 0x142   :  { %4664 = vst [vmem:[#allocation73_spill] sm:$0xff] %v3842_v10  ;;  %v3844_v15 = vadd.f32 %v737_v1, %v578_v2  ;;  %v998_v51 = vadd.f32 %v992_v49, %v809_v47  ;;  %v4672_v47 = vld [vmem:[#allocation23_spill] sm:$0xff]  ;;  %v4673_v49 = vld [vmem:[#allocation33_spill] sm:$0xff] }
 0x143   :  { %v919_v9 = vpop.f32.mrf.mxu0 }
 0x144   :  { %4665 = vst [vmem:[#allocation74_spill] sm:$0xff] %v3844_v15  ;;  %v995_v34 = vadd.f32 %v919_v9, %v694_v55  ;;  %v1008_v1 = vmul.f32 0.5, %v998_v51  ;;  %v4674_v51 = vld [vmem:[#allocation24_spill] sm:$0xff]  ;;  %v4690_v15 = vld [vmem:[#allocation59_spill] sm:$0xff] }
 0x145   :  { %v921_v43 = vpop.f32.mrf.mxu0 }
 0x146   :  { %v999_v53 = vmul.f32 0.5, %v995_v34  ;;  %v996_v7 = vadd.f32 %v921_v43, %v696_v45 }
 0x148   :  { %3061 = vtanh.f32 %v999_v53  ;;  %v1003_v48 = vmul.f32 0.5, %v996_v7  ;;  %v4666_v7 = vld [vmem:[#allocation18_spill] sm:$0xff] }
 0x14a   :  { %3063 = vtanh.f32 %v1003_v48 }
 0x14b   :  { %3065 = vtanh.f32 %v997_v50 }
 0x14c   :  { %3067 = vtanh.f32 %v1008_v1  ;;  %v4675_v1 = vld [vmem:[#allocation34_spill] sm:$0xff] }
 0x155   :  { %v3062_v2 = vpop.eup %3061 }
 0x156   :  { %v1001_v55 = vadd.f32 1.0, %v3062_v2  ;;  %v4676_v2 = vld [vmem:[#allocation25_spill] sm:$0xff] }
 0x157   :  { %v3064_v4 = vpop.eup %3063 }
 0x158   :  { %v1002_v9 = vmul.f32 0.5, %v1001_v55  ;;  %v1005_v57 = vadd.f32 1.0, %v3064_v4  ;;  %v3066_v43 = vpop.eup %3065  ;;  %v4677_v55 = vld [vmem:[#allocation35_spill] sm:$0xff]  ;;  %v4678_v4 = vld [vmem:[#allocation26_spill] sm:$0xff] }
 0x159   :  { %v3068_v48 = vpop.eup %3067 }
 0x15a   :  { %v1006_v61 = vmul.f32 0.5, %v1005_v57  ;;  %v1013_v45 = vmul.f32 %v3066_v43, %v1002_v9  ;;  %v1010_v60 = vadd.f32 1.0, %v3068_v48  ;;  %v4679_v9 = vld [vmem:[#allocation36_spill] sm:$0xff]  ;;  %v4680_v57 = vld [vmem:[#allocation27_spill] sm:$0xff] }
 0x15b   :  { %v4682_v43 = vld [vmem:[#allocation28_spill] sm:$0xff]  ;;  %v4685_v48 = vld [vmem:[#allocation39_spill] sm:$0xff] }
 0x15c   :  { %v1012_v53 = vmul.f32 0.0, %v1006_v61  ;;  %v1011_v12 = vmul.f32 0.5, %v1010_v60  ;;  %v4681_v61 = vld [vmem:[#allocation37_spill] sm:$0xff]  ;;  %v4686_v60 = vmov 0.0  }
 0x15e   :  { %v3850_v34 = vadd.f32 %v1013_v45, %v1012_v53  ;;  %v4683_v45 = vld [vmem:[#allocation38_spill] sm:$0xff]  ;;  %v4684_v53 = vld [vmem:[#allocation29_spill] sm:$0xff] }
 0x160   :  { %3069 = vtanh.f32 %v3850_v34 }
 0x16d   :  { %v3070_v50 = vpop.eup %3069 }
 0x16e   :  { %v1016_v59 = vmul.f32 %v3070_v50, %v1011_v12  ;;  %v4687_v12 = vld [vmem:[#allocation30_spill] sm:$0xff]  ;;  %v4688_v50 = vld [vmem:[#allocation21_spill] sm:$0xff] }
 0x170   :  { %1082 = vmatmul.mubr.f32.vlgmr.msra.gmra.mxu0 %v1016_v59  ;;  %1153 = vmatmul.mubr.f32.vlgmr.msra.gmra.mxu1 %v1016_v59  ;;  %v4689_v59 = vld [vmem:[#allocation17_spill] sm:$0xff] }
 0x171   :  { %1182 = vmatpush1.msra.mxu0 %v3499_v52  ;;  %1253 = vmatpush1.msra.mxu1 %v3375_v62  ;;  %v4668_v62 = vld [vmem:[#allocation20_spill] sm:$0xff] }
 0x172   :  { %1183 = vmatprep.subr.mxu0 %v3506_v54  ;;  %1254 = vmatprep.subr.mxu1 %v3379_v3  ;;  %v4669_v3 = vld [vmem:[#allocation31_spill] sm:$0xff] }
 0x173   :  { %1184 = vmatpush1.msra.mxu0 %v3515_v56  ;;  %1255 = vmatpush1.msra.mxu1 %v3382_v5  ;;  %v4670_v5 = vld [vmem:[#allocation22_spill] sm:$0xff] }
 0x174   :  { %1185 = vmatprep.subr.mxu0 %v3523_v58  ;;  %1256 = vmatprep.subr.mxu1 %v3391_v8  ;;  %v4671_v8 = vld [vmem:[#allocation32_spill] sm:$0xff] }
 0x175   :  { %1186 = vmatpush1.msra.mxu0 %v3534_v63  ;;  %1257 = vmatpush1.msra.mxu1 %v4666_v7 }
 0x176   :  { %1187 = vmatprep.subr.mxu0 %v3541_v6  ;;  %1258 = vmatprep.subr.mxu1 %v4667_v0 }
 0x177   :  { %1188 = vmatpush1.msra.mxu0 %v3550_v11  ;;  %1259 = vmatpush1.msra.mxu1 %v3402_v14 }
 0x178   :  { %1189 = vmatprep.subr.mxu0 %v3556_v13  ;;  %1260 = vmatprep.subr.mxu1 %v3411_v17 }
 0x179   :  { %1190 = vmatpush1.msra.mxu0 %v3564_v18  ;;  %1261 = vmatpush1.msra.mxu1 %v3416_v19 }
 0x17a   :  { %1191 = vmatprep.subr.mxu0 %v3569_v20  ;;  %1262 = vmatprep.subr.mxu1 %v3421_v21 }
 0x17b   :  { %1192 = vmatpush1.msra.mxu0 %v3573_v22  ;;  %1263 = vmatpush1.msra.mxu1 %v3426_v24 }
 0x17c   :  { %1193 = vmatprep.subr.mxu0 %v3577_v25  ;;  %1264 = vmatprep.subr.mxu1 %v3436_v27 }
 0x17d   :  { %1194 = vmatpush1.msra.mxu0 %v3581_v16  ;;  %1265 = vmatpush1.msra.mxu1 %v3440_v28 }
 0x17e   :  { %1195 = vmatprep.subr.mxu0 %v3584_v23  ;;  %1266 = vmatprep.subr.mxu1 %v3444_v30 }
 0x17f   :  { %1196 = vmatpush1.msra.mxu0 %v3590_v29  ;;  %1267 = vmatpush1.msra.mxu1 %v3447_v32 }
 0x180   :  { %1197 = vmatprep.subr.mxu0 %v3594_v31  ;;  %1268 = vmatprep.subr.mxu1 %v3456_v35 }
 0x181   :  { %1198 = vmatpush1.msra.mxu0 %v3597_v33  ;;  %1269 = vmatpush1.msra.mxu1 %v3460_v37 }
 0x182   :  { %1199 = vmatprep.subr.mxu0 %v3601_v36  ;;  %1270 = vmatprep.subr.mxu1 %v3464_v39 }
 0x183   :  { %1200 = vmatpush1.msra.mxu0 %v3607_v26  ;;  %1271 = vmatpush1.msra.mxu1 %v3467_v41 }
 0x184   :  { %1201 = vmatprep.subr.mxu0 %v3611_v38  ;;  %1272 = vmatprep.subr.mxu1 %v3476_v44 }
 0x185   :  { %1202 = vmatpush1.msra.mxu0 %v3614_v40  ;;  %1273 = vmatpush1.msra.mxu1 %v3480_v46 }
 0x186   :  { %1203 = vmatprep.subr.mxu0 %v3618_v42  ;;  %1274 = vmatprep.subr.mxu1 %v4668_v62 }
 0x187   :  { %1204 = vmatpush1.msra.mxu0 %v4669_v3  ;;  %1275 = vmatpush1.msra.mxu1 %v4670_v5 }
 0x188   :  { %1205 = vmatprep.subr.mxu0 %v4671_v8  ;;  %1276 = vmatprep.subr.mxu1 %v4672_v47 }
 0x189   :  { %1206 = vmatpush1.msra.mxu0 %v4673_v49  ;;  %1277 = vmatpush1.msra.mxu1 %v4674_v51 }
 0x18a   :  { %1207 = vmatprep.subr.mxu0 %v4675_v1  ;;  %1278 = vmatprep.subr.mxu1 %v4676_v2 }
 0x18b   :  { %1208 = vmatpush1.msra.mxu0 %v4677_v55  ;;  %1279 = vmatpush1.msra.mxu1 %v4678_v4 }
 0x18c   :  { %1209 = vmatprep.subr.mxu0 %v4679_v9  ;;  %1280 = vmatprep.subr.mxu1 %v4680_v57  ;;  %v4691_v57 = vld [vmem:[#allocation61_spill] sm:$0xff] }
 0x18d   :  { %1210 = vmatpush1.msra.mxu0 %v4681_v61  ;;  %1281 = vmatpush1.msra.mxu1 %v4682_v43 }
 0x18e   :  { %1211 = vmatprep.subr.mxu0 %v4683_v45  ;;  %1282 = vmatprep.subr.mxu1 %v4684_v53 }
 0x18f   :  { %1212 = vmatpush1.msra.mxu0 %v4685_v48  ;;  %1245 = vmatprep.mubr.f32.mxu0 %v4686_v60  ;;  %v4692_v48 = vld [vmem:[#allocation45_spill] sm:$0xff] }
 0x190   :  { %1283 = vmatpush1.msra.mxu1 %v4687_v12  ;;  %1316 = vmatprep.mubr.f32.mxu1 %v4686_v60  ;;  %v4693_v60 = vld [vmem:[#allocation46_spill] sm:$0xff] }
 0x191   :  { %1345 = vmatprep.subr.mxu0 %v4688_v50  ;;  %1416 = vmatprep.subr.mxu1 %v4689_v59 }
 0x230   :  { %v1083_v7 = vpop.f32.mrf.mxu0  ;;  %v1154_v43 = vpop.f32.mrf.mxu1 }
 0x231   :  { %v1159_v10 = vadd.f32 %v1083_v7, %v4690_v15  ;;  %v1161_v9 = vadd.f32 %v1154_v43, %v4692_v48 }
 0x232   :  { %v1085_v61 = vpop.f32.mrf.mxu0  ;;  %v1156_v12 = vpop.f32.mrf.mxu1 }
 0x233   :  { %v1163_v45 = vmul.f32 0.5, %v1159_v10  ;;  %v1160_v53 = vadd.f32 %v1085_v61, %v4691_v57  ;;  %v1162_v55 = vadd.f32 %v1156_v12, %v4693_v60 }
 0x235   :  { %3071 = vtanh.f32 %v1163_v45  ;;  %v1167_v4 = vmul.f32 0.5, %v1160_v53  ;;  %v1172_v50 = vmul.f32 0.5, %v1162_v55 }
 0x237   :  { %3073 = vtanh.f32 %v1167_v4 }
 0x238   :  { %3075 = vtanh.f32 %v1161_v9 }
 0x239   :  { %3077 = vtanh.f32 %v1172_v50  ;;  %v4712_v50 = vld [vmem:[#allocation64_spill] sm:$0xff] }
 0x242   :  { %v3072_v2 = vpop.eup %3071 }
 0x243   :  { %v1165_v59 = vadd.f32 1.0, %v3072_v2  ;;  %v3944_v2 = vld [vmem:[#allocation6 + $0x290] sm:$0xff] }
 0x244   :  { %v3074_v1 = vpop.eup %3073 }
 0x245   :  { %v1166_v51 = vmul.f32 0.5, %v1165_v59  ;;  %v1169_v15 = vadd.f32 1.0, %v3074_v1  ;;  %v3076_v7 = vpop.eup %3075  ;;  %v3928_v1 = vld [vmem:[#allocation6 + $0x2d0] sm:$0xff] }
 0x246   :  { %v3078_v4 = vpop.eup %3077 }
 0x247   :  { %v1170_v10 = vmul.f32 0.5, %v1169_v15  ;;  %v1177_v49 = vmul.f32 %v3076_v7, %v1166_v51  ;;  %v1174_v9 = vadd.f32 1.0, %v3078_v4  ;;  %v3940_v51 = vld [vmem:[#allocation6 + $0x298] sm:$0xff]  ;;  %v4713_v15 = vld [vmem:[#allocation47_spill] sm:$0xff]  ;;  %v4714_v4 = vld [vmem:[#allocation49_spill] sm:$0xff] }
 0x249   :  { %v1176_v57 = vmul.f32 %v1170_v10, %v3850_v34  ;;  %v1175_v43 = vmul.f32 0.5, %v1174_v9  ;;  %v3932_v34 = vld [vmem:[#allocation6 + $0x2b8] sm:$0xff] }
 0x24b   :  { %v3924_v61 = vadd.f32 %v1177_v49, %v1176_v57  ;;  %v3936_v49 = vld [vmem:[#allocation6 + $0x2b0] sm:$0xff] }
 0x24d   :  { %3079 = vtanh.f32 %v3924_v61 }
 0x25a   :  { %v3080_v45 = vpop.eup %3079 }
 0x25b   :  { %v1180_v55 = vmul.f32 %v3080_v45, %v1175_v43 }
 0x25d   :  { %1246 = vmatmul.mubr.f32.vlgmr.msra.gmra.mxu0 %v1180_v55  ;;  %1317 = vmatmul.mubr.f32.vlgmr.msra.gmra.mxu1 %v1180_v55 }
 0x25e   :  { %1346 = vmatpush1.msra.mxu0 %v3499_v52  ;;  %1417 = vmatpush1.msra.mxu1 %v3928_v1 }
 0x25f   :  { %1347 = vmatprep.subr.mxu0 %v3506_v54  ;;  %1418 = vmatprep.subr.mxu1 %v3932_v34 }
 0x260   :  { %1348 = vmatpush1.msra.mxu0 %v3515_v56  ;;  %1419 = vmatpush1.msra.mxu1 %v3936_v49 }
 0x261   :  { %1349 = vmatprep.subr.mxu0 %v3523_v58  ;;  %1420 = vmatprep.subr.mxu1 %v3940_v51 }
 0x262   :  { %1350 = vmatpush1.msra.mxu0 %v3534_v63  ;;  %1421 = vmatpush1.msra.mxu1 %v3944_v2 }
 0x263   :  { %1351 = vmatprep.subr.mxu0 %v3541_v6  ;;  %1422 = vmatprep.subr.mxu1 %v4667_v0  ;;  %v4709_v0 = vld [vmem:[#allocation21_spill] sm:$0xff] }
 0x264   :  { %1352 = vmatpush1.msra.mxu0 %v3550_v11  ;;  %1423 = vmatpush1.msra.mxu1 %v3402_v14  ;;  %v4694_v14 = vld [vmem:[#allocation33_spill] sm:$0xff] }
 0x265   :  { %1353 = vmatprep.subr.mxu0 %v3556_v13  ;;  %1424 = vmatprep.subr.mxu1 %v3411_v17  ;;  %v4695_v17 = vld [vmem:[#allocation24_spill] sm:$0xff] }
 0x266   :  { %1354 = vmatpush1.msra.mxu0 %v3564_v18  ;;  %1425 = vmatpush1.msra.mxu1 %v3416_v19  ;;  %v4696_v19 = vld [vmem:[#allocation34_spill] sm:$0xff] }
 0x267   :  { %1355 = vmatprep.subr.mxu0 %v3569_v20  ;;  %1426 = vmatprep.subr.mxu1 %v3421_v21  ;;  %v4697_v21 = vld [vmem:[#allocation25_spill] sm:$0xff] }
 0x268   :  { %1356 = vmatpush1.msra.mxu0 %v3573_v22  ;;  %1427 = vmatpush1.msra.mxu1 %v3426_v24  ;;  %v4698_v24 = vld [vmem:[#allocation35_spill] sm:$0xff] }
 0x269   :  { %1357 = vmatprep.subr.mxu0 %v3577_v25  ;;  %1428 = vmatprep.subr.mxu1 %v3436_v27  ;;  %v4699_v27 = vld [vmem:[#allocation26_spill] sm:$0xff] }
 0x26a   :  { %1358 = vmatpush1.msra.mxu0 %v3581_v16  ;;  %1429 = vmatpush1.msra.mxu1 %v3440_v28  ;;  %v4700_v28 = vld [vmem:[#allocation36_spill] sm:$0xff] }
 0x26b   :  { %1359 = vmatprep.subr.mxu0 %v3584_v23  ;;  %1430 = vmatprep.subr.mxu1 %v3444_v30  ;;  %v4701_v30 = vld [vmem:[#allocation27_spill] sm:$0xff] }
 0x26c   :  { %1360 = vmatpush1.msra.mxu0 %v3590_v29  ;;  %1431 = vmatpush1.msra.mxu1 %v3447_v32  ;;  %v4702_v32 = vld [vmem:[#allocation37_spill] sm:$0xff] }
 0x26d   :  { %1361 = vmatprep.subr.mxu0 %v3594_v31  ;;  %1432 = vmatprep.subr.mxu1 %v3456_v35  ;;  %v4703_v35 = vld [vmem:[#allocation28_spill] sm:$0xff] }
 0x26e   :  { %1362 = vmatpush1.msra.mxu0 %v3597_v33  ;;  %1433 = vmatpush1.msra.mxu1 %v3460_v37  ;;  %v4704_v37 = vld [vmem:[#allocation38_spill] sm:$0xff] }
 0x26f   :  { %1363 = vmatprep.subr.mxu0 %v3601_v36  ;;  %1434 = vmatprep.subr.mxu1 %v3464_v39  ;;  %v4705_v39 = vld [vmem:[#allocation29_spill] sm:$0xff] }
 0x270   :  { %1364 = vmatpush1.msra.mxu0 %v3607_v26  ;;  %1435 = vmatpush1.msra.mxu1 %v3467_v41  ;;  %v4706_v41 = vld [vmem:[#allocation39_spill] sm:$0xff] }
 0x271   :  { %1365 = vmatprep.subr.mxu0 %v3611_v38  ;;  %1436 = vmatprep.subr.mxu1 %v3476_v44  ;;  %v4707_v44 = vmov 0.0  }
 0x272   :  { %1366 = vmatpush1.msra.mxu0 %v3614_v40  ;;  %1437 = vmatpush1.msra.mxu1 %v3480_v46  ;;  %v4708_v46 = vld [vmem:[#allocation30_spill] sm:$0xff] }
 0x273   :  { %1367 = vmatprep.subr.mxu0 %v3618_v42  ;;  %1438 = vmatprep.subr.mxu1 %v4668_v62  ;;  %v4002_v62 = vld [vmem:[#allocation6 + $0x2d8] sm:$0xff] }
 0x274   :  { %1368 = vmatpush1.msra.mxu0 %v4669_v3  ;;  %1439 = vmatpush1.msra.mxu1 %v4670_v5  ;;  %4710 = vst [vmem:[#allocation18_spill] sm:$0xff] %v4002_v62 }
 0x275   :  { %1369 = vmatprep.subr.mxu0 %v4671_v8  ;;  %1440 = vmatprep.subr.mxu1 %v4672_v47  ;;  %v4711_v47 = vld [vmem:[#allocation63_spill] sm:$0xff] }
 0x276   :  { %1370 = vmatpush1.msra.mxu0 %v4694_v14  ;;  %1441 = vmatpush1.msra.mxu1 %v4695_v17 }
 0x277   :  { %1371 = vmatprep.subr.mxu0 %v4696_v19  ;;  %1442 = vmatprep.subr.mxu1 %v4697_v21 }
 0x278   :  { %1372 = vmatpush1.msra.mxu0 %v4698_v24  ;;  %1443 = vmatpush1.msra.mxu1 %v4699_v27 }
 0x279   :  { %1373 = vmatprep.subr.mxu0 %v4700_v28  ;;  %1444 = vmatprep.subr.mxu1 %v4701_v30 }
 0x27a   :  { %1374 = vmatpush1.msra.mxu0 %v4702_v32  ;;  %1445 = vmatpush1.msra.mxu1 %v4703_v35 }
 0x27b   :  { %1375 = vmatprep.subr.mxu0 %v4704_v37  ;;  %1446 = vmatprep.subr.mxu1 %v4705_v39 }
 0x27c   :  { %1376 = vmatpush1.msra.mxu0 %v4706_v41  ;;  %1409 = vmatprep.mubr.f32.mxu0 %v4707_v44 }
 0x27d   :  { %1447 = vmatpush1.msra.mxu1 %v4708_v46  ;;  %1480 = vmatprep.mubr.f32.mxu1 %v4707_v44 }
 0x27e   :  { %1509 = vmatprep.subr.mxu0 %v4709_v0  ;;  %1580 = vmatprep.subr.mxu1 %v4002_v62 }
 0x31d   :  { %v1247_v5 = vpop.f32.mrf.mxu0  ;;  %v1318_v48 = vpop.f32.mrf.mxu1 }
 0x31e   :  { %v1323_v53 = vadd.f32 %v1247_v5, %v4711_v47  ;;  %v1325_v7 = vadd.f32 %v1318_v48, %v4713_v15  ;;  %v4728_v15 = vld [vmem:[#allocation51_spill] sm:$0xff] }
 0x31f   :  { %v1249_v60 = vpop.f32.mrf.mxu0  ;;  %v1320_v57 = vpop.f32.mrf.mxu1 }
 0x320   :  { %v1327_v12 = vmul.f32 0.5, %v1323_v53  ;;  %v1324_v59 = vadd.f32 %v1249_v60, %v4712_v50  ;;  %v1326_v9 = vadd.f32 %v1320_v57, %v4714_v4  ;;  %v4727_v50 = vld [vmem:[#allocation66_spill] sm:$0xff]  ;;  %v4729_v4 = vld [vmem:[#allocation52_spill] sm:$0xff] }
 0x322   :  { %3081 = vtanh.f32 %v1327_v12  ;;  %v1331_v10 = vmul.f32 0.5, %v1324_v59  ;;  %v1336_v43 = vmul.f32 0.5, %v1326_v9 }
 0x324   :  { %3083 = vtanh.f32 %v1331_v10 }
 0x325   :  { %3085 = vtanh.f32 %v1325_v7 }
 0x326   :  { %3087 = vtanh.f32 %v1336_v43 }
 0x32f   :  { %v3082_v45 = vpop.eup %3081 }
 0x330   :  { %v1329_v55 = vadd.f32 1.0, %v3082_v45 }
 0x331   :  { %v3084_v17 = vpop.eup %3083 }
 0x332   :  { %v1330_v21 = vmul.f32 0.5, %v1329_v55  ;;  %v1333_v27 = vadd.f32 1.0, %v3084_v17  ;;  %v3086_v30 = vpop.eup %3085 }
 0x333   :  { %v3088_v5 = vpop.eup %3087 }
 0x334   :  { %v1334_v35 = vmul.f32 0.5, %v1333_v27  ;;  %v1341_v39 = vmul.f32 %v3086_v30, %v1330_v21  ;;  %v1338_v47 = vadd.f32 1.0, %v3088_v5 }
 0x336   :  { %v1340_v46 = vmul.f32 %v1334_v35, %v3924_v61  ;;  %v1339_v53 = vmul.f32 0.5, %v1338_v47  ;;  %v4120_v61 = vld [vmem:[#allocation6 + $0xf8] sm:$0xff] }
 0x337   :  { %4723 = vst [vmem:[#allocation61_spill] sm:$0xff] %v4120_v61 }
 0x338   :  { %v4010_v0 = vadd.f32 %v1341_v39, %v1340_v46 }
 0x33a   :  { %3089 = vtanh.f32 %v4010_v0 }
 0x347   :  { %v3090_v48 = vpop.eup %3089 }
 0x348   :  { %v1344_v60 = vmul.f32 %v3090_v48, %v1339_v53 }
 0x34a   :  { %1410 = vmatmul.mubr.f32.vlgmr.msra.gmra.mxu0 %v1344_v60  ;;  %1481 = vmatmul.mubr.f32.vlgmr.msra.gmra.mxu1 %v1344_v60 }
 0x34b   :  { %1510 = vmatpush1.msra.mxu0 %v3499_v52  ;;  %1581 = vmatpush1.msra.mxu1 %v3928_v1  ;;  %v4024_v52 = vld [vmem:[#allocation6 + $0x278] sm:$0xff] }
 0x34c   :  { %1511 = vmatprep.subr.mxu0 %v3506_v54  ;;  %1582 = vmatprep.subr.mxu1 %v3932_v34  ;;  %v4028_v54 = vld [vmem:[#allocation6 + $0x270] sm:$0xff] }
 0x34d   :  { %1512 = vmatpush1.msra.mxu0 %v3515_v56  ;;  %1583 = vmatpush1.msra.mxu1 %v3936_v49  ;;  %v4032_v56 = vld [vmem:[#allocation6 + $0x258] sm:$0xff] }
 0x34e   :  { %1513 = vmatprep.subr.mxu0 %v3523_v58  ;;  %1584 = vmatprep.subr.mxu1 %v3940_v51  ;;  %v4036_v58 = vld [vmem:[#allocation6 + $0x250] sm:$0xff] }
 0x34f   :  { %1514 = vmatpush1.msra.mxu0 %v3534_v63  ;;  %1585 = vmatpush1.msra.mxu1 %v3944_v2  ;;  %v4040_v63 = vld [vmem:[#allocation6 + $0x238] sm:$0xff] }
 0x350   :  { %1515 = vmatprep.subr.mxu0 %v3541_v6  ;;  %1586 = vmatprep.subr.mxu1 %v4024_v52  ;;  %v4044_v6 = vld [vmem:[#allocation6 + $0x230] sm:$0xff] }
 0x351   :  { %1516 = vmatpush1.msra.mxu0 %v3550_v11  ;;  %1587 = vmatpush1.msra.mxu1 %v4028_v54  ;;  %v4048_v11 = vld [vmem:[#allocation6 + $0x218] sm:$0xff] }
 0x352   :  { %1517 = vmatprep.subr.mxu0 %v3556_v13  ;;  %1588 = vmatprep.subr.mxu1 %v4032_v56  ;;  %v4052_v13 = vld [vmem:[#allocation6 + $0x210] sm:$0xff] }
 0x353   :  { %1518 = vmatpush1.msra.mxu0 %v3564_v18  ;;  %1589 = vmatpush1.msra.mxu1 %v4036_v58  ;;  %v4056_v18 = vld [vmem:[#allocation6 + $0x1f8] sm:$0xff] }
 0x354   :  { %1519 = vmatprep.subr.mxu0 %v3569_v20  ;;  %1590 = vmatprep.subr.mxu1 %v4040_v63  ;;  %v4060_v20 = vld [vmem:[#allocation6 + $0x1f0] sm:$0xff] }
 0x355   :  { %1520 = vmatpush1.msra.mxu0 %v3573_v22  ;;  %1591 = vmatpush1.msra.mxu1 %v4044_v6  ;;  %v4064_v22 = vld [vmem:[#allocation6 + $0x1d8] sm:$0xff] }
 0x356   :  { %1521 = vmatprep.subr.mxu0 %v3577_v25  ;;  %1592 = vmatprep.subr.mxu1 %v4048_v11  ;;  %v4068_v25 = vld [vmem:[#allocation6 + $0x1d0] sm:$0xff] }
 0x357   :  { %1522 = vmatpush1.msra.mxu0 %v3581_v16  ;;  %1593 = vmatpush1.msra.mxu1 %v4052_v13  ;;  %v4072_v16 = vld [vmem:[#allocation6 + $0x1b8] sm:$0xff] }
 0x358   :  { %1523 = vmatprep.subr.mxu0 %v3584_v23  ;;  %1594 = vmatprep.subr.mxu1 %v4056_v18  ;;  %v4076_v23 = vld [vmem:[#allocation6 + $0x1b0] sm:$0xff] }
 0x359   :  { %1524 = vmatpush1.msra.mxu0 %v3590_v29  ;;  %1595 = vmatpush1.msra.mxu1 %v4060_v20  ;;  %v4080_v29 = vld [vmem:[#allocation6 + $0x198] sm:$0xff] }
 0x35a   :  { %1525 = vmatprep.subr.mxu0 %v3594_v31  ;;  %1596 = vmatprep.subr.mxu1 %v4064_v22  ;;  %v4084_v31 = vld [vmem:[#allocation6 + $0x190] sm:$0xff] }
 0x35b   :  { %1526 = vmatpush1.msra.mxu0 %v3597_v33  ;;  %1597 = vmatpush1.msra.mxu1 %v4068_v25  ;;  %v4088_v33 = vld [vmem:[#allocation6 + $0x178] sm:$0xff] }
 0x35c   :  { %1527 = vmatprep.subr.mxu0 %v3601_v36  ;;  %1598 = vmatprep.subr.mxu1 %v4072_v16  ;;  %4715 = vst [vmem:[#allocation19_spill] sm:$0xff] %v4088_v33  ;;  %v4092_v36 = vld [vmem:[#allocation6 + $0x170] sm:$0xff] }
 0x35d   :  { %1528 = vmatpush1.msra.mxu0 %v3607_v26  ;;  %1599 = vmatpush1.msra.mxu1 %v4076_v23  ;;  %4716 = vst [vmem:[#allocation20_spill] sm:$0xff] %v4092_v36  ;;  %v4096_v26 = vld [vmem:[#allocation6 + $0x158] sm:$0xff] }
 0x35e   :  { %1529 = vmatprep.subr.mxu0 %v3611_v38  ;;  %1600 = vmatprep.subr.mxu1 %v4080_v29  ;;  %4717 = vst [vmem:[#allocation31_spill] sm:$0xff] %v4096_v26  ;;  %v4100_v38 = vld [vmem:[#allocation6 + $0x150] sm:$0xff] }
 0x35f   :  { %1530 = vmatpush1.msra.mxu0 %v3614_v40  ;;  %1601 = vmatpush1.msra.mxu1 %v4084_v31  ;;  %4718 = vst [vmem:[#allocation22_spill] sm:$0xff] %v4100_v38  ;;  %v4104_v40 = vld [vmem:[#allocation6 + $0x138] sm:$0xff] }
 0x360   :  { %1531 = vmatprep.subr.mxu0 %v3618_v42  ;;  %1602 = vmatprep.subr.mxu1 %v4088_v33  ;;  %4719 = vst [vmem:[#allocation32_spill] sm:$0xff] %v4104_v40  ;;  %v4108_v42 = vld [vmem:[#allocation6 + $0x130] sm:$0xff] }
 0x361   :  { %1532 = vmatpush1.msra.mxu0 %v4669_v3  ;;  %1603 = vmatpush1.msra.mxu1 %v4092_v36  ;;  %4720 = vst [vmem:[#allocation23_spill] sm:$0xff] %v4108_v42  ;;  %v4112_v3 = vld [vmem:[#allocation6 + $0x118] sm:$0xff] }
 0x362   :  { %1533 = vmatprep.subr.mxu0 %v4671_v8  ;;  %1604 = vmatprep.subr.mxu1 %v4096_v26  ;;  %4721 = vst [vmem:[#allocation17_spill] sm:$0xff] %v4112_v3  ;;  %v4116_v8 = vld [vmem:[#allocation6 + $0x110] sm:$0xff] }
 0x363   :  { %1534 = vmatpush1.msra.mxu0 %v4694_v14  ;;  %1605 = vmatpush1.msra.mxu1 %v4100_v38  ;;  %4722 = vst [vmem:[#allocation59_spill] sm:$0xff] %v4116_v8  ;;  %v4125_v14 = vld [vmem:[#allocation6 + $0xf0] sm:$0xff] }
 0x364   :  { %1535 = vmatprep.subr.mxu0 %v4696_v19  ;;  %1606 = vmatprep.subr.mxu1 %v4104_v40  ;;  %4724 = vst [vmem:[#allocation45_spill] sm:$0xff] %v4125_v14  ;;  %v4129_v19 = vld [vmem:[#allocation6 + $0x2c8] sm:$0xff] }
 0x365   :  { %1536 = vmatpush1.msra.mxu0 %v4698_v24  ;;  %1607 = vmatpush1.msra.mxu1 %v4108_v42  ;;  %4725 = vst [vmem:[#allocation46_spill] sm:$0xff] %v4129_v19 }
 0x366   :  { %1537 = vmatprep.subr.mxu0 %v4700_v28  ;;  %1608 = vmatprep.subr.mxu1 %v4112_v3  ;;  %v4726_v28 = vld [vmem:[#allocation65_spill] sm:$0xff] }
 0x367   :  { %1538 = vmatpush1.msra.mxu0 %v4702_v32  ;;  %1609 = vmatpush1.msra.mxu1 %v4116_v8 }
 0x368   :  { %1539 = vmatprep.subr.mxu0 %v4704_v37  ;;  %1610 = vmatprep.subr.mxu1 %v4120_v61 }
 0x369   :  { %1540 = vmatpush1.msra.mxu0 %v4706_v41  ;;  %1573 = vmatprep.mubr.f32.mxu0 %v4707_v44 }
 0x36a   :  { %1611 = vmatpush1.msra.mxu1 %v4125_v14  ;;  %1644 = vmatprep.mubr.f32.mxu1 %v4707_v44 }
 0x36b   :  { %1673 = vmatprep.subr.mxu0 %v4129_v19  ;;  %1744 = vmatprep.subr.mxu1 %v4002_v62 }
 0x40a   :  { %v1411_v24 = vpop.f32.mrf.mxu0  ;;  %v1482_v37 = vpop.f32.mrf.mxu1 }
 0x40b   :  { %v1487_v32 = vadd.f32 %v1411_v24, %v4726_v28  ;;  %v1489_v7 = vadd.f32 %v1482_v37, %v4728_v15  ;;  %v4141_v28 = vld [vmem:[#allocation6 + $0x2c0] sm:$0xff]  ;;  %v4153_v37 = vld [vmem:[#allocation6 + $0x288] sm:$0xff] }
 0x40c   :  { %v1413_v12 = vpop.f32.mrf.mxu0  ;;  %v1484_v57 = vpop.f32.mrf.mxu1  ;;  %v4173_v15 = vld [vmem:[#allocation6 + $0x240] sm:$0xff] }
 0x40d   :  { %v1491_v41 = vmul.f32 0.5, %v1487_v32  ;;  %v1488_v59 = vadd.f32 %v1413_v12, %v4727_v50  ;;  %v1490_v9 = vadd.f32 %v1484_v57, %v4729_v4  ;;  %v4145_v32 = vld [vmem:[#allocation6 + $0x2a8] sm:$0xff]  ;;  %v4157_v12 = vld [vmem:[#allocation6 + $0x280] sm:$0xff] }
 0x40e   :  { %v4165_v50 = vld [vmem:[#allocation6 + $0x260] sm:$0xff]  ;;  %v4185_v57 = vld [vmem:[#allocation6 + $0x208] sm:$0xff] }
 0x40f   :  { %3091 = vtanh.f32 %v1491_v41  ;;  %v1495_v10 = vmul.f32 0.5, %v1488_v59  ;;  %v1500_v43 = vmul.f32 0.5, %v1490_v9  ;;  %v4161_v41 = vld [vmem:[#allocation6 + $0x268] sm:$0xff]  ;;  %v4189_v4 = vld [vmem:[#allocation6 + $0x200] sm:$0xff] }
 0x410   :  { %v4169_v59 = vld [vmem:[#allocation6 + $0x248] sm:$0xff] }
 0x411   :  { %3093 = vtanh.f32 %v1495_v10  ;;  %v4181_v10 = vld [vmem:[#allocation6 + $0x220] sm:$0xff]  ;;  %v4193_v9 = vld [vmem:[#allocation6 + $0x1e8] sm:$0xff] }
 0x412   :  { %3095 = vtanh.f32 %v1489_v7  ;;  %v4177_v7 = vld [vmem:[#allocation6 + $0x228] sm:$0xff] }
 0x413   :  { %3097 = vtanh.f32 %v1500_v43  ;;  %v4197_v43 = vld [vmem:[#allocation6 + $0x1e0] sm:$0xff] }
 0x41c   :  { %v3092_v45 = vpop.eup %3091 }
 0x41d   :  { %v1493_v55 = vadd.f32 1.0, %v3092_v45  ;;  %v4201_v45 = vld [vmem:[#allocation6 + $0x1c8] sm:$0xff] }
 0x41e   :  { %v3094_v17 = vpop.eup %3093 }
 0x41f   :  { %v1494_v21 = vmul.f32 0.5, %v1493_v55  ;;  %v1497_v27 = vadd.f32 1.0, %v3094_v17  ;;  %v3096_v30 = vpop.eup %3095  ;;  %v4205_v55 = vld [vmem:[#allocation6 + $0x1c0] sm:$0xff]  ;;  %v4209_v17 = vld [vmem:[#allocation6 + $0x1a8] sm:$0xff] }
 0x420   :  { %v3098_v47 = vpop.eup %3097 }
 0x421   :  { %v1498_v35 = vmul.f32 0.5, %v1497_v27  ;;  %v1505_v39 = vmul.f32 %v3096_v30, %v1494_v21  ;;  %v1502_v53 = vadd.f32 1.0, %v3098_v47  ;;  %v4213_v21 = vld [vmem:[#allocation6 + $0x1a0] sm:$0xff]  ;;  %v4217_v27 = vld [vmem:[#allocation6 + $0x188] sm:$0xff] }
 0x422   :  { %v4221_v30 = vld [vmem:[#allocation6 + $0x180] sm:$0xff] }
 0x423   :  { %v1504_v46 = vmul.f32 %v1498_v35, %v4010_v0  ;;  %v1503_v48 = vmul.f32 0.5, %v1502_v53  ;;  %v4149_v0 = vld [vmem:[#allocation6 + $0x2a0] sm:$0xff]  ;;  %v4225_v35 = vld [vmem:[#allocation6 + $0x168] sm:$0xff] }
 0x424   :  { %v4237_v47 = vld [vmem:[#allocation6 + $0x140] sm:$0xff]  ;;  %v4241_v53 = vld [vmem:[#allocation6 + $0x128] sm:$0xff] }
 0x425   :  { %v4138_v5 = vadd.f32 %v1505_v39, %v1504_v46  ;;  %v4229_v39 = vld [vmem:[#allocation6 + $0x160] sm:$0xff]  ;;  %v4233_v46 = vld [vmem:[#allocation6 + $0x148] sm:$0xff]  ;;  %4732 = vst [vmem:[#allocation34_spill] sm:$0xff] %v4237_v47  ;;  %4733 = vst [vmem:[#allocation25_spill] sm:$0xff] %v4241_v53 }
 0x426   :  { %4730 = vst [vmem:[#allocation33_spill] sm:$0xff] %v4229_v39  ;;  %4731 = vst [vmem:[#allocation24_spill] sm:$0xff] %v4233_v46 }
 0x427   :  { %3099 = vtanh.f32 %v4138_v5 }
 0x434   :  { %v3100_v60 = vpop.eup %3099 }
 0x435   :  { %v1508_v24 = vmul.f32 %v3100_v60, %v1503_v48  ;;  %v4245_v48 = vld [vmem:[#allocation6 + $0x120] sm:$0xff]  ;;  %v4249_v60 = vld [vmem:[#allocation6 + $0x108] sm:$0xff] }
 0x436   :  { %4734 = vst [vmem:[#allocation35_spill] sm:$0xff] %v4245_v48  ;;  %4735 = vst [vmem:[#allocation26_spill] sm:$0xff] %v4249_v60 }
 0x437   :  { %1574 = vmatmul.mubr.f32.vlgmr.msra.gmra.mxu0 %v1508_v24  ;;  %1645 = vmatmul.mubr.f32.vlgmr.msra.gmra.mxu1 %v1508_v24  ;;  %v4253_v24 = vld [vmem:[#allocation6 + $0x100] sm:$0xff] }
 0x438   :  { %1674 = vmatpush1.msra.mxu0 %v4141_v28  ;;  %1745 = vmatpush1.msra.mxu1 %v3928_v1  ;;  %4736 = vst [vmem:[#allocation36_spill] sm:$0xff] %v4253_v24 }
 0x439   :  { %1675 = vmatprep.subr.mxu0 %v4145_v32  ;;  %1746 = vmatprep.subr.mxu1 %v3932_v34 }
 0x43a   :  { %1676 = vmatpush1.msra.mxu0 %v4149_v0  ;;  %1747 = vmatpush1.msra.mxu1 %v3936_v49 }
 0x43b   :  { %1677 = vmatprep.subr.mxu0 %v4153_v37  ;;  %1748 = vmatprep.subr.mxu1 %v3940_v51 }
 0x43c   :  { %1678 = vmatpush1.msra.mxu0 %v4157_v12  ;;  %1749 = vmatpush1.msra.mxu1 %v3944_v2 }
 0x43d   :  { %1679 = vmatprep.subr.mxu0 %v4161_v41  ;;  %1750 = vmatprep.subr.mxu1 %v4024_v52 }
 0x43e   :  { %1680 = vmatpush1.msra.mxu0 %v4165_v50  ;;  %1751 = vmatpush1.msra.mxu1 %v4028_v54 }
 0x43f   :  { %1681 = vmatprep.subr.mxu0 %v4169_v59  ;;  %1752 = vmatprep.subr.mxu1 %v4032_v56 }
 0x440   :  { %1682 = vmatpush1.msra.mxu0 %v4173_v15  ;;  %1753 = vmatpush1.msra.mxu1 %v4036_v58 }
 0x441   :  { %1683 = vmatprep.subr.mxu0 %v4177_v7  ;;  %1754 = vmatprep.subr.mxu1 %v4040_v63 }
 0x442   :  { %1684 = vmatpush1.msra.mxu0 %v4181_v10  ;;  %1755 = vmatpush1.msra.mxu1 %v4044_v6 }
 0x443   :  { %1685 = vmatprep.subr.mxu0 %v4185_v57  ;;  %1756 = vmatprep.subr.mxu1 %v4048_v11 }
 0x444   :  { %1686 = vmatpush1.msra.mxu0 %v4189_v4  ;;  %1757 = vmatpush1.msra.mxu1 %v4052_v13 }
 0x445   :  { %1687 = vmatprep.subr.mxu0 %v4193_v9  ;;  %1758 = vmatprep.subr.mxu1 %v4056_v18 }
 0x446   :  { %1688 = vmatpush1.msra.mxu0 %v4197_v43  ;;  %1759 = vmatpush1.msra.mxu1 %v4060_v20 }
 0x447   :  { %1689 = vmatprep.subr.mxu0 %v4201_v45  ;;  %1760 = vmatprep.subr.mxu1 %v4064_v22 }
 0x448   :  { %1690 = vmatpush1.msra.mxu0 %v4205_v55  ;;  %1761 = vmatpush1.msra.mxu1 %v4068_v25 }
 0x449   :  { %1691 = vmatprep.subr.mxu0 %v4209_v17  ;;  %1762 = vmatprep.subr.mxu1 %v4072_v16 }
 0x44a   :  { %1692 = vmatpush1.msra.mxu0 %v4213_v21  ;;  %1763 = vmatpush1.msra.mxu1 %v4076_v23 }
 0x44b   :  { %1693 = vmatprep.subr.mxu0 %v4217_v27  ;;  %1764 = vmatprep.subr.mxu1 %v4080_v29 }
 0x44c   :  { %1694 = vmatpush1.msra.mxu0 %v4221_v30  ;;  %1765 = vmatpush1.msra.mxu1 %v4084_v31 }
 0x44d   :  { %1695 = vmatprep.subr.mxu0 %v4225_v35  ;;  %1766 = vmatprep.subr.mxu1 %v4088_v33 }
 0x44e   :  { %1696 = vmatpush1.msra.mxu0 %v4229_v39  ;;  %1767 = vmatpush1.msra.mxu1 %v4092_v36 }
 0x44f   :  { %1697 = vmatprep.subr.mxu0 %v4233_v46  ;;  %1768 = vmatprep.subr.mxu1 %v4096_v26 }
 0x450   :  { %1698 = vmatpush1.msra.mxu0 %v4237_v47  ;;  %1769 = vmatpush1.msra.mxu1 %v4100_v38 }
 0x451   :  { %1699 = vmatprep.subr.mxu0 %v4241_v53  ;;  %1770 = vmatprep.subr.mxu1 %v4104_v40  ;;  %v4257_v53 = vld [vmem:[#allocation6 + $0xe8] sm:$0xff] }
 0x452   :  { %1700 = vmatpush1.msra.mxu0 %v4245_v48  ;;  %1771 = vmatpush1.msra.mxu1 %v4108_v42  ;;  %4737 = vst [vmem:[#allocation27_spill] sm:$0xff] %v4257_v53  ;;  %v4261_v48 = vld [vmem:[#allocation6 + $0xe0] sm:$0xff]  ;;  %v4740_v42 = vld [vmem:[#allocation68_spill] sm:$0xff] }
 0x453   :  { %1701 = vmatprep.subr.mxu0 %v4249_v60  ;;  %1772 = vmatprep.subr.mxu1 %v4112_v3  ;;  %4738 = vst [vmem:[#allocation37_spill] sm:$0xff] %v4261_v48 }
 0x454   :  { %1702 = vmatpush1.msra.mxu0 %v4253_v24  ;;  %1773 = vmatpush1.msra.mxu1 %v4116_v8  ;;  %v4739_v24 = vld [vmem:[#allocation67_spill] sm:$0xff] }
 0x455   :  { %1703 = vmatprep.subr.mxu0 %v4257_v53  ;;  %1774 = vmatprep.subr.mxu1 %v4120_v61 }
 0x456   :  { %1704 = vmatpush1.msra.mxu0 %v4261_v48  ;;  %1737 = vmatprep.mubr.f32.mxu0 %v4707_v44  ;;  %v4741_v48 = vld [vmem:[#allocation53_spill] sm:$0xff] }
 0x457   :  { %1775 = vmatpush1.msra.mxu1 %v4125_v14  ;;  %1808 = vmatprep.mubr.f32.mxu1 %v4707_v44  ;;  %v4742_v44 = vld [vmem:[#allocation54_spill] sm:$0xff] }
 0x458   :  { %1837 = vmatprep.subr.mxu0 %v4129_v19  ;;  %1908 = vmatprep.subr.mxu1 %v4002_v62 }
 0x4f7   :  { %v1575_v8 = vpop.f32.mrf.mxu0  ;;  %v1646_v53 = vpop.f32.mrf.mxu1 }
 0x4f8   :  { %v1651_v3 = vadd.f32 %v1575_v8, %v4739_v24  ;;  %v1653_v38 = vadd.f32 %v1646_v53, %v4741_v48  ;;  %v4751_v53 = vld [vmem:[#allocation32_spill] sm:$0xff]  ;;  %v4752_v48 = vld [vmem:[#allocation35_spill] sm:$0xff] }
 0x4f9   :  { %v1577_v60 = vpop.f32.mrf.mxu0  ;;  %v1648_v14 = vpop.f32.mrf.mxu1 }
 0x4fa   :  { %v1655_v61 = vmul.f32 0.5, %v1651_v3  ;;  %v1652_v40 = vadd.f32 %v1577_v60, %v4740_v42  ;;  %v1654_v26 = vadd.f32 %v1648_v14, %v4742_v44  ;;  %v4746_v14 = vld [vmem:[#allocation24_spill] sm:$0xff]  ;;  %v4753_v60 = vld [vmem:[#allocation23_spill] sm:$0xff] }
 0x4fc   :  { %3101 = vtanh.f32 %v1655_v61  ;;  %v1659_v47 = vmul.f32 0.5, %v1652_v40  ;;  %v1664_v19 = vmul.f32 0.5, %v1654_v26 }
 0x4fe   :  { %3103 = vtanh.f32 %v1659_v47 }
 0x4ff   :  { %3105 = vtanh.f32 %v1653_v38 }
 0x500   :  { %3107 = vtanh.f32 %v1664_v19  ;;  %v4747_v19 = vld [vmem:[#allocation31_spill] sm:$0xff] }
 0x509   :  { %v3102_v46 = vpop.eup %3101 }
 0x50a   :  { %v1657_v62 = vadd.f32 1.0, %v3102_v46  ;;  %v4750_v46 = vld [vmem:[#allocation25_spill] sm:$0xff] }
 0x50b   :  { %v3104_v36 = vpop.eup %3103 }
 0x50c   :  { %v1658_v39 = vmul.f32 0.5, %v1657_v62  ;;  %v1661_v8 = vadd.f32 1.0, %v3104_v36  ;;  %v3106_v24 = vpop.eup %3105  ;;  %v4743_v62 = vld [vmem:[#allocation19_spill] sm:$0xff]  ;;  %v4745_v36 = vld [vmem:[#allocation20_spill] sm:$0xff] }
 0x50d   :  { %v3108_v38 = vpop.eup %3107 }
 0x50e   :  { %v1662_v3 = vmul.f32 0.5, %v1661_v8  ;;  %v1669_v33 = vmul.f32 %v3106_v24, %v1658_v39  ;;  %v1666_v40 = vadd.f32 1.0, %v3108_v38  ;;  %v4749_v39 = vld [vmem:[#allocation22_spill] sm:$0xff]  ;;  %v4755_v24 = vld [vmem:[#allocation17_spill] sm:$0xff]  ;;  %v4758_v38 = vld [vmem:[#allocation27_spill] sm:$0xff] }
 0x50f   :  { %v4754_v8 = vld [vmem:[#allocation26_spill] sm:$0xff] }
 0x510   :  { %v1668_v42 = vmul.f32 %v1662_v3, %v4138_v5  ;;  %v1667_v47 = vmul.f32 0.5, %v1666_v40  ;;  %v4748_v5 = vld [vmem:[#allocation34_spill] sm:$0xff]  ;;  %v4756_v3 = vld [vmem:[#allocation36_spill] sm:$0xff]  ;;  %v4759_v40 = vld [vmem:[#allocation61_spill] sm:$0xff] }
 0x512   :  { %v4274_v61 = vadd.f32 %v1669_v33, %v1668_v42  ;;  %v4744_v33 = vld [vmem:[#allocation33_spill] sm:$0xff]  ;;  %v4757_v42 = vld [vmem:[#allocation59_spill] sm:$0xff] }
 0x514   :  { %3109 = vtanh.f32 %v4274_v61 }
 0x521   :  { %v3110_v44 = vpop.eup %3109 }
 0x522   :  { %v1672_v26 = vmul.f32 %v3110_v44, %v1667_v47  ;;  %v4760_v47 = vld [vmem:[#allocation37_spill] sm:$0xff]  ;;  %v4761_v44 = vmov 0.0  }
 0x524   :  { %1738 = vmatmul.mubr.f32.vlgmr.msra.gmra.mxu0 %v1672_v26  ;;  %1809 = vmatmul.mubr.f32.vlgmr.msra.gmra.mxu1 %v1672_v26  ;;  %v4762_v26 = vld [vmem:[#allocation45_spill] sm:$0xff] }
 0x525   :  { %1838 = vmatpush1.msra.mxu0 %v4141_v28  ;;  %1909 = vmatpush1.msra.mxu1 %v3928_v1 }
 0x526   :  { %1839 = vmatprep.subr.mxu0 %v4145_v32  ;;  %1910 = vmatprep.subr.mxu1 %v3932_v34 }
 0x527   :  { %1840 = vmatpush1.msra.mxu0 %v4149_v0  ;;  %1911 = vmatpush1.msra.mxu1 %v3936_v49 }
 0x528   :  { %1841 = vmatprep.subr.mxu0 %v4153_v37  ;;  %1912 = vmatprep.subr.mxu1 %v3940_v51 }
 0x529   :  { %1842 = vmatpush1.msra.mxu0 %v4157_v12  ;;  %1913 = vmatpush1.msra.mxu1 %v3944_v2 }
 0x52a   :  { %1843 = vmatprep.subr.mxu0 %v4161_v41  ;;  %1914 = vmatprep.subr.mxu1 %v4024_v52 }
 0x52b   :  { %1844 = vmatpush1.msra.mxu0 %v4165_v50  ;;  %1915 = vmatpush1.msra.mxu1 %v4028_v54 }
 0x52c   :  { %1845 = vmatprep.subr.mxu0 %v4169_v59  ;;  %1916 = vmatprep.subr.mxu1 %v4032_v56 }
 0x52d   :  { %1846 = vmatpush1.msra.mxu0 %v4173_v15  ;;  %1917 = vmatpush1.msra.mxu1 %v4036_v58 }
 0x52e   :  { %1847 = vmatprep.subr.mxu0 %v4177_v7  ;;  %1918 = vmatprep.subr.mxu1 %v4040_v63 }
 0x52f   :  { %1848 = vmatpush1.msra.mxu0 %v4181_v10  ;;  %1919 = vmatpush1.msra.mxu1 %v4044_v6 }
 0x530   :  { %1849 = vmatprep.subr.mxu0 %v4185_v57  ;;  %1920 = vmatprep.subr.mxu1 %v4048_v11 }
 0x531   :  { %1850 = vmatpush1.msra.mxu0 %v4189_v4  ;;  %1921 = vmatpush1.msra.mxu1 %v4052_v13 }
 0x532   :  { %1851 = vmatprep.subr.mxu0 %v4193_v9  ;;  %1922 = vmatprep.subr.mxu1 %v4056_v18 }
 0x533   :  { %1852 = vmatpush1.msra.mxu0 %v4197_v43  ;;  %1923 = vmatpush1.msra.mxu1 %v4060_v20 }
 0x534   :  { %1853 = vmatprep.subr.mxu0 %v4201_v45  ;;  %1924 = vmatprep.subr.mxu1 %v4064_v22 }
 0x535   :  { %1854 = vmatpush1.msra.mxu0 %v4205_v55  ;;  %1925 = vmatpush1.msra.mxu1 %v4068_v25 }
 0x536   :  { %1855 = vmatprep.subr.mxu0 %v4209_v17  ;;  %1926 = vmatprep.subr.mxu1 %v4072_v16 }
 0x537   :  { %1856 = vmatpush1.msra.mxu0 %v4213_v21  ;;  %1927 = vmatpush1.msra.mxu1 %v4076_v23 }
 0x538   :  { %1857 = vmatprep.subr.mxu0 %v4217_v27  ;;  %1928 = vmatprep.subr.mxu1 %v4080_v29 }
 0x539   :  { %1858 = vmatpush1.msra.mxu0 %v4221_v30  ;;  %1929 = vmatpush1.msra.mxu1 %v4084_v31 }
 0x53a   :  { %1859 = vmatprep.subr.mxu0 %v4225_v35  ;;  %1930 = vmatprep.subr.mxu1 %v4743_v62 }
 0x53b   :  { %1860 = vmatpush1.msra.mxu0 %v4744_v33  ;;  %1931 = vmatpush1.msra.mxu1 %v4745_v36 }
 0x53c   :  { %1861 = vmatprep.subr.mxu0 %v4746_v14  ;;  %1932 = vmatprep.subr.mxu1 %v4747_v19 }
 0x53d   :  { %1862 = vmatpush1.msra.mxu0 %v4748_v5  ;;  %1933 = vmatpush1.msra.mxu1 %v4749_v39 }
 0x53e   :  { %1863 = vmatprep.subr.mxu0 %v4750_v46  ;;  %1934 = vmatprep.subr.mxu1 %v4751_v53  ;;  %v4766_v46 = vld [vmem:[#allocation70_spill] sm:$0xff] }
 0x53f   :  { %1864 = vmatpush1.msra.mxu0 %v4752_v48  ;;  %1935 = vmatpush1.msra.mxu1 %v4753_v60  ;;  %v4763_v60 = vld [vmem:[#allocation46_spill] sm:$0xff] }
 0x540   :  { %1865 = vmatprep.subr.mxu0 %v4754_v8  ;;  %1936 = vmatprep.subr.mxu1 %v4755_v24  ;;  %v4764_v8 = vld [vmem:[#allocation18_spill] sm:$0xff] }
 0x541   :  { %1866 = vmatpush1.msra.mxu0 %v4756_v3  ;;  %1937 = vmatpush1.msra.mxu1 %v4757_v42  ;;  %v4765_v3 = vld [vmem:[#allocation69_spill] sm:$0xff] }
 0x542   :  { %1867 = vmatprep.subr.mxu0 %v4758_v38  ;;  %1938 = vmatprep.subr.mxu1 %v4759_v40 }
 0x543   :  { %1868 = vmatpush1.msra.mxu0 %v4760_v47  ;;  %1901 = vmatprep.mubr.f32.mxu0 %v4761_v44  ;;  %v4767_v47 = vld [vmem:[#allocation55_spill] sm:$0xff] }
 0x544   :  { %1939 = vmatpush1.msra.mxu1 %v4762_v26  ;;  %1972 = vmatprep.mubr.f32.mxu1 %v4761_v44  ;;  %v4768_v44 = vld [vmem:[#allocation56_spill] sm:$0xff] }
 0x545   :  { %2001 = vmatprep.subr.mxu0 %v4763_v60  ;;  %2072 = vmatprep.subr.mxu1 %v4764_v8 }
 0x5e4   :  { %v1739_v24 = vpop.f32.mrf.mxu0  ;;  %v1810_v42 = vpop.f32.mrf.mxu1 }
 0x5e5   :  { %v1815_v48 = vadd.f32 %v1739_v24, %v4765_v3  ;;  %v1817_v39 = vadd.f32 %v1810_v42, %v4767_v47 }
 0x5e6   :  { %v1741_v53 = vpop.f32.mrf.mxu0  ;;  %v1812_v26 = vpop.f32.mrf.mxu1 }
 0x5e7   :  { %v1819_v38 = vmul.f32 0.5, %v1815_v48  ;;  %v1816_v40 = vadd.f32 %v1741_v53, %v4766_v46  ;;  %v1818_v19 = vadd.f32 %v1812_v26, %v4768_v44 }
 0x5e9   :  { %3111 = vtanh.f32 %v1819_v38  ;;  %v1823_v5 = vmul.f32 0.5, %v1816_v40  ;;  %v1828_v60 = vmul.f32 0.5, %v1818_v19 }
 0x5eb   :  { %3113 = vtanh.f32 %v1823_v5 }
 0x5ec   :  { %3115 = vtanh.f32 %v1817_v39 }
 0x5ed   :  { %3117 = vtanh.f32 %v1828_v60 }
 0x5f6   :  { %v3112_v14 = vpop.eup %3111 }
 0x5f7   :  { %v1821_v8 = vadd.f32 1.0, %v3112_v14 }
 0x5f8   :  { %v3114_v36 = vpop.eup %3113 }
 0x5f9   :  { %v1822_v33 = vmul.f32 0.5, %v1821_v8  ;;  %v1825_v24 = vadd.f32 1.0, %v3114_v36  ;;  %v3116_v3 = vpop.eup %3115 }
 0x5fa   :  { %v3118_v5 = vpop.eup %3117 }
 0x5fb   :  { %v1826_v48 = vmul.f32 0.5, %v1825_v24  ;;  %v1833_v62 = vmul.f32 %v3116_v3, %v1822_v33  ;;  %v1830_v39 = vadd.f32 1.0, %v3118_v5 }
 0x5fd   :  { %v1832_v46 = vmul.f32 %v1826_v48, %v4274_v61  ;;  %v1831_v42 = vmul.f32 0.5, %v1830_v39 }
 0x5ff   :  { %v4348_v53 = vadd.f32 %v1833_v62, %v1832_v46 }
 0x601   :  { %3119 = vtanh.f32 %v4348_v53 }
 0x60e   :  { %v3120_v38 = vpop.eup %3119 }
 0x60f   :  { %v1836_v19 = vmul.f32 %v3120_v38, %v1831_v42 }
 0x611   :  { %1902 = vmatmul.mubr.f32.vlgmr.msra.gmra.mxu0 %v1836_v19  ;;  %1973 = vmatmul.mubr.f32.vlgmr.msra.gmra.mxu1 %v1836_v19 }
 0x612   :  { %2002 = vmatpush1.msra.mxu0 %v4141_v28  ;;  %2073 = vmatpush1.msra.mxu1 %v3928_v1  ;;  %v4769_v1 = vld [vmem:[#allocation19_spill] sm:$0xff] }
 0x613   :  { %2003 = vmatprep.subr.mxu0 %v4145_v32  ;;  %2074 = vmatprep.subr.mxu1 %v3932_v34  ;;  %v4770_v34 = vld [vmem:[#allocation33_spill] sm:$0xff]  ;;  %v4789_v28 = vld [vmem:[#allocation71_spill] sm:$0xff] }
 0x614   :  { %2004 = vmatpush1.msra.mxu0 %v4149_v0  ;;  %2075 = vmatpush1.msra.mxu1 %v3936_v49  ;;  %v4771_v49 = vld [vmem:[#allocation20_spill] sm:$0xff] }
 0x615   :  { %2005 = vmatprep.subr.mxu0 %v4153_v37  ;;  %2076 = vmatprep.subr.mxu1 %v3940_v51  ;;  %v4772_v51 = vld [vmem:[#allocation24_spill] sm:$0xff] }
 0x616   :  { %2006 = vmatpush1.msra.mxu0 %v4157_v12  ;;  %2077 = vmatpush1.msra.mxu1 %v3944_v2  ;;  %v4773_v2 = vld [vmem:[#allocation31_spill] sm:$0xff] }
 0x617   :  { %2007 = vmatprep.subr.mxu0 %v4161_v41  ;;  %2078 = vmatprep.subr.mxu1 %v4024_v52  ;;  %v4774_v52 = vld [vmem:[#allocation34_spill] sm:$0xff]  ;;  %v4790_v41 = vld [vmem:[#allocation72_spill] sm:$0xff] }
 0x618   :  { %2008 = vmatpush1.msra.mxu0 %v4165_v50  ;;  %2079 = vmatpush1.msra.mxu1 %v4028_v54  ;;  %v4775_v54 = vld [vmem:[#allocation22_spill] sm:$0xff] }
 0x619   :  { %2009 = vmatprep.subr.mxu0 %v4169_v59  ;;  %2080 = vmatprep.subr.mxu1 %v4032_v56  ;;  %v4776_v56 = vld [vmem:[#allocation25_spill] sm:$0xff] }
 0x61a   :  { %2010 = vmatpush1.msra.mxu0 %v4173_v15  ;;  %2081 = vmatpush1.msra.mxu1 %v4036_v58  ;;  %v4777_v58 = vld [vmem:[#allocation32_spill] sm:$0xff]  ;;  %v4791_v59 = vld [vmem:[#allocation57_spill] sm:$0xff] }
 0x61b   :  { %2011 = vmatprep.subr.mxu0 %v4177_v7  ;;  %2082 = vmatprep.subr.mxu1 %v4040_v63  ;;  %v4778_v63 = vld [vmem:[#allocation35_spill] sm:$0xff] }
 0x61c   :  { %2012 = vmatpush1.msra.mxu0 %v4181_v10  ;;  %2083 = vmatpush1.msra.mxu1 %v4044_v6  ;;  %v4779_v6 = vld [vmem:[#allocation23_spill] sm:$0xff] }
 0x61d   :  { %2013 = vmatprep.subr.mxu0 %v4185_v57  ;;  %2084 = vmatprep.subr.mxu1 %v4048_v11  ;;  %v4780_v11 = vld [vmem:[#allocation26_spill] sm:$0xff] }
 0x61e   :  { %2014 = vmatpush1.msra.mxu0 %v4189_v4  ;;  %2085 = vmatpush1.msra.mxu1 %v4052_v13  ;;  %v4781_v13 = vld [vmem:[#allocation17_spill] sm:$0xff]  ;;  %v4792_v57 = vld [vmem:[#allocation58_spill] sm:$0xff] }
 0x61f   :  { %2015 = vmatprep.subr.mxu0 %v4193_v9  ;;  %2086 = vmatprep.subr.mxu1 %v4056_v18  ;;  %v4782_v18 = vld [vmem:[#allocation36_spill] sm:$0xff] }
 0x620   :  { %2016 = vmatpush1.msra.mxu0 %v4197_v43  ;;  %2087 = vmatpush1.msra.mxu1 %v4060_v20  ;;  %v4783_v20 = vld [vmem:[#allocation59_spill] sm:$0xff] }
 0x621   :  { %2017 = vmatprep.subr.mxu0 %v4201_v45  ;;  %2088 = vmatprep.subr.mxu1 %v4064_v22  ;;  %v4784_v22 = vld [vmem:[#allocation27_spill] sm:$0xff] }
 0x622   :  { %2018 = vmatpush1.msra.mxu0 %v4205_v55  ;;  %2089 = vmatpush1.msra.mxu1 %v4068_v25  ;;  %v4785_v25 = vld [vmem:[#allocation61_spill] sm:$0xff] }
 0x623   :  { %2019 = vmatprep.subr.mxu0 %v4209_v17  ;;  %2090 = vmatprep.subr.mxu1 %v4072_v16  ;;  %v4786_v16 = vld [vmem:[#allocation37_spill] sm:$0xff] }
 0x624   :  { %2020 = vmatpush1.msra.mxu0 %v4213_v21  ;;  %2091 = vmatpush1.msra.mxu1 %v4076_v23  ;;  %v4787_v23 = vmov 0.0  }
 0x625   :  { %2021 = vmatprep.subr.mxu0 %v4217_v27  ;;  %2092 = vmatprep.subr.mxu1 %v4080_v29  ;;  %v4788_v29 = vld [vmem:[#allocation45_spill] sm:$0xff] }
 0x626   :  { %2022 = vmatpush1.msra.mxu0 %v4221_v30  ;;  %2093 = vmatpush1.msra.mxu1 %v4084_v31 }
 0x627   :  { %2023 = vmatprep.subr.mxu0 %v4225_v35  ;;  %2094 = vmatprep.subr.mxu1 %v4769_v1 }
 0x628   :  { %2024 = vmatpush1.msra.mxu0 %v4770_v34  ;;  %2095 = vmatpush1.msra.mxu1 %v4771_v49 }
 0x629   :  { %2025 = vmatprep.subr.mxu0 %v4772_v51  ;;  %2096 = vmatprep.subr.mxu1 %v4773_v2 }
 0x62a   :  { %2026 = vmatpush1.msra.mxu0 %v4774_v52  ;;  %2097 = vmatpush1.msra.mxu1 %v4775_v54 }
 0x62b   :  { %2027 = vmatprep.subr.mxu0 %v4776_v56  ;;  %2098 = vmatprep.subr.mxu1 %v4777_v58 }
 0x62c   :  { %2028 = vmatpush1.msra.mxu0 %v4778_v63  ;;  %2099 = vmatpush1.msra.mxu1 %v4779_v6 }
 0x62d   :  { %2029 = vmatprep.subr.mxu0 %v4780_v11  ;;  %2100 = vmatprep.subr.mxu1 %v4781_v13 }
 0x62e   :  { %2030 = vmatpush1.msra.mxu0 %v4782_v18  ;;  %2101 = vmatpush1.msra.mxu1 %v4783_v20 }
 0x62f   :  { %2031 = vmatprep.subr.mxu0 %v4784_v22  ;;  %2102 = vmatprep.subr.mxu1 %v4785_v25 }
 0x630   :  { %2032 = vmatpush1.msra.mxu0 %v4786_v16  ;;  %2065 = vmatprep.mubr.f32.mxu0 %v4787_v23 }
 0x631   :  { %2103 = vmatpush1.msra.mxu1 %v4788_v29  ;;  %2136 = vmatprep.mubr.f32.mxu1 %v4787_v23 }
 0x6d1   :  { %v1903_v31 = vpop.f32.mrf.mxu0  ;;  %v1974_v0 = vpop.f32.mrf.mxu1 }
 0x6d2   :  { %v1979_v32 = vadd.f32 %v1903_v31, %v4789_v28  ;;  %v1981_v15 = vadd.f32 %v1974_v0, %v4791_v59 }
 0x6d3   :  { %v1905_v37 = vpop.f32.mrf.mxu0  ;;  %v1976_v10 = vpop.f32.mrf.mxu1 }
 0x6d4   :  { %v1983_v12 = vmul.f32 0.5, %v1979_v32  ;;  %v1980_v50 = vadd.f32 %v1905_v37, %v4790_v41  ;;  %v1982_v4 = vadd.f32 %v1976_v10, %v4792_v57 }
 0x6d6   :  { %3121 = vtanh.f32 %v1983_v12  ;;  %v1987_v7 = vmul.f32 0.5, %v1980_v50  ;;  %v1992_v9 = vmul.f32 0.5, %v1982_v4 }
 0x6d8   :  { %3123 = vtanh.f32 %v1987_v7 }
 0x6d9   :  { %3125 = vtanh.f32 %v1981_v15 }
 0x6da   :  { %3127 = vtanh.f32 %v1992_v9 }
 0x6e3   :  { %v3122_v43 = vpop.eup %3121 }
 0x6e4   :  { %v1985_v45 = vadd.f32 1.0, %v3122_v43 }
 0x6e5   :  { %v3124_v55 = vpop.eup %3123 }
 0x6e6   :  { %v1986_v17 = vmul.f32 0.5, %v1985_v45  ;;  %v1989_v21 = vadd.f32 1.0, %v3124_v55  ;;  %v3126_v27 = vpop.eup %3125 }
 0x6e7   :  { %v3128_v33 = vpop.eup %3127 }
 0x6e8   :  { %v1990_v30 = vmul.f32 0.5, %v1989_v21  ;;  %v1997_v35 = vmul.f32 %v3126_v27, %v1986_v17  ;;  %v1994_v36 = vadd.f32 1.0, %v3128_v33 }
 0x6ea   :  { %v1996_v61 = vmul.f32 %v1990_v30, %v4348_v53  ;;  %v1995_v14 = vmul.f32 0.5, %v1994_v36 }
 0x6ec   :  { %v1998_v62 = vadd.f32 %v1997_v35, %v1996_v61 }
 0x6ee   :  { %3129 = vtanh.f32 %v1998_v62 }
 0x6fb   :  { %v3130_v40 = vpop.eup %3129 }
 0x6fc   :  { %v2000_v47 = vmul.f32 %v3130_v40, %v1995_v14 }
 0x6fe   :  { %2066 = vmatmul.mubr.f32.vlgmr.msra.gmra.mxu0 %v2000_v47  ;;  %2137 = vmatmul.mubr.f32.vlgmr.msra.gmra.mxu1 %v2000_v47 }
 0x6ff   :  { %3264 = shalt.err (!%p3261_p0)  }
 0x700   :  { %62 = dma.hbm_to_vmem [thread:$0]  %s4504_s6, 17408, %s60_s14, [#allocation3]  ;;  %v4793_v26 = vld [vmem:[#allocation73_spill] sm:$0xff]  ;;  %v4794_v48 = vld [vmem:[#allocation74_spill] sm:$0xff]  ;;  %v4795_v53 = vld [vmem:[#allocation60_spill] sm:$0xff] }
 0x701   :  { %v4796_v38 = vld [vmem:[#allocation62_spill] sm:$0xff] }
 0x7be   :  { %v2067_v44 = vpop.f32.mrf.mxu0  ;;  %v2138_v8 = vpop.f32.mrf.mxu1 }
 0x7bf   :  { %v2143_v60 = vadd.f32 %v2067_v44, %v4793_v26  ;;  %v2145_v5 = vadd.f32 %v2138_v8, %v4795_v53 }
 0x7c0   :  { %v2069_v24 = vpop.f32.mrf.mxu0  ;;  %v2140_v42 = vpop.f32.mrf.mxu1 }
 0x7c1   :  { %v2147_v3 = vmul.f32 0.5, %v2143_v60  ;;  %v2144_v46 = vadd.f32 %v2069_v24, %v4794_v48  ;;  %v2146_v19 = vadd.f32 %v2140_v42, %v4796_v38 }
 0x7c3   :  { %3131 = vtanh.f32 %v2147_v3  ;;  %v2151_v39 = vmul.f32 0.5, %v2144_v46  ;;  %v2156_v1 = vmul.f32 0.5, %v2146_v19 }
 0x7c5   :  { %3133 = vtanh.f32 %v2151_v39 }
 0x7c6   :  { %3135 = vtanh.f32 %v2145_v5 }
 0x7c7   :  { %3137 = vtanh.f32 %v2156_v1 }
 0x7d0   :  { %v3132_v34 = vpop.eup %3131 }
 0x7d1   :  { %v2149_v49 = vadd.f32 1.0, %v3132_v34 }
 0x7d2   :  { %v3134_v51 = vpop.eup %3133 }
 0x7d3   :  { %v2150_v2 = vmul.f32 0.5, %v2149_v49  ;;  %v2153_v52 = vadd.f32 1.0, %v3134_v51  ;;  %v3136_v54 = vpop.eup %3135 }
 0x7d4   :  { %v3138_v11 = vpop.eup %3137 }
 0x7d5   :  { %v2154_v56 = vmul.f32 0.5, %v2153_v52  ;;  %v2161_v58 = vmul.f32 %v3136_v54, %v2150_v2  ;;  %v2158_v13 = vadd.f32 1.0, %v3138_v11 }
 0x7d7   :  { %v2160_v63 = vmul.f32 %v2154_v56, %v1998_v62  ;;  %v2159_v18 = vmul.f32 0.5, %v2158_v13 }
 0x7d9   :  { %v2162_v6 = vadd.f32 %v2161_v58, %v2160_v63 }
 0x7db   :  { %3139 = vtanh.f32 %v2162_v6 }
 0x7e8   :  { %v3140_v20 = vpop.eup %3139 }
 0x7e9   :  { %v4427_v22 = vmul.f32 %v3140_v20, %v2159_v18 }
 0x7ea   :  { %3269 = dma.done.wait [#allocation3], 17408 }
 0x7eb   :  { %3270 = vsyncadd [#allocation3], 4294949888  ;;  %2963 = vmatprep.subr.mxu0 %v4787_v23  ;;  %2995 = vmatprep.mubr.msk.f32.mxu0 %vm3278_vm0, %v4787_v23  ;;  %v4797_v25 = vld [vmem:[#allocation41_spill] sm:$0xff]  ;;  %v2286_v32 = vld [vmem:[#allocation2 + $0x3b0] sm:$0xff]  ;;  %vm2374_vm3 = vcmask 523264  }
 0x7ec   :  { %v4798_v16 = vmax.f32 %v4797_v25, 0.0  ;;  %v2287_v29 = vld [vmem:[#allocation2 + $0x3b8] sm:$0xff]  ;;  %v2198_v0 = vld [vmem:[#allocation2 + $0xf0] sm:$0xff]  ;;  %v2285_v12 = vld [vmem:[#allocation2 + $0x3a8] sm:$0xff] }
 0x7ed   :  { %v2199_v31 = vld [vmem:[#allocation2 + $0xf8] sm:$0xff]  ;;  %2964 = vmatpush3.msra.mxu0 %v2287_v29  ;;  %v2182_v37 = vld [vmem:[#allocation2 + $0x70] sm:$0xff]  ;;  %v2197_v41 = vld [vmem:[#allocation2 + $0xe8] sm:$0xff] }
 0x7ee   :  { %2442 = vmatprep.mubr.f32.mxu1 %v4798_v16  ;;  %v2183_v28 = vld [vmem:[#allocation2 + $0x78] sm:$0xff]  ;;  %2815 = vmatprep.subr.mxu1 %v2199_v31  ;;  %v2181_v50 = vld [vmem:[#allocation2 + $0x68] sm:$0xff]  ;;  %v2284_v59 = vld [vmem:[#allocation2 + $0x3a0] sm:$0xff] }
 0x7ef   :  { %2965 = vmatprep.subr.mxu0 %v4787_v23  ;;  %2816 = vmatpush3.msra.mxu1 %v2183_v28  ;;  %v2196_v15 = vld [vmem:[#allocation2 + $0xe0] sm:$0xff]  ;;  %v2283_v10 = vld [vmem:[#allocation2 + $0x398] sm:$0xff]  ;;  %v2282_v9 = vld [vmem:[#allocation2 + $0x390] sm:$0xff] }
 0x7f0   :  { %2966 = vmatpush3.msra.mxu0 %v2286_v32  ;;  %2817 = vmatprep.subr.mxu1 %v2198_v0  ;;  %v2180_v7 = vld [vmem:[#allocation2 + $0x60] sm:$0xff]  ;;  %v2195_v57 = vld [vmem:[#allocation2 + $0xd8] sm:$0xff]  ;;  %v2194_v43 = vld [vmem:[#allocation2 + $0xd0] sm:$0xff] }
 0x7f1   :  { %2967 = vmatprep.subr.mxu0 %v4787_v23  ;;  %2818 = vmatpush3.msra.mxu1 %v2182_v37  ;;  %v2179_v4 = vld [vmem:[#allocation2 + $0x58] sm:$0xff]  ;;  %v2178_v45 = vld [vmem:[#allocation2 + $0x50] sm:$0xff]  ;;  %v2281_v55 = vld [vmem:[#allocation2 + $0x388] sm:$0xff] }
 0x7f2   :  { %2968 = vmatpush3.msra.mxu0 %v2285_v12  ;;  %2819 = vmatprep.subr.mxu1 %v2197_v41  ;;  %v2193_v17 = vld [vmem:[#allocation2 + $0xc8] sm:$0xff]  ;;  %v2280_v27 = vld [vmem:[#allocation2 + $0x380] sm:$0xff]  ;;  %v2279_v61 = vld [vmem:[#allocation2 + $0x378] sm:$0xff] }
 0x7f3   :  { %2969 = vmatprep.subr.mxu0 %v4787_v23  ;;  %2820 = vmatpush3.msra.mxu1 %v2181_v50  ;;  %v2177_v21 = vld [vmem:[#allocation2 + $0x48] sm:$0xff]  ;;  %v2192_v30 = vld [vmem:[#allocation2 + $0xc0] sm:$0xff]  ;;  %v2191_v62 = vld [vmem:[#allocation2 + $0xb8] sm:$0xff] }
 0x7f4   :  { %2970 = vmatpush3.msra.mxu0 %v2284_v59  ;;  %2821 = vmatprep.subr.mxu1 %v2196_v15  ;;  %v2176_v35 = vld [vmem:[#allocation2 + $0x40] sm:$0xff]  ;;  %v2175_v33 = vld [vmem:[#allocation2 + $0x38] sm:$0xff]  ;;  %v2278_v36 = vld [vmem:[#allocation2 + $0x370] sm:$0xff] }
 0x7f5   :  { %2971 = vmatprep.subr.mxu0 %v4787_v23  ;;  %2822 = vmatpush3.msra.mxu1 %v2180_v7  ;;  %v2190_v14 = vld [vmem:[#allocation2 + $0xb0] sm:$0xff]  ;;  %v2277_v47 = vld [vmem:[#allocation2 + $0x368] sm:$0xff]  ;;  %v2276_v60 = vld [vmem:[#allocation2 + $0x360] sm:$0xff] }
 0x7f6   :  { %2972 = vmatpush3.msra.mxu0 %v2283_v10  ;;  %2823 = vmatprep.subr.mxu1 %v2195_v57  ;;  %v2174_v40 = vld [vmem:[#allocation2 + $0x30] sm:$0xff]  ;;  %v2189_v44 = vld [vmem:[#allocation2 + $0xa8] sm:$0xff]  ;;  %v2188_v8 = vld [vmem:[#allocation2 + $0xa0] sm:$0xff] }
 0x7f7   :  { %2973 = vmatprep.subr.mxu0 %v4787_v23  ;;  %2824 = vmatpush3.msra.mxu1 %v2179_v4  ;;  %v2173_v26 = vld [vmem:[#allocation2 + $0x28] sm:$0xff]  ;;  %v2172_v24 = vld [vmem:[#allocation2 + $0x20] sm:$0xff]  ;;  %v2275_v3 = vld [vmem:[#allocation2 + $0x358] sm:$0xff] }
 0x7f8   :  { %2974 = vmatpush3.msra.mxu0 %v2282_v9  ;;  %2825 = vmatprep.subr.mxu1 %v2194_v43  ;;  %v2187_v48 = vld [vmem:[#allocation2 + $0x98] sm:$0xff]  ;;  %v2274_v53 = vld [vmem:[#allocation2 + $0x350] sm:$0xff]  ;;  %v2273_v42 = vld [vmem:[#allocation2 + $0x348] sm:$0xff] }
 0x7f9   :  { %2975 = vmatprep.subr.mxu0 %v4787_v23  ;;  %2826 = vmatpush3.msra.mxu1 %v2178_v45  ;;  %v2171_v46 = vld [vmem:[#allocation2 + $0x18] sm:$0xff]  ;;  %v2186_v5 = vld [vmem:[#allocation2 + $0x90] sm:$0xff]  ;;  %v2185_v38 = vld [vmem:[#allocation2 + $0x88] sm:$0xff] }
 0x7fa   :  { %2976 = vmatpush3.msra.mxu0 %v2281_v55  ;;  %2827 = vmatprep.subr.mxu1 %v2193_v17  ;;  %v2170_v39 = vld [vmem:[#allocation2 + $0x10] sm:$0xff]  ;;  %v2169_v19 = vld [vmem:[#allocation2 + $0x8] sm:$0xff]  ;;  %v2272_v1 = vld [vmem:[#allocation2 + $0x340] sm:$0xff] }
 0x7fb   :  { %2977 = vmatprep.subr.mxu0 %v4787_v23  ;;  %2828 = vmatpush3.msra.mxu1 %v2177_v21  ;;  %v2184_v34 = vld [vmem:[#allocation2 + $0x80] sm:$0xff]  ;;  %v2231_v51 = vld [vmem:[#allocation2 + $0x1f8] sm:$0xff]  ;;  %v2230_v54 = vld [vmem:[#allocation2 + $0x1f0] sm:$0xff] }
 0x7fc   :  { %2978 = vmatpush3.msra.mxu0 %v2280_v27  ;;  %2829 = vmatprep.subr.mxu1 %v2192_v30  ;;  %v2168_v49 = vld [vmem:[#allocation2] sm:$0xff]  ;;  %v2215_v2 = vld [vmem:[#allocation2 + $0x178] sm:$0xff]  ;;  %v4799_v58 = vld [vmem:[#allocation40_spill] sm:$0xff] }
 0x7fd   :  { %2979 = vmatprep.subr.mxu0 %v4787_v23  ;;  %2830 = vmatpush3.msra.mxu1 %v2176_v35  ;;  %v2263_v52 = vld [vmem:[#allocation2 + $0x2f8] sm:$0xff]  ;;  %v4800_v63 = vmax.f32 %v4799_v58, 0.0  ;;  %v2214_v6 = vld [vmem:[#allocation2 + $0x170] sm:$0xff]  ;;  %v2229_v13 = vld [vmem:[#allocation2 + $0x1e8] sm:$0xff] }
 0x7fe   :  { %2980 = vmatpush3.msra.mxu0 %v2279_v61  ;;  %2831 = vmatprep.subr.mxu1 %v2191_v62  ;;  %v2247_v56 = vld [vmem:[#allocation2 + $0x278] sm:$0xff]  ;;  %v2262_v11 = vld [vmem:[#allocation2 + $0x2f0] sm:$0xff]  ;;  %v2213_v20 = vld [vmem:[#allocation2 + $0x168] sm:$0xff] }
 0x7ff   :  { %2981 = vmatprep.subr.mxu0 %v4787_v23  ;;  %2832 = vmatpush3.msra.mxu1 %v2175_v33  ;;  %v2246_v18 = vld [vmem:[#allocation2 + $0x270] sm:$0xff]  ;;  %v2261_v25 = vld [vmem:[#allocation2 + $0x2e8] sm:$0xff]  ;;  %v2212_v29 = vld [vmem:[#allocation2 + $0x160] sm:$0xff] }
 0x800   :  { %2982 = vmatpush3.msra.mxu0 %v2278_v36  ;;  %2833 = vmatprep.subr.mxu1 %v2190_v14  ;;  %v2245_v16 = vld [vmem:[#allocation2 + $0x268] sm:$0xff]  ;;  %v2260_v31 = vld [vmem:[#allocation2 + $0x2e0] sm:$0xff]  ;;  %v2227_v28 = vld [vmem:[#allocation2 + $0x1d8] sm:$0xff] }
 0x801   :  { %2983 = vmatprep.subr.mxu0 %v4787_v23  ;;  %2834 = vmatpush3.msra.mxu1 %v2174_v40  ;;  %v2244_v32 = vld [vmem:[#allocation2 + $0x260] sm:$0xff]  ;;  %v2211_v0 = vld [vmem:[#allocation2 + $0x158] sm:$0xff]  ;;  %v2226_v12 = vld [vmem:[#allocation2 + $0x1d0] sm:$0xff] }
 0x802   :  { %2984 = vmatpush3.msra.mxu0 %v2277_v47  ;;  %2835 = vmatprep.subr.mxu1 %v2189_v44  ;;  %v2259_v37 = vld [vmem:[#allocation2 + $0x2d8] sm:$0xff]  ;;  %v2210_v50 = vld [vmem:[#allocation2 + $0x150] sm:$0xff]  ;;  %v2225_v15 = vld [vmem:[#allocation2 + $0x1c8] sm:$0xff] }
 0x803   :  { %2985 = vmatprep.subr.mxu0 %v4787_v23  ;;  %2836 = vmatpush3.msra.mxu1 %v2173_v26  ;;  %v2243_v41 = vld [vmem:[#allocation2 + $0x258] sm:$0xff]  ;;  %v2258_v59 = vld [vmem:[#allocation2 + $0x2d0] sm:$0xff]  ;;  %v2209_v10 = vld [vmem:[#allocation2 + $0x148] sm:$0xff] }
 0x804   :  { %2986 = vmatpush3.msra.mxu0 %v2276_v60  ;;  %2837 = vmatprep.subr.mxu1 %v2188_v8  ;;  %v2242_v7 = vld [vmem:[#allocation2 + $0x250] sm:$0xff]  ;;  %v2257_v57 = vld [vmem:[#allocation2 + $0x2c8] sm:$0xff]  ;;  %v2224_v4 = vld [vmem:[#allocation2 + $0x1c0] sm:$0xff] }
 0x805   :  { %2987 = vmatprep.subr.mxu0 %v4787_v23  ;;  %2838 = vmatpush3.msra.mxu1 %v2172_v24  ;;  %v2241_v9 = vld [vmem:[#allocation2 + $0x248] sm:$0xff]  ;;  %v2208_v43 = vld [vmem:[#allocation2 + $0x140] sm:$0xff]  ;;  %v2223_v55 = vld [vmem:[#allocation2 + $0x1b8] sm:$0xff] }
 0x806   :  { %2988 = vmatpush3.msra.mxu0 %v2275_v3  ;;  %2839 = vmatprep.subr.mxu1 %v2187_v48  ;;  %v2256_v45 = vld [vmem:[#allocation2 + $0x2c0] sm:$0xff]  ;;  %v2207_v21 = vld [vmem:[#allocation2 + $0x138] sm:$0xff]  ;;  %v2222_v30 = vld [vmem:[#allocation2 + $0x1b0] sm:$0xff] }
 0x807   :  { %2989 = vmatprep.subr.mxu0 %v4787_v23  ;;  %2840 = vmatpush3.msra.mxu1 %v2171_v46  ;;  %v2240_v17 = vld [vmem:[#allocation2 + $0x240] sm:$0xff]  ;;  %v2255_v27 = vld [vmem:[#allocation2 + $0x2b8] sm:$0xff]  ;;  %v2206_v61 = vld [vmem:[#allocation2 + $0x130] sm:$0xff] }
 0x808   :  { %2990 = vmatpush3.msra.mxu0 %v2274_v53  ;;  %2841 = vmatprep.subr.mxu1 %v2186_v5  ;;  %v2239_v35 = vld [vmem:[#allocation2 + $0x238] sm:$0xff]  ;;  %v2254_v62 = vld [vmem:[#allocation2 + $0x2b0] sm:$0xff]  ;;  %v2221_v33 = vld [vmem:[#allocation2 + $0x1a8] sm:$0xff] }
 0x809   :  { %2991 = vmatprep.subr.mxu0 %v4787_v23  ;;  %2842 = vmatpush3.msra.mxu1 %v2170_v39  ;;  %v2238_v36 = vld [vmem:[#allocation2 + $0x230] sm:$0xff]  ;;  %v2205_v14 = vld [vmem:[#allocation2 + $0x128] sm:$0xff]  ;;  %v2220_v47 = vld [vmem:[#allocation2 + $0x1a0] sm:$0xff] }
 0x80a   :  { %2992 = vmatpush3.msra.mxu0 %v2273_v42  ;;  %2843 = vmatprep.subr.mxu1 %v2185_v38  ;;  %v2253_v40 = vld [vmem:[#allocation2 + $0x2a8] sm:$0xff]  ;;  %v2204_v26 = vld [vmem:[#allocation2 + $0x120] sm:$0xff]  ;;  %v2219_v8 = vld [vmem:[#allocation2 + $0x198] sm:$0xff] }
 0x80b   :  { %2993 = vmatprep.subr.mxu0 %v4787_v23  ;;  %2844 = vmatpush3.msra.mxu1 %v2169_v19  ;;  %v2237_v44 = vld [vmem:[#allocation2 + $0x228] sm:$0xff]  ;;  %v2252_v60 = vld [vmem:[#allocation2 + $0x2a0] sm:$0xff]  ;;  %v2203_v3 = vld [vmem:[#allocation2 + $0x118] sm:$0xff] }
 0x80c   :  { %2994 = vmatpush3.msra.mxu0 %v2272_v1  ;;  %2845 = vmatprep.subr.mxu1 %v2184_v34  ;;  %v2236_v24 = vld [vmem:[#allocation2 + $0x220] sm:$0xff]  ;;  %v2251_v48 = vld [vmem:[#allocation2 + $0x298] sm:$0xff]  ;;  %v2218_v46 = vld [vmem:[#allocation2 + $0x190] sm:$0xff] }
 0x80d   :  { %2996 = vmatmul.mubr.f32.vlgmr.msra.gmra.mxu0 %v4427_v22  ;;  %2846 = vmatpush3.msra.mxu1 %v2168_v49  ;;  %v2228_v22 = vld [vmem:[#allocation2 + $0x1e0] sm:$0xff]  ;;  %v2235_v53 = vld [vmem:[#allocation2 + $0x218] sm:$0xff]  ;;  %v2202_v5 = vld [vmem:[#allocation2 + $0x110] sm:$0xff] }
 0x80e   :  { %2850 = vmatprep.subr.mxu0 %v2231_v51  ;;  %2443 = vmatmul.mubr.f32.vlgmr.msra.gmra.mxu1 %v4800_v63  ;;  %v2250_v39 = vld [vmem:[#allocation2 + $0x290] sm:$0xff]  ;;  %v2217_v42 = vld [vmem:[#allocation2 + $0x188] sm:$0xff]  ;;  %v2216_v34 = vld [vmem:[#allocation2 + $0x180] sm:$0xff] }
 0x80f   :  { %2851 = vmatpush3.msra.mxu0 %v2215_v2  ;;  %2885 = vmatprep.subr.mxu1 %v2263_v52  ;;  %v2234_v38 = vld [vmem:[#allocation2 + $0x210] sm:$0xff]  ;;  %v2201_v19 = vld [vmem:[#allocation2 + $0x108] sm:$0xff]  ;;  %v2200_v49 = vld [vmem:[#allocation2 + $0x100] sm:$0xff] }
 0x810   :  { %2852 = vmatprep.subr.mxu0 %v2230_v54  ;;  %2886 = vmatpush3.msra.mxu1 %v2247_v56  ;;  %v2249_v1 = vld [vmem:[#allocation2 + $0x288] sm:$0xff]  ;;  %v2248_v2 = vld [vmem:[#allocation2 + $0x280] sm:$0xff]  ;;  %v4801_v52 = vld [vmem:[#allocation44_spill] sm:$0xff] }
 0x811   :  { %2853 = vmatpush3.msra.mxu0 %v2214_v6  ;;  %2887 = vmatprep.subr.mxu1 %v2262_v11  ;;  %v2233_v51 = vld [vmem:[#allocation2 + $0x208] sm:$0xff]  ;;  %v4802_v54 = vmax.f32 %v4801_v52, 0.0  ;;  %v2232_v56 = vld [vmem:[#allocation2 + $0x200] sm:$0xff]  ;;  %v2271_v58 = vld [vmem:[#allocation2 + $0x338] sm:$0xff] }
 0x812   :  { %2854 = vmatprep.subr.mxu0 %v2229_v13  ;;  %2888 = vmatpush3.msra.mxu1 %v2246_v18  ;;  %v4803_v63 = vld [vmem:[#allocation43_spill] sm:$0xff]  ;;  %v2270_v11 = vld [vmem:[#allocation2 + $0x330] sm:$0xff]  ;;  %v4805_v13 = vld [vmem:[#allocation50_spill] sm:$0xff] }
 0x813   :  { %2855 = vmatpush3.msra.mxu0 %v2213_v20  ;;  %2889 = vmatprep.subr.mxu1 %v2261_v25  ;;  %v4804_v6 = vmax.f32 %v4803_v63, 0.0  ;;  %v4806_v18 = vmax.f32 %v4805_v13, 0.0  ;;  %v4807_v20 = vld [vmem:[#allocation48_spill] sm:$0xff] }
 0x814   :  { %2856 = vmatprep.subr.mxu0 %v2228_v22  ;;  %2890 = vmatpush3.msra.mxu1 %v2245_v16  ;;  %v4808_v25 = vmax.f32 %v4807_v20, 0.0  ;;  %v2269_v22 = vld [vmem:[#allocation2 + $0x328] sm:$0xff]  ;;  %v2268_v16 = vld [vmem:[#allocation2 + $0x320] sm:$0xff] }
 0x815   :  { %2857 = vmatpush3.msra.mxu0 %v2212_v29  ;;  %2891 = vmatprep.subr.mxu1 %v2260_v31  ;;  %v2267_v29 = vld [vmem:[#allocation2 + $0x318] sm:$0xff]  ;;  %v2266_v31 = vld [vmem:[#allocation2 + $0x310] sm:$0xff] }
 0x816   :  { %2858 = vmatprep.subr.mxu0 %v2227_v28  ;;  %2892 = vmatpush3.msra.mxu1 %v2244_v32  ;;  %v2265_v28 = vld [vmem:[#allocation2 + $0x308] sm:$0xff]  ;;  %v2264_v32 = vld [vmem:[#allocation2 + $0x300] sm:$0xff] }
 0x817   :  { %2859 = vmatpush3.msra.mxu0 %v2211_v0  ;;  %2893 = vmatprep.subr.mxu1 %v2259_v37  ;;  %v4809_v0 = vld [vmem:[#allocation42_spill] sm:$0xff] }
 0x818   :  { %2860 = vmatprep.subr.mxu0 %v2226_v12  ;;  %2894 = vmatpush3.msra.mxu1 %v2243_v41  ;;  %v4810_v37 = vmax.f32 %v4809_v0, 0.0  ;;  %v2303_v12 = vld [vmem:[#allocation2 + $0x438] sm:$0xff]  ;;  %v2302_v41 = vld [vmem:[#allocation2 + $0x430] sm:$0xff] }
 0x819   :  { %2861 = vmatpush3.msra.mxu0 %v2210_v50  ;;  %2895 = vmatprep.subr.mxu1 %v2258_v59  ;;  %v2301_v50 = vld [vmem:[#allocation2 + $0x428] sm:$0xff]  ;;  %v2300_v59 = vld [vmem:[#allocation2 + $0x420] sm:$0xff] }
 0x81a   :  { %2862 = vmatprep.subr.mxu0 %v2225_v15  ;;  %2896 = vmatpush3.msra.mxu1 %v2242_v7  ;;  %v2299_v15 = vld [vmem:[#allocation2 + $0x418] sm:$0xff]  ;;  %v2298_v7 = vld [vmem:[#allocation2 + $0x410] sm:$0xff] }
 0x81b   :  { %2863 = vmatpush3.msra.mxu0 %v2209_v10  ;;  %2897 = vmatprep.subr.mxu1 %v2257_v57  ;;  %v2297_v10 = vld [vmem:[#allocation2 + $0x408] sm:$0xff]  ;;  %v2296_v57 = vld [vmem:[#allocation2 + $0x400] sm:$0xff] }
 0x81c   :  { %2864 = vmatprep.subr.mxu0 %v2224_v4  ;;  %2898 = vmatpush3.msra.mxu1 %v2241_v9  ;;  %v2295_v4 = vld [vmem:[#allocation2 + $0x3f8] sm:$0xff]  ;;  %v2294_v9 = vld [vmem:[#allocation2 + $0x3f0] sm:$0xff] }
 0x81d   :  { %2865 = vmatpush3.msra.mxu0 %v2208_v43  ;;  %2899 = vmatprep.subr.mxu1 %v2256_v45  ;;  %v2293_v43 = vld [vmem:[#allocation2 + $0x3e8] sm:$0xff]  ;;  %v2292_v45 = vld [vmem:[#allocation2 + $0x3e0] sm:$0xff] }
 0x81e   :  { %2866 = vmatprep.subr.mxu0 %v2223_v55  ;;  %2900 = vmatpush3.msra.mxu1 %v2240_v17  ;;  %v2291_v55 = vld [vmem:[#allocation2 + $0x3d8] sm:$0xff]  ;;  %v2290_v17 = vld [vmem:[#allocation2 + $0x3d0] sm:$0xff] }
 0x81f   :  { %2867 = vmatpush3.msra.mxu0 %v2207_v21  ;;  %2901 = vmatprep.subr.mxu1 %v2255_v27  ;;  %v2289_v21 = vld [vmem:[#allocation2 + $0x3c8] sm:$0xff]  ;;  %v2288_v27 = vld [vmem:[#allocation2 + $0x3c0] sm:$0xff] }
 0x820   :  { %2868 = vmatprep.subr.mxu0 %v2222_v30  ;;  %2902 = vmatpush3.msra.mxu1 %v2239_v35 }
 0x821   :  { %2869 = vmatpush3.msra.mxu0 %v2206_v61  ;;  %2903 = vmatprep.subr.mxu1 %v2254_v62 }
 0x822   :  { %2870 = vmatprep.subr.mxu0 %v2221_v33  ;;  %2904 = vmatpush3.msra.mxu1 %v2238_v36 }
 0x823   :  { %2871 = vmatpush3.msra.mxu0 %v2205_v14  ;;  %2905 = vmatprep.subr.mxu1 %v2253_v40 }
 0x824   :  { %2872 = vmatprep.subr.mxu0 %v2220_v47  ;;  %2906 = vmatpush3.msra.mxu1 %v2237_v44 }
 0x825   :  { %2873 = vmatpush3.msra.mxu0 %v2204_v26  ;;  %2907 = vmatprep.subr.mxu1 %v2252_v60 }
 0x826   :  { %2874 = vmatprep.subr.mxu0 %v2219_v8  ;;  %2908 = vmatpush3.msra.mxu1 %v2236_v24 }
 0x827   :  { %2875 = vmatpush3.msra.mxu0 %v2203_v3  ;;  %2909 = vmatprep.subr.mxu1 %v2251_v48 }
 0x828   :  { %2876 = vmatprep.subr.mxu0 %v2218_v46  ;;  %2910 = vmatpush3.msra.mxu1 %v2235_v53 }
 0x829   :  { %2877 = vmatpush3.msra.mxu0 %v2202_v5  ;;  %2911 = vmatprep.subr.mxu1 %v2250_v39  ;;  %v2738_v39 = vld [vmem:[%s4500_s2] sm:$0xff] }
 0x82a   :  { %2878 = vmatprep.subr.mxu0 %v2217_v42  ;;  %2912 = vmatpush3.msra.mxu1 %v2234_v38  ;;  %vm2739_vm4 = vcmp.ne.s32.totalorder %v2738_v39, 0  ;;  %v4812_v38 = vld [vmem:[#allocation16_spill] sm:$0xff] }
 0x82b   :  { %2879 = vmatpush3.msra.mxu0 %v2201_v19  ;;  %2913 = vmatprep.subr.mxu1 %v2249_v1 }
 0x82c   :  { %2880 = vmatprep.subr.mxu0 %v2216_v34  ;;  %2512 = vmatprep.mubr.f32.mxu0 %v4802_v54 }
 0x82d   :  { %2881 = vmatpush3.msra.mxu0 %v2200_v49  ;;  %2914 = vmatpush3.msra.mxu1 %v2233_v51 }
 0x82e   :  { %2513 = vmatmul.mubr.f32.vlgmr.msra.gmra.mxu0 %v4804_v6  ;;  %2915 = vmatprep.subr.mxu1 %v2248_v2 }
 0x82f   :  { %2998 = vmatprep.subr.mxu0 %v4787_v23  ;;  %2916 = vmatpush3.msra.mxu1 %v2232_v56 }
 0x830   :  { %2582 = vmatprep.mubr.f32.mxu1 %v4806_v18  ;;  %2999 = vmatpush3.msra.mxu0 %v2271_v58 }
 0x831   :  { %2583 = vmatmul.mubr.f32.vlgmr.msra.gmra.mxu1 %v4808_v25  ;;  %3000 = vmatprep.subr.mxu0 %v4787_v23 }
 0x832   :  { %3001 = vmatpush3.msra.mxu0 %v2270_v11  ;;  %3014 = vmatprep.mubr.msk.f32.mxu0 %vm3278_vm0, %v4787_v23 }
 0x833   :  { %3002 = vmatprep.subr.mxu0 %v4787_v23  ;;  %3017 = vmatprep.subr.mxu1 %v4787_v23 }
 0x834   :  { %3003 = vmatpush3.msra.mxu0 %v2269_v22  ;;  %3049 = vmatprep.mubr.msk.f32.mxu1 %vm3278_vm0, %v4787_v23 }
 0x835   :  { %3004 = vmatprep.subr.mxu0 %v4787_v23  ;;  %3018 = vmatpush3.msra.mxu1 %v2303_v12 }
 0x836   :  { %3005 = vmatpush3.msra.mxu0 %v2268_v16  ;;  %3019 = vmatprep.subr.mxu1 %v4787_v23 }
 0x837   :  { %3006 = vmatprep.subr.mxu0 %v4787_v23  ;;  %3020 = vmatpush3.msra.mxu1 %v2302_v41 }
 0x838   :  { %3007 = vmatpush3.msra.mxu0 %v2267_v29  ;;  %3021 = vmatprep.subr.mxu1 %v4787_v23 }
 0x839   :  { %3008 = vmatprep.subr.mxu0 %v4787_v23  ;;  %3022 = vmatpush3.msra.mxu1 %v2301_v50 }
 0x83a   :  { %3009 = vmatpush3.msra.mxu0 %v2266_v31  ;;  %3023 = vmatprep.subr.mxu1 %v4787_v23 }
 0x83b   :  { %3010 = vmatprep.subr.mxu0 %v4787_v23  ;;  %3024 = vmatpush3.msra.mxu1 %v2300_v59 }
 0x83c   :  { %3011 = vmatpush3.msra.mxu0 %v2265_v28  ;;  %3025 = vmatprep.subr.mxu1 %v4787_v23 }
 0x83d   :  { %3012 = vmatprep.subr.mxu0 %v4787_v23  ;;  %3026 = vmatpush3.msra.mxu1 %v2299_v15 }
 0x83e   :  { %3013 = vmatpush3.msra.mxu0 %v2264_v32  ;;  %3027 = vmatprep.subr.mxu1 %v4787_v23 }
 0x83f   :  { %3015 = vmatmul.mubr.msk.f32.vlgmr.msra.gmra.mxu0 %vm2374_vm3, %v4810_v37  ;;  %3028 = vmatpush3.msra.mxu1 %v2298_v7 }
 0x840   :  { %3029 = vmatprep.subr.mxu1 %v4787_v23 }
 0x841   :  { %3030 = vmatpush3.msra.mxu1 %v2297_v10 }
 0x842   :  { %3031 = vmatprep.subr.mxu1 %v4787_v23 }
 0x843   :  { %3032 = vmatpush3.msra.mxu1 %v2296_v57 }
 0x844   :  { %3033 = vmatprep.subr.mxu1 %v4787_v23 }
 0x845   :  { %3034 = vmatpush3.msra.mxu1 %v2295_v4 }
 0x846   :  { %3035 = vmatprep.subr.mxu1 %v4787_v23 }
 0x847   :  { %3036 = vmatpush3.msra.mxu1 %v2294_v9 }
 0x848   :  { %3037 = vmatprep.subr.mxu1 %v4787_v23 }
 0x849   :  { %3038 = vmatpush3.msra.mxu1 %v2293_v43 }
 0x84a   :  { %3039 = vmatprep.subr.mxu1 %v4787_v23 }
 0x84b   :  { %3040 = vmatpush3.msra.mxu1 %v2292_v45 }
 0x84c   :  { %3041 = vmatprep.subr.mxu1 %v4787_v23 }
 0x84d   :  { %3042 = vmatpush3.msra.mxu1 %v2291_v55 }
 0x84e   :  { %3043 = vmatprep.subr.mxu1 %v4787_v23 }
 0x84f   :  { %3044 = vmatpush3.msra.mxu1 %v2290_v17 }
 0x850   :  { %3045 = vmatprep.subr.mxu1 %v4787_v23 }
 0x851   :  { %3046 = vmatpush3.msra.mxu1 %v2289_v21 }
 0x852   :  { %3047 = vmatprep.subr.mxu1 %v4787_v23  ;;  %v4811_v23 = vld [vmem:[#allocation15_spill] sm:$0xff] }
 0x853   :  { %3048 = vmatpush3.msra.mxu1 %v2288_v27 }
 0x8cd   :  { %v2370_v30 = vpop.f32.mrf.mxu0 }
 0x8ce   :  { %v2847_v61 = vpop.f32.mrf.mxu1 }
 0x8cf   :  { %v2997_v35 = vpop.f32.mrf.mxu0 }
 0x8d0   :  { %v2848_v33 = vpop.f32.mrf.mxu1 }
 0x8d1   :  { %v2849_v40 = vadd.f32 %v2848_v33, %v2847_v61 }
 0x8d3   :  { %v2445_v26 = vadd.f32 %v2849_v40, %v2370_v30 }
 0x8ee   :  { %v2882_v62 = vpop.f32.mrf.mxu0 }
 0x8f0   :  { %v2883_v36 = vpop.f32.mrf.mxu0 }
 0x8f1   :  { %v2917_v14 = vpop.f32.mrf.mxu1  ;;  %v2884_v47 = vadd.f32 %v2883_v36, %v2882_v62 }
 0x8f3   :  { %v2918_v44 = vpop.f32.mrf.mxu1  ;;  %v2515_v60 = vadd.f32 %v2884_v47, %v2445_v26 }
 0x8f4   :  { %v2919_v8 = vadd.f32 %v2918_v44, %v2917_v14 }
 0x8f6   :  { %v2585_v24 = vadd.f32 %v2919_v8, %v2515_v60 }
 0x8ff   :  { %v2654_v3 = vpop.f32.mrf.mxu0 }
 0x900   :  { %v2655_v48 = vadd.f32 %v2654_v3, %v2585_v24 }
 0x901   :  { %v3016_v46 = vpop.f32.mrf.mxu0 }
 0x902   :  { %v2662_v53 = vadd.f32 %v4811_v23, %v2655_v48 }
 0x904   :  { %v2663_v5 = vmax.f32 %v2662_v53, 0.0 }
 0x906   :  { %3050 = vmatmul.mubr.f32.vlgmr.msra.gmra.mxu1 %v2663_v5 }
 0x9c6   :  { %v2734_v42 = vpop.f32.mrf.mxu1 }
 0x9c7   :  { %v2735_v19 = vadd.f32 %v4812_v38, %v2734_v42 }
 0x9c8   :  { %v3051_v1 = vpop.f32.mrf.mxu1 }
 0x9c9   :  { %v2740_v34 = vsel %vm2739_vm4, %v2735_v19, -inf }
 0x9ca   :  { %2741 = vst [vmem:[%s4505_s7] sm:$0xff] %v2740_v34 }
 0x9cb   :  { %2746 = vsyncpa [#allocation5], 1 }
 0x9cc   :  { %2747 = vsyncpa [#allocation7], 1 }
 0x9cd   :  { %2748 = vsyncmov [#allocation3] }
 0x9d0   :  { %s2749_s0 = vpop.sfrf %2748 }
 0x9d1   :  { %p2789_p1 = scmp.ne.s32.totalorder %s2749_s0, 0 }
 0x9d3   :  { %2753 = shalt.err (%p2789_p1)  }

</bundles_post_ra>
